<compile_context>
chip_gen: v7x
topology: tpu7x:2x2x1
jax: 0.10.0
libtpu: 0.0.40
codegen_flags: <defaults>
</compile_context>

<pallas_src>
import functools

import jax
import jax.numpy as jnp
import numpy as np
from jax.experimental import pallas as pl
from jax.experimental.pallas import tpu as pltpu

EPS = 1e-5      # nn.BatchNorm2d default eps
LANES = 128

_PARALLEL = pltpu.CompilerParams(dimension_semantics=("parallel",))


def _round_up(v, m):
    return (v + m - 1) // m * m


# ---------------------------------------------------------------------------
# In-kernel helpers
# ---------------------------------------------------------------------------
def _reshape_rows(v, ho, wo, cp):
    # Collapse (ho, wo, cp) -> (ho*wo, cp).  When wo is not a whole number of bf16
    # sublane tiles, go via f32 so the collapse never crosses a packed-tile boundary.
    if v.dtype == jnp.bfloat16 and wo % 16 != 0:
        return v.astype(jnp.float32).reshape(ho * wo, cp).astype(jnp.bfloat16)
    return v.reshape(ho * wo, cp)


def _accum_taps(x_ref, w_ref, taps, ho, wo, cp):
    # 9 shifted bf16 matmuls accumulated in f32 (replaces HBM im2col).
    coutp = w_ref.shape[-1]
    acc = jnp.zeros((ho * wo, coutp), jnp.float32)
    for t, (rh, rw, co) in enumerate(taps):
        lhs = _reshape_rows(x_ref[0, rh:rh + ho, rw:rw + wo, co:co + cp], ho, wo, cp)
        acc = acc + jnp.dot(lhs, w_ref[t], preferred_element_type=jnp.float32)
    return acc


def _stats_rows(acc, coutp):
    # per-block sum / sum-of-squares for the cross-block BN reduction (single sweep).
    s1 = jnp.sum(acc, axis=0, keepdims=True)
    s2 = jnp.sum(acc * acc, axis=0, keepdims=True)
    return jnp.concatenate([s1, s2, jnp.zeros((6, coutp), jnp.float32)], axis=0)


# ---------------------------------------------------------------------------
# Pallas kernels
# ---------------------------------------------------------------------------
def _conv_stats_kernel(x_ref, w_ref, y_ref, st_ref, *, taps, ho, wo, cp):
    coutp = w_ref.shape[-1]
    acc = _accum_taps(x_ref, w_ref, taps, ho, wo, cp)
    y_ref[0] = acc
    st_ref[0] = _stats_rows(acc, coutp)


def _conv_shortcut_stats_kernel(x_ref, w_ref, ws_ref, y_ref, ys_ref, st_ref, sts_ref, *,
                                taps, sc_tap, ho, wo, cp):
    # conv1 + fused 1x1 projection shortcut (10th matmul rides in MXU slack).
    coutp = w_ref.shape[-1]
    acc = _accum_taps(x_ref, w_ref, taps, ho, wo, cp)
    y_ref[0] = acc
    st_ref[0] = _stats_rows(acc, coutp)

    rh, rw, co = sc_tap
    lhs = _reshape_rows(x_ref[0, rh:rh + ho, rw:rw + wo, co:co + cp], ho, wo, cp)
    acc_s = jnp.dot(lhs, ws_ref[...], preferred_element_type=jnp.float32)
    ys_ref[0] = acc_s
    sts_ref[0] = _stats_rows(acc_s, coutp)


def _bn_relu_kernel(y_ref, sc_ref, b_ref, o_ref):
    # y * scale + bias, ReLU, store as bf16 (input of conv2).
    o_ref[0] = jnp.maximum(y_ref[0] * sc_ref[...] + b_ref[...], 0.0).astype(o_ref.dtype)


def _bn_add_relu_kernel(y_ref, sc_ref, b_ref, s_ref, ssc_ref, sb_ref, o_ref):
    # bn2 + shortcut-affine + residual add + ReLU, all fused and lane-dense.
    main = y_ref[0] * sc_ref[...] + b_ref[...]
    short = s_ref[0] * ssc_ref[...] + sb_ref[...]
    o_ref[0] = jnp.maximum(main + short, 0.0)


# ---------------------------------------------------------------------------
# pallas_call wrappers (grid over batch, "parallel" for megacore / pipelining)
# ---------------------------------------------------------------------------
def _conv_stats_call(x4d, wmat, taps, ho, wo, cp):
    n, hk, wk, ck = x4d.shape
    ntaps, _, coutp = wmat.shape
    kern = functools.partial(_conv_stats_kernel, taps=taps, ho=ho, wo=wo, cp=cp)
    y, st = pl.pallas_call(
        kern,
        grid=(n,),
        in_specs=[
            pl.BlockSpec((1, hk, wk, ck), lambda i: (i, 0, 0, 0)),
            pl.BlockSpec((ntaps, cp, coutp), lambda i: (0, 0, 0)),
        ],
        out_specs=(
            pl.BlockSpec((1, ho * wo, coutp), lambda i: (i, 0, 0)),
            pl.BlockSpec((1, 8, coutp), lambda i: (i, 0, 0)),
        ),
        out_shape=(
            jax.ShapeDtypeStruct((n, ho * wo, coutp), jnp.float32),
            jax.ShapeDtypeStruct((n, 8, coutp), jnp.float32),
        ),
        compiler_params=_PARALLEL,
    )(x4d, wmat)
    return y, st


def _conv_shortcut_stats_call(x4d, wmat, wsmat, taps, sc_tap, ho, wo, cp):
    n, hk, wk, ck = x4d.shape
    ntaps, _, coutp = wmat.shape
    kern = functools.partial(_conv_shortcut_stats_kernel, taps=taps, sc_tap=sc_tap,
                             ho=ho, wo=wo, cp=cp)
    y, ys, st, sts = pl.pallas_call(
        kern,
        grid=(n,),
        in_specs=[
            pl.BlockSpec((1, hk, wk, ck), lambda i: (i, 0, 0, 0)),
            pl.BlockSpec((ntaps, cp, coutp), lambda i: (0, 0, 0)),
            pl.BlockSpec((cp, coutp), lambda i: (0, 0)),
        ],
        out_specs=(
            pl.BlockSpec((1, ho * wo, coutp), lambda i: (i, 0, 0)),
            pl.BlockSpec((1, ho * wo, coutp), lambda i: (i, 0, 0)),
            pl.BlockSpec((1, 8, coutp), lambda i: (i, 0, 0)),
            pl.BlockSpec((1, 8, coutp), lambda i: (i, 0, 0)),
        ),
        out_shape=(
            jax.ShapeDtypeStruct((n, ho * wo, coutp), jnp.float32),
            jax.ShapeDtypeStruct((n, ho * wo, coutp), jnp.float32),
            jax.ShapeDtypeStruct((n, 8, coutp), jnp.float32),
            jax.ShapeDtypeStruct((n, 8, coutp), jnp.float32),
        ),
        compiler_params=_PARALLEL,
    )(x4d, wmat, wsmat)
    return y, ys, st, sts


def _bn_relu_call(y, scale, bias):
    n, m, coutp = y.shape
    return pl.pallas_call(
        _bn_relu_kernel,
        grid=(n,),
        in_specs=[
            pl.BlockSpec((1, m, coutp), lambda i: (i, 0, 0)),
            pl.BlockSpec((1, coutp), lambda i: (0, 0)),
            pl.BlockSpec((1, coutp), lambda i: (0, 0)),
        ],
        out_specs=pl.BlockSpec((1, m, coutp), lambda i: (i, 0, 0)),
        out_shape=jax.ShapeDtypeStruct((n, m, coutp), jnp.bfloat16),
        compiler_params=_PARALLEL,
    )(y, scale, bias)


def _bn_add_relu_call(y, scale, bias, s, sscale, sbias):
    n, m, coutp = y.shape
    return pl.pallas_call(
        _bn_add_relu_kernel,
        grid=(n,),
        in_specs=[
            pl.BlockSpec((1, m, coutp), lambda i: (i, 0, 0)),
            pl.BlockSpec((1, coutp), lambda i: (0, 0)),
            pl.BlockSpec((1, coutp), lambda i: (0, 0)),
            pl.BlockSpec((1, m, coutp), lambda i: (i, 0, 0)),
            pl.BlockSpec((1, coutp), lambda i: (0, 0)),
            pl.BlockSpec((1, coutp), lambda i: (0, 0)),
        ],
        out_specs=pl.BlockSpec((1, m, coutp), lambda i: (i, 0, 0)),
        out_shape=jax.ShapeDtypeStruct((n, m, coutp), jnp.float32),
        compiler_params=_PARALLEL,
    )(y, scale, bias, s, sscale, sbias)


# ---------------------------------------------------------------------------
# Parameters (torch-like) and one-time packing to MXU-friendly layout (bf16, padded)
# ---------------------------------------------------------------------------
def init_resblock_params(key, in_channels, out_channels, stride):
    ks = jax.random.split(key, 9)
    params = {
        "w1": 0.1 * jax.random.normal(ks[0], (out_channels, in_channels, 3, 3), jnp.float32),
        "g1": 1.0 + 0.1 * jax.random.normal(ks[1], (out_channels,), jnp.float32),
        "b1": 0.1 * jax.random.normal(ks[2], (out_channels,), jnp.float32),
        "w2": 0.1 * jax.random.normal(ks[3], (out_channels, out_channels, 3, 3), jnp.float32),
        "g2": 1.0 + 0.1 * jax.random.normal(ks[4], (out_channels,), jnp.float32),
        "b2": 0.1 * jax.random.normal(ks[5], (out_channels,), jnp.float32),
    }
    if stride != 1 or in_channels != out_channels:
        params["ws"] = 0.1 * jax.random.normal(ks[6], (out_channels, in_channels, 1, 1), jnp.float32)
        params["gs"] = 1.0 + 0.1 * jax.random.normal(ks[7], (out_channels,), jnp.float32)
        params["bs"] = 0.1 * jax.random.normal(ks[8], (out_channels,), jnp.float32)
    return params


def pack_resblock_params(params):
    cout, cin = params["w1"].shape[0], params["w1"].shape[1]
    cp = _round_up(cin, LANES)
    coutp = _round_up(cout, LANES)

    def conv3_to_mat(wgt):  # (cout, cin, 3, 3) -> (9, cin_p, cout_p) bf16, tap = dh*3+dw
        o, i = wgt.shape[0], wgt.shape[1]
        ip = _round_up(i, LANES)
        mat = jnp.transpose(wgt, (2, 3, 1, 0)).reshape(9, i, o)
        mat = jnp.pad(mat, ((0, 0), (0, ip - i), (0, coutp - o)))
        return mat.astype(jnp.bfloat16)

    def vec_pad(v):
        return jnp.pad(v, (0, coutp - v.shape[0])).astype(jnp.float32)

    packed = {
        "w1": conv3_to_mat(params["w1"]),
        "g1": vec_pad(params["g1"]), "b1": vec_pad(params["b1"]),
        "w2": conv3_to_mat(params["w2"]),
        "g2": vec_pad(params["g2"]), "b2": vec_pad(params["b2"]),
    }
    if "ws" in params:
        wsm = jnp.transpose(params["ws"][:, :, 0, 0], (1, 0))   # (cin, cout)
        wsm = jnp.pad(wsm, ((0, cp - cin), (0, coutp - cout)))
        packed["ws"] = wsm.astype(jnp.bfloat16)
        packed["gs"] = vec_pad(params["gs"])
        packed["bs"] = vec_pad(params["bs"])
    return packed


# ---------------------------------------------------------------------------
# Forward
# ---------------------------------------------------------------------------
def _bn_scale_bias(stats, gamma_p, beta_p, count):
    # tiny cross-block reduction + gamma/beta folding (biased variance, PyTorch training fwd)
    s1 = jnp.sum(stats[:, 0, :], axis=0)
    s2 = jnp.sum(stats[:, 1, :], axis=0)
    mean = s1 / count
    var = jnp.maximum(s2 / count - mean * mean, 0.0)
    scale = gamma_p * jax.lax.rsqrt(var + EPS)
    bias = beta_p - mean * scale
    return scale.reshape(1, -1), bias.reshape(1, -1)


@functools.partial(jax.jit, static_argnames=("stride", "out_channels"))
def res_block_forward(x_nchw, packed, stride, out_channels):
    n, cin, h, w = x_nchw.shape
    cp = _round_up(cin, LANES)
    coutp = packed["w1"].shape[-1]

    x = jnp.transpose(x_nchw, (0, 2, 3, 1)).astype(jnp.float32)        # NCHW -> NHWC
    xc = jnp.pad(x, ((0, 0), (0, 0), (0, 0), (0, cp - cin)))           # lane-pad channels

    if stride == 1:
        ho, wo = h, w
        xk = jnp.pad(xc, ((0, 0), (1, 1), (1, 1), (0, 0))).astype(jnp.bfloat16)
        taps1 = tuple((dh, dw, 0) for dh in range(3) for dw in range(3))
        sc_tap = (1, 1, 0)
    elif stride == 2:
        ho = (h - 1) // 2 + 1
        wo = (w - 1) // 2 + 1
        hp, wp = 2 * (ho + 1), 2 * (wo + 1)
        xp = jnp.pad(xc, ((0, 0), (1, hp - h - 1), (1, wp - w - 1), (0, 0)))
        # space-to-depth: every stride-2 tap becomes a contiguous (row, col, lane) slice
        xk = xp.reshape(n, ho + 1, 2, wo + 1, 2, cp)
        xk = jnp.transpose(xk, (0, 1, 3, 2, 4, 5)).reshape(n, ho + 1, wo + 1, 4 * cp)
        xk = xk.astype(jnp.bfloat16)
        taps1 = tuple((dh // 2, dw // 2, ((dh % 2) * 2 + (dw % 2)) * cp)
                      for dh in range(3) for dw in range(3))
        sc_tap = (0, 0, 3 * cp)
    else:
        raise ValueError("ResBlock only uses stride 1 or 2")

    m = n * ho * wo
    has_proj = "ws" in packed

    # conv1 (+ fused 1x1 projection shortcut) + per-block BN statistics
    if has_proj:
        y1, ys, st1, sts = _conv_shortcut_stats_call(xk, packed["w1"], packed["ws"],
                                                     taps1, sc_tap, ho, wo, cp)
        sscale, sbias = _bn_scale_bias(sts, packed["gs"], packed["bs"], m)
        s_flat = ys
    else:
        y1, st1 = _conv_stats_call(xk, packed["w1"], taps1, ho, wo, cp)
        s_flat = xc.reshape(n, h * w, cp)                 # identity shortcut (f32)
        sscale = jnp.ones((1, coutp), jnp.float32)
        sbias = jnp.zeros((1, coutp), jnp.float32)

    # bn1 + relu with global stats, then halo-pad the bf16 result for conv2
    scale1, bias1 = _bn_scale_bias(st1, packed["g1"], packed["b1"], m)
    out1 = _bn_relu_call(y1, scale1, bias1)               # (n, ho*wo, coutp) bf16
    out1p = jnp.pad(out1.reshape(n, ho, wo, coutp), ((0, 0), (1, 1), (1, 1), (0, 0)))

    # conv2 (stride 1) + stats, then bn2 + residual add + relu (fused, lane-dense)
    taps2 = tuple((dh, dw, 0) for dh in range(3) for dw in range(3))
    y2, st2 = _conv_stats_call(out1p, packed["w2"], taps2, ho, wo, coutp)
    scale2, bias2 = _bn_scale_bias(st2, packed["g2"], packed["b2"], m)
    out = _bn_add_relu_call(y2, scale2, bias2, s_flat, sscale, sbias)

    out = out.reshape(n, ho, wo, coutp)[..., :out_channels]
    return jnp.transpose(out, (0, 3, 1, 2))               # NHWC -> NCHW


# ---------------------------------------------------------------------------
# Pure-JAX reference (same bf16 conv-operand rounding as the kernel pipeline)
# ---------------------------------------------------------------------------
def _ref_forward(x, params, stride):
    def conv(inp, wgt, s, pad):
        return jax.lax.conv_general_dilated(
            inp.astype(jnp.bfloat16), wgt.astype(jnp.bfloat16), (s, s),
            ((pad, pad), (pad, pad)),
            dimension_numbers=("NCHW", "OIHW", "NCHW"),
            preferred_element_type=jnp.float32)

    def bn(inp, g, b):
        mean = inp.mean(axis=(0, 2, 3), keepdims=True)
        var = ((inp - mean) ** 2).mean(axis=(0, 2, 3), keepdims=True)
        return (inp - mean) * jax.lax.rsqrt(var + EPS) * g.reshape(1, -1, 1, 1) + b.reshape(1, -1, 1, 1)

    out = jax.nn.relu(bn(conv(x, params["w1"], stride, 1), params["g1"], params["b1"]))
    out = bn(conv(out, params["w2"], 1, 1), params["g2"], params["b2"])
    if "ws" in params:
        short = bn(conv(x, params["ws"], stride, 0), params["gs"], params["bs"])
    else:
        short = x
    return jax.nn.relu(out + short)


if __name__ == "__main__":
    key = jax.random.PRNGKey(0)
    kx, kp1, kp2 = jax.random.split(key, 3)

    x = jax.random.normal(kx, (2, 4, 16, 16), jnp.float32)   # NCHW, like PyTorch

    # Case 1: downsampling block (in=4 -> out=8, stride=2) -> 1x1-conv projection shortcut
    params_a = init_resblock_params(kp1, 4, 8, 2)
    packed_a = pack_resblock_params(params_a)
    out_a = jax.block_until_ready(res_block_forward(x, packed_a, stride=2, out_channels=8))
    ref_a = _ref_forward(x, params_a, 2)
    np.testing.assert_allclose(np.asarray(out_a), np.asarray(ref_a), rtol=1e-2, atol=1e-2)

    # Case 2: identity-shortcut block (in=out=4, stride=1)
    params_b = init_resblock_params(kp2, 4, 4, 1)
    packed_b = pack_resblock_params(params_b)
    out_b = jax.block_until_ready(res_block_forward(x, packed_b, stride=1, out_channels=4))
    ref_b = _ref_forward(x, params_b, 1)
    np.testing.assert_allclose(np.asarray(out_b), np.asarray(ref_b), rtol=1e-2, atol=1e-2)

    print("KERNEL_OK")
</pallas_src>

<mosaic_0001>
module attributes {stable_mosaic.version = 11 : i64} {
  func.func @_conv_shortcut_stats_kernel(%arg0: i32, %arg1: memref<1x9x9x512xbf16, #tpu.memory_space<vmem>>, %arg2: memref<9x128x128xbf16, #tpu.memory_space<vmem>>, %arg3: memref<128x128xbf16, #tpu.memory_space<vmem>>, %arg4: memref<1x64x128xf32, #tpu.memory_space<vmem>>, %arg5: memref<1x64x128xf32, #tpu.memory_space<vmem>>, %arg6: memref<1x8x128xf32, #tpu.memory_space<vmem>>, %arg7: memref<1x8x128xf32, #tpu.memory_space<vmem>>) attributes {dimension_semantics = [#tpu.dimension_semantics<parallel>], iteration_bounds = array<i64: 2>, scalar_prefetch = 0 : i64, scratch_operands = 0 : i64, tpu.core_type = #tpu.core_type<tc>, window_params = [{transform_indices = @transform_0, window_bounds = array<i64: 1, 9, 9, 512>}, {pipeline_mode = #tpu.pipeline_mode<synchronous>, transform_indices = @transform_1, window_bounds = array<i64: 9, 128, 128>}, {pipeline_mode = #tpu.pipeline_mode<synchronous>, transform_indices = @transform_2, window_bounds = array<i64: 128, 128>}, {transform_indices = @transform_3, window_bounds = array<i64: 1, 64, 128>}, {transform_indices = @transform_4, window_bounds = array<i64: 1, 64, 128>}, {transform_indices = @transform_5, window_bounds = array<i64: 1, 8, 128>}, {transform_indices = @transform_6, window_bounds = array<i64: 1, 8, 128>}]} {
    %cst = arith.constant 0.000000e+00 : f32
    %0 = vector.broadcast %cst : f32 to vector<64x128xf32>
    %c0 = arith.constant 0 : index
    %c0_0 = arith.constant 0 : index
    %c0_1 = arith.constant 0 : index
    %c0_2 = arith.constant 0 : index
    %1 = vector.load %arg1[%c0, %c0_0, %c0_1, %c0_2] : memref<1x9x9x512xbf16, #tpu.memory_space<vmem>>, vector<1x8x8x128xbf16>
    %2 = vector.shape_cast %1 : vector<1x8x8x128xbf16> to vector<8x8x128xbf16>
    %3 = arith.extf %2 : vector<8x8x128xbf16> to vector<8x8x128xf32>
    %4 = vector.shape_cast %3 : vector<8x8x128xf32> to vector<64x128xf32>
    %5 = arith.truncf %4 : vector<64x128xf32> to vector<64x128xbf16>
    %c0_3 = arith.constant 0 : index
    %c0_4 = arith.constant 0 : index
    %c0_5 = arith.constant 0 : index
    %6 = vector.load %arg2[%c0_3, %c0_4, %c0_5] : memref<9x128x128xbf16, #tpu.memory_space<vmem>>, vector<1x128x128xbf16>
    %7 = vector.shape_cast %6 : vector<1x128x128xbf16> to vector<128x128xbf16>
    %cst_6 = arith.constant dense<0.000000e+00> : vector<64x128xf32>
    %8 = tpu.matmul %5, %7, %cst_6 {dimension_numbers = #tpu.dot_dimension_numbers<[1], [0], [0], [1], [0, 0, 1, 1], [], []>} : vector<64x128xbf16>, vector<128x128xbf16>, vector<64x128xf32> -> vector<64x128xf32>
    %9 = arith.addf %0, %8 : vector<64x128xf32>
    %c0_7 = arith.constant 0 : index
    %c0_8 = arith.constant 0 : index
    %c0_9 = arith.constant 0 : index
    %c128 = arith.constant 128 : index
    %10 = vector.load %arg1[%c0_7, %c0_8, %c0_9, %c128] : memref<1x9x9x512xbf16, #tpu.memory_space<vmem>>, vector<1x8x8x128xbf16>
    %11 = vector.shape_cast %10 : vector<1x8x8x128xbf16> to vector<8x8x128xbf16>
    %12 = arith.extf %11 : vector<8x8x128xbf16> to vector<8x8x128xf32>
    %13 = vector.shape_cast %12 : vector<8x8x128xf32> to vector<64x128xf32>
    %14 = arith.truncf %13 : vector<64x128xf32> to vector<64x128xbf16>
    %c1 = arith.constant 1 : index
    %c0_10 = arith.constant 0 : index
    %c0_11 = arith.constant 0 : index
    %15 = vector.load %arg2[%c1, %c0_10, %c0_11] : memref<9x128x128xbf16, #tpu.memory_space<vmem>>, vector<1x128x128xbf16>
    %16 = vector.shape_cast %15 : vector<1x128x128xbf16> to vector<128x128xbf16>
    %cst_12 = arith.constant dense<0.000000e+00> : vector<64x128xf32>
    %17 = tpu.matmul %14, %16, %cst_12 {dimension_numbers = #tpu.dot_dimension_numbers<[1], [0], [0], [1], [0, 0, 1, 1], [], []>} : vector<64x128xbf16>, vector<128x128xbf16>, vector<64x128xf32> -> vector<64x128xf32>
    %18 = arith.addf %9, %17 : vector<64x128xf32>
    %c0_13 = arith.constant 0 : index
    %c0_14 = arith.constant 0 : index
    %c1_15 = arith.constant 1 : index
    %c0_16 = arith.constant 0 : index
    %19 = vector.load %arg1[%c0_13, %c0_14, %c1_15, %c0_16] : memref<1x9x9x512xbf16, #tpu.memory_space<vmem>>, vector<1x8x8x128xbf16>
    %20 = vector.shape_cast %19 : vector<1x8x8x128xbf16> to vector<8x8x128xbf16>
    %21 = arith.extf %20 : vector<8x8x128xbf16> to vector<8x8x128xf32>
    %22 = vector.shape_cast %21 : vector<8x8x128xf32> to vector<64x128xf32>
    %23 = arith.truncf %22 : vector<64x128xf32> to vector<64x128xbf16>
    %c2 = arith.constant 2 : index
    %c0_17 = arith.constant 0 : index
    %c0_18 = arith.constant 0 : index
    %24 = vector.load %arg2[%c2, %c0_17, %c0_18] : memref<9x128x128xbf16, #tpu.memory_space<vmem>>, vector<1x128x128xbf16>
    %25 = vector.shape_cast %24 : vector<1x128x128xbf16> to vector<128x128xbf16>
    %cst_19 = arith.constant dense<0.000000e+00> : vector<64x128xf32>
    %26 = tpu.matmul %23, %25, %cst_19 {dimension_numbers = #tpu.dot_dimension_numbers<[1], [0], [0], [1], [0, 0, 1, 1], [], []>} : vector<64x128xbf16>, vector<128x128xbf16>, vector<64x128xf32> -> vector<64x128xf32>
    %27 = arith.addf %18, %26 : vector<64x128xf32>
    %c0_20 = arith.constant 0 : index
    %c0_21 = arith.constant 0 : index
    %c0_22 = arith.constant 0 : index
    %c256 = arith.constant 256 : index
    %28 = vector.load %arg1[%c0_20, %c0_21, %c0_22, %c256] : memref<1x9x9x512xbf16, #tpu.memory_space<vmem>>, vector<1x8x8x128xbf16>
    %29 = vector.shape_cast %28 : vector<1x8x8x128xbf16> to vector<8x8x128xbf16>
    %30 = arith.extf %29 : vector<8x8x128xbf16> to vector<8x8x128xf32>
    %31 = vector.shape_cast %30 : vector<8x8x128xf32> to vector<64x128xf32>
    %32 = arith.truncf %31 : vector<64x128xf32> to vector<64x128xbf16>
    %c3 = arith.constant 3 : index
    %c0_23 = arith.constant 0 : index
    %c0_24 = arith.constant 0 : index
    %33 = vector.load %arg2[%c3, %c0_23, %c0_24] : memref<9x128x128xbf16, #tpu.memory_space<vmem>>, vector<1x128x128xbf16>
    %34 = vector.shape_cast %33 : vector<1x128x128xbf16> to vector<128x128xbf16>
    %cst_25 = arith.constant dense<0.000000e+00> : vector<64x128xf32>
    %35 = tpu.matmul %32, %34, %cst_25 {dimension_numbers = #tpu.dot_dimension_numbers<[1], [0], [0], [1], [0, 0, 1, 1], [], []>} : vector<64x128xbf16>, vector<128x128xbf16>, vector<64x128xf32> -> vector<64x128xf32>
    %36 = arith.addf %27, %35 : vector<64x128xf32>
    %c0_26 = arith.constant 0 : index
    %c0_27 = arith.constant 0 : index
    %c0_28 = arith.constant 0 : index
    %c384 = arith.constant 384 : index
    %37 = vector.load %arg1[%c0_26, %c0_27, %c0_28, %c384] : memref<1x9x9x512xbf16, #tpu.memory_space<vmem>>, vector<1x8x8x128xbf16>
    %38 = vector.shape_cast %37 : vector<1x8x8x128xbf16> to vector<8x8x128xbf16>
    %39 = arith.extf %38 : vector<8x8x128xbf16> to vector<8x8x128xf32>
    %40 = vector.shape_cast %39 : vector<8x8x128xf32> to vector<64x128xf32>
    %41 = arith.truncf %40 : vector<64x128xf32> to vector<64x128xbf16>
    %c4 = arith.constant 4 : index
    %c0_29 = arith.constant 0 : index
    %c0_30 = arith.constant 0 : index
    %42 = vector.load %arg2[%c4, %c0_29, %c0_30] : memref<9x128x128xbf16, #tpu.memory_space<vmem>>, vector<1x128x128xbf16>
    %43 = vector.shape_cast %42 : vector<1x128x128xbf16> to vector<128x128xbf16>
    %cst_31 = arith.constant dense<0.000000e+00> : vector<64x128xf32>
    %44 = tpu.matmul %41, %43, %cst_31 {dimension_numbers = #tpu.dot_dimension_numbers<[1], [0], [0], [1], [0, 0, 1, 1], [], []>} : vector<64x128xbf16>, vector<128x128xbf16>, vector<64x128xf32> -> vector<64x128xf32>
    %45 = arith.addf %36, %44 : vector<64x128xf32>
    %c0_32 = arith.constant 0 : index
    %c0_33 = arith.constant 0 : index
    %c1_34 = arith.constant 1 : index
    %c256_35 = arith.constant 256 : index
    %46 = vector.load %arg1[%c0_32, %c0_33, %c1_34, %c256_35] : memref<1x9x9x512xbf16, #tpu.memory_space<vmem>>, vector<1x8x8x128xbf16>
    %47 = vector.shape_cast %46 : vector<1x8x8x128xbf16> to vector<8x8x128xbf16>
    %48 = arith.extf %47 : vector<8x8x128xbf16> to vector<8x8x128xf32>
    %49 = vector.shape_cast %48 : vector<8x8x128xf32> to vector<64x128xf32>
    %50 = arith.truncf %49 : vector<64x128xf32> to vector<64x128xbf16>
    %c5 = arith.constant 5 : index
    %c0_36 = arith.constant 0 : index
    %c0_37 = arith.constant 0 : index
    %51 = vector.load %arg2[%c5, %c0_36, %c0_37] : memref<9x128x128xbf16, #tpu.memory_space<vmem>>, vector<1x128x128xbf16>
    %52 = vector.shape_cast %51 : vector<1x128x128xbf16> to vector<128x128xbf16>
    %cst_38 = arith.constant dense<0.000000e+00> : vector<64x128xf32>
    %53 = tpu.matmul %50, %52, %cst_38 {dimension_numbers = #tpu.dot_dimension_numbers<[1], [0], [0], [1], [0, 0, 1, 1], [], []>} : vector<64x128xbf16>, vector<128x128xbf16>, vector<64x128xf32> -> vector<64x128xf32>
    %54 = arith.addf %45, %53 : vector<64x128xf32>
    %c0_39 = arith.constant 0 : index
    %c1_40 = arith.constant 1 : index
    %c0_41 = arith.constant 0 : index
    %c0_42 = arith.constant 0 : index
    %55 = vector.load %arg1[%c0_39, %c1_40, %c0_41, %c0_42] : memref<1x9x9x512xbf16, #tpu.memory_space<vmem>>, vector<1x8x8x128xbf16>
    %56 = vector.shape_cast %55 : vector<1x8x8x128xbf16> to vector<8x8x128xbf16>
    %57 = arith.extf %56 : vector<8x8x128xbf16> to vector<8x8x128xf32>
    %58 = vector.shape_cast %57 : vector<8x8x128xf32> to vector<64x128xf32>
    %59 = arith.truncf %58 : vector<64x128xf32> to vector<64x128xbf16>
    %c6 = arith.constant 6 : index
    %c0_43 = arith.constant 0 : index
    %c0_44 = arith.constant 0 : index
    %60 = vector.load %arg2[%c6, %c0_43, %c0_44] : memref<9x128x128xbf16, #tpu.memory_space<vmem>>, vector<1x128x128xbf16>
    %61 = vector.shape_cast %60 : vector<1x128x128xbf16> to vector<128x128xbf16>
    %cst_45 = arith.constant dense<0.000000e+00> : vector<64x128xf32>
    %62 = tpu.matmul %59, %61, %cst_45 {dimension_numbers = #tpu.dot_dimension_numbers<[1], [0], [0], [1], [0, 0, 1, 1], [], []>} : vector<64x128xbf16>, vector<128x128xbf16>, vector<64x128xf32> -> vector<64x128xf32>
    %63 = arith.addf %54, %62 : vector<64x128xf32>
    %c0_46 = arith.constant 0 : index
    %c1_47 = arith.constant 1 : index
    %c0_48 = arith.constant 0 : index
    %c128_49 = arith.constant 128 : index
    %64 = vector.load %arg1[%c0_46, %c1_47, %c0_48, %c128_49] : memref<1x9x9x512xbf16, #tpu.memory_space<vmem>>, vector<1x8x8x128xbf16>
    %65 = vector.shape_cast %64 : vector<1x8x8x128xbf16> to vector<8x8x128xbf16>
    %66 = arith.extf %65 : vector<8x8x128xbf16> to vector<8x8x128xf32>
    %67 = vector.shape_cast %66 : vector<8x8x128xf32> to vector<64x128xf32>
    %68 = arith.truncf %67 : vector<64x128xf32> to vector<64x128xbf16>
    %c7 = arith.constant 7 : index
    %c0_50 = arith.constant 0 : index
    %c0_51 = arith.constant 0 : index
    %69 = vector.load %arg2[%c7, %c0_50, %c0_51] : memref<9x128x128xbf16, #tpu.memory_space<vmem>>, vector<1x128x128xbf16>
    %70 = vector.shape_cast %69 : vector<1x128x128xbf16> to vector<128x128xbf16>
    %cst_52 = arith.constant dense<0.000000e+00> : vector<64x128xf32>
    %71 = tpu.matmul %68, %70, %cst_52 {dimension_numbers = #tpu.dot_dimension_numbers<[1], [0], [0], [1], [0, 0, 1, 1], [], []>} : vector<64x128xbf16>, vector<128x128xbf16>, vector<64x128xf32> -> vector<64x128xf32>
    %72 = arith.addf %63, %71 : vector<64x128xf32>
    %c0_53 = arith.constant 0 : index
    %c1_54 = arith.constant 1 : index
    %c1_55 = arith.constant 1 : index
    %c0_56 = arith.constant 0 : index
    %73 = vector.load %arg1[%c0_53, %c1_54, %c1_55, %c0_56] : memref<1x9x9x512xbf16, #tpu.memory_space<vmem>>, vector<1x8x8x128xbf16>
    %74 = vector.shape_cast %73 : vector<1x8x8x128xbf16> to vector<8x8x128xbf16>
    %75 = arith.extf %74 : vector<8x8x128xbf16> to vector<8x8x128xf32>
    %76 = vector.shape_cast %75 : vector<8x8x128xf32> to vector<64x128xf32>
    %77 = arith.truncf %76 : vector<64x128xf32> to vector<64x128xbf16>
    %c8 = arith.constant 8 : index
    %c0_57 = arith.constant 0 : index
    %c0_58 = arith.constant 0 : index
    %78 = vector.load %arg2[%c8, %c0_57, %c0_58] : memref<9x128x128xbf16, #tpu.memory_space<vmem>>, vector<1x128x128xbf16>
    %79 = vector.shape_cast %78 : vector<1x128x128xbf16> to vector<128x128xbf16>
    %cst_59 = arith.constant dense<0.000000e+00> : vector<64x128xf32>
    %80 = tpu.matmul %77, %79, %cst_59 {dimension_numbers = #tpu.dot_dimension_numbers<[1], [0], [0], [1], [0, 0, 1, 1], [], []>} : vector<64x128xbf16>, vector<128x128xbf16>, vector<64x128xf32> -> vector<64x128xf32>
    %81 = arith.addf %72, %80 : vector<64x128xf32>
    %c0_60 = arith.constant 0 : index
    %c0_61 = arith.constant 0 : index
    %c0_62 = arith.constant 0 : index
    %82 = vector.load %arg4[%c0_60, %c0_61, %c0_62] : memref<1x64x128xf32, #tpu.memory_space<vmem>>, vector<1x64x128xf32>
    %83 = vector.shape_cast %82 : vector<1x64x128xf32> to vector<64x128xf32>
    %84 = vector.shape_cast %81 : vector<64x128xf32> to vector<1x64x128xf32>
    tpu.vector_store %arg4[%c0_60, %c0_61, %c0_62], %84 {strides = array<i32>} : memref<1x64x128xf32, #tpu.memory_space<vmem>>, vector<1x64x128xf32>,
    %cst_63 = arith.constant dense<0.000000e+00> : vector<128xf32>
    %85 = vector.multi_reduction <add>, %81, %cst_63 [0] : vector<64x128xf32> to vector<128xf32>
    %86 = vector.shape_cast %85 : vector<128xf32> to vector<1x128xf32>
    %87 = arith.mulf %81, %81 : vector<64x128xf32>
    %cst_64 = arith.constant dense<0.000000e+00> : vector<128xf32>
    %88 = vector.multi_reduction <add>, %87, %cst_64 [0] : vector<64x128xf32> to vector<128xf32>
    %89 = vector.shape_cast %88 : vector<128xf32> to vector<1x128xf32>
    %cst_65 = arith.constant 0.000000e+00 : f32
    %90 = vector.broadcast %cst_65 : f32 to vector<6x128xf32>
    %91 = tpu.concatenate %86, %89, %90 in 0 : vector<1x128xf32>, vector<1x128xf32>, vector<6x128xf32> -> vector<8x128xf32>
    %c0_66 = arith.constant 0 : index
    %c0_67 = arith.constant 0 : index
    %c0_68 = arith.constant 0 : index
    %92 = vector.load %arg6[%c0_66, %c0_67, %c0_68] : memref<1x8x128xf32, #tpu.memory_space<vmem>>, vector<1x8x128xf32>
    %93 = vector.shape_cast %92 : vector<1x8x128xf32> to vector<8x128xf32>
    %94 = vector.shape_cast %91 : vector<8x128xf32> to vector<1x8x128xf32>
    tpu.vector_store %arg6[%c0_66, %c0_67, %c0_68], %94 {strides = array<i32>} : memref<1x8x128xf32, #tpu.memory_space<vmem>>, vector<1x8x128xf32>,
    %c0_69 = arith.constant 0 : index
    %c0_70 = arith.constant 0 : index
    %c0_71 = arith.constant 0 : index
    %c384_72 = arith.constant 384 : index
    %95 = vector.load %arg1[%c0_69, %c0_70, %c0_71, %c384_72] : memref<1x9x9x512xbf16, #tpu.memory_space<vmem>>, vector<1x8x8x128xbf16>
    %96 = vector.shape_cast %95 : vector<1x8x8x128xbf16> to vector<8x8x128xbf16>
    %97 = arith.extf %96 : vector<8x8x128xbf16> to vector<8x8x128xf32>
    %98 = vector.shape_cast %97 : vector<8x8x128xf32> to vector<64x128xf32>
    %99 = arith.truncf %98 : vector<64x128xf32> to vector<64x128xbf16>
    %c0_73 = arith.constant 0 : index
    %c0_74 = arith.constant 0 : index
    %100 = vector.load %arg3[%c0_73, %c0_74] : memref<128x128xbf16, #tpu.memory_space<vmem>>, vector<128x128xbf16>
    %cst_75 = arith.constant dense<0.000000e+00> : vector<64x128xf32>
    %101 = tpu.matmul %99, %100, %cst_75 {dimension_numbers = #tpu.dot_dimension_numbers<[1], [0], [0], [1], [0, 0, 1, 1], [], []>} : vector<64x128xbf16>, vector<128x128xbf16>, vector<64x128xf32> -> vector<64x128xf32>
    %c0_76 = arith.constant 0 : index
    %c0_77 = arith.constant 0 : index
    %c0_78 = arith.constant 0 : index
    %102 = vector.load %arg5[%c0_76, %c0_77, %c0_78] : memref<1x64x128xf32, #tpu.memory_space<vmem>>, vector<1x64x128xf32>
    %103 = vector.shape_cast %102 : vector<1x64x128xf32> to vector<64x128xf32>
    %104 = vector.shape_cast %101 : vector<64x128xf32> to vector<1x64x128xf32>
    tpu.vector_store %arg5[%c0_76, %c0_77, %c0_78], %104 {strides = array<i32>} : memref<1x64x128xf32, #tpu.memory_space<vmem>>, vector<1x64x128xf32>,
    %cst_79 = arith.constant dense<0.000000e+00> : vector<128xf32>
    %105 = vector.multi_reduction <add>, %101, %cst_79 [0] : vector<64x128xf32> to vector<128xf32>
    %106 = vector.shape_cast %105 : vector<128xf32> to vector<1x128xf32>
    %107 = arith.mulf %101, %101 : vector<64x128xf32>
    %cst_80 = arith.constant dense<0.000000e+00> : vector<128xf32>
    %108 = vector.multi_reduction <add>, %107, %cst_80 [0] : vector<64x128xf32> to vector<128xf32>
    %109 = vector.shape_cast %108 : vector<128xf32> to vector<1x128xf32>
    %cst_81 = arith.constant 0.000000e+00 : f32
    %110 = vector.broadcast %cst_81 : f32 to vector<6x128xf32>
    %111 = tpu.concatenate %106, %109, %110 in 0 : vector<1x128xf32>, vector<1x128xf32>, vector<6x128xf32> -> vector<8x128xf32>
    %c0_82 = arith.constant 0 : index
    %c0_83 = arith.constant 0 : index
    %c0_84 = arith.constant 0 : index
    %112 = vector.load %arg7[%c0_82, %c0_83, %c0_84] : memref<1x8x128xf32, #tpu.memory_space<vmem>>, vector<1x8x128xf32>
    %113 = vector.shape_cast %112 : vector<1x8x128xf32> to vector<8x128xf32>
    %114 = vector.shape_cast %111 : vector<8x128xf32> to vector<1x8x128xf32>
    tpu.vector_store %arg7[%c0_82, %c0_83, %c0_84], %114 {strides = array<i32>} : memref<1x8x128xf32, #tpu.memory_space<vmem>>, vector<1x8x128xf32>,
    return
  }
  func.func @transform_0(%arg0: i32) -> (i32, i32, i32, i32) {
    %c0_i32 = arith.constant 0 : i32
    %c0_i32_0 = arith.constant 0 : i32
    %c0_i32_1 = arith.constant 0 : i32
    %c0_i32_2 = arith.constant 0 : i32
    return %arg0, %c0_i32, %c0_i32_0, %c0_i32_1 : i32, i32, i32, i32
  }
  func.func @transform_1(%arg0: i32) -> (i32, i32, i32) {
    %c0_i32 = arith.constant 0 : i32
    %c0_i32_0 = arith.constant 0 : i32
    %c0_i32_1 = arith.constant 0 : i32
    %c0_i32_2 = arith.constant 0 : i32
    return %c0_i32, %c0_i32_0, %c0_i32_1 : i32, i32, i32
  }
  func.func @transform_2(%arg0: i32) -> (i32, i32) {
    %c0_i32 = arith.constant 0 : i32
    %c0_i32_0 = arith.constant 0 : i32
    %c0_i32_1 = arith.constant 0 : i32
    return %c0_i32, %c0_i32_0 : i32, i32
  }
  func.func @transform_3(%arg0: i32) -> (i32, i32, i32) {
    %c0_i32 = arith.constant 0 : i32
    %c0_i32_0 = arith.constant 0 : i32
    %c0_i32_1 = arith.constant 0 : i32
    return %arg0, %c0_i32, %c0_i32_0 : i32, i32, i32
  }
  func.func @transform_4(%arg0: i32) -> (i32, i32, i32) {
    %c0_i32 = arith.constant 0 : i32
    %c0_i32_0 = arith.constant 0 : i32
    %c0_i32_1 = arith.constant 0 : i32
    return %arg0, %c0_i32, %c0_i32_0 : i32, i32, i32
  }
  func.func @transform_5(%arg0: i32) -> (i32, i32, i32) {
    %c0_i32 = arith.constant 0 : i32
    %c0_i32_0 = arith.constant 0 : i32
    %c0_i32_1 = arith.constant 0 : i32
    return %arg0, %c0_i32, %c0_i32_0 : i32, i32, i32
  }
  func.func @transform_6(%arg0: i32) -> (i32, i32, i32) {
    %c0_i32 = arith.constant 0 : i32
    %c0_i32_0 = arith.constant 0 : i32
    %c0_i32_1 = arith.constant 0 : i32
    return %arg0, %c0_i32, %c0_i32_0 : i32, i32, i32
  }
}

module attributes {stable_mosaic.version = 11 : i64} {
  func.func @_bn_relu_kernel(%arg0: i32, %arg1: memref<1x64x128xf32, #tpu.memory_space<vmem>>, %arg2: memref<1x128xf32, #tpu.memory_space<vmem>>, %arg3: memref<1x128xf32, #tpu.memory_space<vmem>>, %arg4: memref<1x64x128xbf16, #tpu.memory_space<vmem>>) attributes {dimension_semantics = [#tpu.dimension_semantics<parallel>], iteration_bounds = array<i64: 2>, scalar_prefetch = 0 : i64, scratch_operands = 0 : i64, tpu.core_type = #tpu.core_type<tc>, window_params = [{transform_indices = @transform_0, window_bounds = array<i64: 1, 64, 128>}, {pipeline_mode = #tpu.pipeline_mode<synchronous>, transform_indices = @transform_1, window_bounds = array<i64: 1, 128>}, {pipeline_mode = #tpu.pipeline_mode<synchronous>, transform_indices = @transform_2, window_bounds = array<i64: 1, 128>}, {transform_indices = @transform_3, window_bounds = array<i64: 1, 64, 128>}]} {
    %c0 = arith.constant 0 : index
    %c0_0 = arith.constant 0 : index
    %c0_1 = arith.constant 0 : index
    %0 = vector.load %arg1[%c0, %c0_0, %c0_1] : memref<1x64x128xf32, #tpu.memory_space<vmem>>, vector<1x64x128xf32>
    %1 = vector.shape_cast %0 : vector<1x64x128xf32> to vector<64x128xf32>
    %c0_2 = arith.constant 0 : index
    %c0_3 = arith.constant 0 : index
    %2 = vector.load %arg2[%c0_2, %c0_3] : memref<1x128xf32, #tpu.memory_space<vmem>>, vector<1x128xf32>
    %3 = vector.broadcast %2 : vector<1x128xf32> to vector<64x128xf32>
    %4 = arith.mulf %1, %3 : vector<64x128xf32>
    %c0_4 = arith.constant 0 : index
    %c0_5 = arith.constant 0 : index
    %5 = vector.load %arg3[%c0_4, %c0_5] : memref<1x128xf32, #tpu.memory_space<vmem>>, vector<1x128xf32>
    %6 = vector.broadcast %5 : vector<1x128xf32> to vector<64x128xf32>
    %7 = arith.addf %4, %6 : vector<64x128xf32>
    %cst = arith.constant 0.000000e+00 : f32
    %8 = vector.broadcast %cst : f32 to vector<64x128xf32>
    %9 = arith.maximumf %7, %8 : vector<64x128xf32>
    %10 = arith.truncf %9 : vector<64x128xf32> to vector<64x128xbf16>
    %c0_6 = arith.constant 0 : index
    %c0_7 = arith.constant 0 : index
    %c0_8 = arith.constant 0 : index
    %11 = vector.load %arg4[%c0_6, %c0_7, %c0_8] : memref<1x64x128xbf16, #tpu.memory_space<vmem>>, vector<1x64x128xbf16>
    %12 = vector.shape_cast %11 : vector<1x64x128xbf16> to vector<64x128xbf16>
    %13 = vector.shape_cast %10 : vector<64x128xbf16> to vector<1x64x128xbf16>
    tpu.vector_store %arg4[%c0_6, %c0_7, %c0_8], %13 {strides = array<i32>} : memref<1x64x128xbf16, #tpu.memory_space<vmem>>, vector<1x64x128xbf16>,
    return
  }
  func.func @transform_0(%arg0: i32) -> (i32, i32, i32) {
    %c0_i32 = arith.constant 0 : i32
    %c0_i32_0 = arith.constant 0 : i32
    %c0_i32_1 = arith.constant 0 : i32
    return %arg0, %c0_i32, %c0_i32_0 : i32, i32, i32
  }
  func.func @transform_1(%arg0: i32) -> (i32, i32) {
    %c0_i32 = arith.constant 0 : i32
    %c0_i32_0 = arith.constant 0 : i32
    %c0_i32_1 = arith.constant 0 : i32
    return %c0_i32, %c0_i32_0 : i32, i32
  }
  func.func @transform_2(%arg0: i32) -> (i32, i32) {
    %c0_i32 = arith.constant 0 : i32
    %c0_i32_0 = arith.constant 0 : i32
    %c0_i32_1 = arith.constant 0 : i32
    return %c0_i32, %c0_i32_0 : i32, i32
  }
  func.func @transform_3(%arg0: i32) -> (i32, i32, i32) {
    %c0_i32 = arith.constant 0 : i32
    %c0_i32_0 = arith.constant 0 : i32
    %c0_i32_1 = arith.constant 0 : i32
    return %arg0, %c0_i32, %c0_i32_0 : i32, i32, i32
  }
}

module attributes {stable_mosaic.version = 11 : i64} {
  func.func @_conv_stats_kernel(%arg0: i32, %arg1: memref<1x10x10x128xbf16, #tpu.memory_space<vmem>>, %arg2: memref<9x128x128xbf16, #tpu.memory_space<vmem>>, %arg3: memref<1x64x128xf32, #tpu.memory_space<vmem>>, %arg4: memref<1x8x128xf32, #tpu.memory_space<vmem>>) attributes {dimension_semantics = [#tpu.dimension_semantics<parallel>], iteration_bounds = array<i64: 2>, scalar_prefetch = 0 : i64, scratch_operands = 0 : i64, tpu.core_type = #tpu.core_type<tc>, window_params = [{transform_indices = @transform_0, window_bounds = array<i64: 1, 10, 10, 128>}, {pipeline_mode = #tpu.pipeline_mode<synchronous>, transform_indices = @transform_1, window_bounds = array<i64: 9, 128, 128>}, {transform_indices = @transform_2, window_bounds = array<i64: 1, 64, 128>}, {transform_indices = @transform_3, window_bounds = array<i64: 1, 8, 128>}]} {
    %cst = arith.constant 0.000000e+00 : f32
    %0 = vector.broadcast %cst : f32 to vector<64x128xf32>
    %c0 = arith.constant 0 : index
    %c0_0 = arith.constant 0 : index
    %c0_1 = arith.constant 0 : index
    %c0_2 = arith.constant 0 : index
    %1 = vector.load %arg1[%c0, %c0_0, %c0_1, %c0_2] : memref<1x10x10x128xbf16, #tpu.memory_space<vmem>>, vector<1x8x8x128xbf16>
    %2 = vector.shape_cast %1 : vector<1x8x8x128xbf16> to vector<8x8x128xbf16>
    %3 = arith.extf %2 : vector<8x8x128xbf16> to vector<8x8x128xf32>
    %4 = vector.shape_cast %3 : vector<8x8x128xf32> to vector<64x128xf32>
    %5 = arith.truncf %4 : vector<64x128xf32> to vector<64x128xbf16>
    %c0_3 = arith.constant 0 : index
    %c0_4 = arith.constant 0 : index
    %c0_5 = arith.constant 0 : index
    %6 = vector.load %arg2[%c0_3, %c0_4, %c0_5] : memref<9x128x128xbf16, #tpu.memory_space<vmem>>, vector<1x128x128xbf16>
    %7 = vector.shape_cast %6 : vector<1x128x128xbf16> to vector<128x128xbf16>
    %cst_6 = arith.constant dense<0.000000e+00> : vector<64x128xf32>
    %8 = tpu.matmul %5, %7, %cst_6 {dimension_numbers = #tpu.dot_dimension_numbers<[1], [0], [0], [1], [0, 0, 1, 1], [], []>} : vector<64x128xbf16>, vector<128x128xbf16>, vector<64x128xf32> -> vector<64x128xf32>
    %9 = arith.addf %0, %8 : vector<64x128xf32>
    %c0_7 = arith.constant 0 : index
    %c0_8 = arith.constant 0 : index
    %c1 = arith.constant 1 : index
    %c0_9 = arith.constant 0 : index
    %10 = vector.load %arg1[%c0_7, %c0_8, %c1, %c0_9] : memref<1x10x10x128xbf16, #tpu.memory_space<vmem>>, vector<1x8x8x128xbf16>
    %11 = vector.shape_cast %10 : vector<1x8x8x128xbf16> to vector<8x8x128xbf16>
    %12 = arith.extf %11 : vector<8x8x128xbf16> to vector<8x8x128xf32>
    %13 = vector.shape_cast %12 : vector<8x8x128xf32> to vector<64x128xf32>
    %14 = arith.truncf %13 : vector<64x128xf32> to vector<64x128xbf16>
    %c1_10 = arith.constant 1 : index
    %c0_11 = arith.constant 0 : index
    %c0_12 = arith.constant 0 : index
    %15 = vector.load %arg2[%c1_10, %c0_11, %c0_12] : memref<9x128x128xbf16, #tpu.memory_space<vmem>>, vector<1x128x128xbf16>
    %16 = vector.shape_cast %15 : vector<1x128x128xbf16> to vector<128x128xbf16>
    %cst_13 = arith.constant dense<0.000000e+00> : vector<64x128xf32>
    %17 = tpu.matmul %14, %16, %cst_13 {dimension_numbers = #tpu.dot_dimension_numbers<[1], [0], [0], [1], [0, 0, 1, 1], [], []>} : vector<64x128xbf16>, vector<128x128xbf16>, vector<64x128xf32> -> vector<64x128xf32>
    %18 = arith.addf %9, %17 : vector<64x128xf32>
    %c0_14 = arith.constant 0 : index
    %c0_15 = arith.constant 0 : index
    %c2 = arith.constant 2 : index
    %c0_16 = arith.constant 0 : index
    %19 = vector.load %arg1[%c0_14, %c0_15, %c2, %c0_16] : memref<1x10x10x128xbf16, #tpu.memory_space<vmem>>, vector<1x8x8x128xbf16>
    %20 = vector.shape_cast %19 : vector<1x8x8x128xbf16> to vector<8x8x128xbf16>
    %21 = arith.extf %20 : vector<8x8x128xbf16> to vector<8x8x128xf32>
    %22 = vector.shape_cast %21 : vector<8x8x128xf32> to vector<64x128xf32>
    %23 = arith.truncf %22 : vector<64x128xf32> to vector<64x128xbf16>
    %c2_17 = arith.constant 2 : index
    %c0_18 = arith.constant 0 : index
    %c0_19 = arith.constant 0 : index
    %24 = vector.load %arg2[%c2_17, %c0_18, %c0_19] : memref<9x128x128xbf16, #tpu.memory_space<vmem>>, vector<1x128x128xbf16>
    %25 = vector.shape_cast %24 : vector<1x128x128xbf16> to vector<128x128xbf16>
    %cst_20 = arith.constant dense<0.000000e+00> : vector<64x128xf32>
    %26 = tpu.matmul %23, %25, %cst_20 {dimension_numbers = #tpu.dot_dimension_numbers<[1], [0], [0], [1], [0, 0, 1, 1], [], []>} : vector<64x128xbf16>, vector<128x128xbf16>, vector<64x128xf32> -> vector<64x128xf32>
    %27 = arith.addf %18, %26 : vector<64x128xf32>
    %c0_21 = arith.constant 0 : index
    %c1_22 = arith.constant 1 : index
    %c0_23 = arith.constant 0 : index
    %c0_24 = arith.constant 0 : index
    %28 = vector.load %arg1[%c0_21, %c1_22, %c0_23, %c0_24] : memref<1x10x10x128xbf16, #tpu.memory_space<vmem>>, vector<1x8x8x128xbf16>
    %29 = vector.shape_cast %28 : vector<1x8x8x128xbf16> to vector<8x8x128xbf16>
    %30 = arith.extf %29 : vector<8x8x128xbf16> to vector<8x8x128xf32>
    %31 = vector.shape_cast %30 : vector<8x8x128xf32> to vector<64x128xf32>
    %32 = arith.truncf %31 : vector<64x128xf32> to vector<64x128xbf16>
    %c3 = arith.constant 3 : index
    %c0_25 = arith.constant 0 : index
    %c0_26 = arith.constant 0 : index
    %33 = vector.load %arg2[%c3, %c0_25, %c0_26] : memref<9x128x128xbf16, #tpu.memory_space<vmem>>, vector<1x128x128xbf16>
    %34 = vector.shape_cast %33 : vector<1x128x128xbf16> to vector<128x128xbf16>
    %cst_27 = arith.constant dense<0.000000e+00> : vector<64x128xf32>
    %35 = tpu.matmul %32, %34, %cst_27 {dimension_numbers = #tpu.dot_dimension_numbers<[1], [0], [0], [1], [0, 0, 1, 1], [], []>} : vector<64x128xbf16>, vector<128x128xbf16>, vector<64x128xf32> -> vector<64x128xf32>
    %36 = arith.addf %27, %35 : vector<64x128xf32>
    %c0_28 = arith.constant 0 : index
    %c1_29 = arith.constant 1 : index
    %c1_30 = arith.constant 1 : index
    %c0_31 = arith.constant 0 : index
    %37 = vector.load %arg1[%c0_28, %c1_29, %c1_30, %c0_31] : memref<1x10x10x128xbf16, #tpu.memory_space<vmem>>, vector<1x8x8x128xbf16>
    %38 = vector.shape_cast %37 : vector<1x8x8x128xbf16> to vector<8x8x128xbf16>
    %39 = arith.extf %38 : vector<8x8x128xbf16> to vector<8x8x128xf32>
    %40 = vector.shape_cast %39 : vector<8x8x128xf32> to vector<64x128xf32>
    %41 = arith.truncf %40 : vector<64x128xf32> to vector<64x128xbf16>
    %c4 = arith.constant 4 : index
    %c0_32 = arith.constant 0 : index
    %c0_33 = arith.constant 0 : index
    %42 = vector.load %arg2[%c4, %c0_32, %c0_33] : memref<9x128x128xbf16, #tpu.memory_space<vmem>>, vector<1x128x128xbf16>
    %43 = vector.shape_cast %42 : vector<1x128x128xbf16> to vector<128x128xbf16>
    %cst_34 = arith.constant dense<0.000000e+00> : vector<64x128xf32>
    %44 = tpu.matmul %41, %43, %cst_34 {dimension_numbers = #tpu.dot_dimension_numbers<[1], [0], [0], [1], [0, 0, 1, 1], [], []>} : vector<64x128xbf16>, vector<128x128xbf16>, vector<64x128xf32> -> vector<64x128xf32>
    %45 = arith.addf %36, %44 : vector<64x128xf32>
    %c0_35 = arith.constant 0 : index
    %c1_36 = arith.constant 1 : index
    %c2_37 = arith.constant 2 : index
    %c0_38 = arith.constant 0 : index
    %46 = vector.load %arg1[%c0_35, %c1_36, %c2_37, %c0_38] : memref<1x10x10x128xbf16, #tpu.memory_space<vmem>>, vector<1x8x8x128xbf16>
    %47 = vector.shape_cast %46 : vector<1x8x8x128xbf16> to vector<8x8x128xbf16>
    %48 = arith.extf %47 : vector<8x8x128xbf16> to vector<8x8x128xf32>
    %49 = vector.shape_cast %48 : vector<8x8x128xf32> to vector<64x128xf32>
    %50 = arith.truncf %49 : vector<64x128xf32> to vector<64x128xbf16>
    %c5 = arith.constant 5 : index
    %c0_39 = arith.constant 0 : index
    %c0_40 = arith.constant 0 : index
    %51 = vector.load %arg2[%c5, %c0_39, %c0_40] : memref<9x128x128xbf16, #tpu.memory_space<vmem>>, vector<1x128x128xbf16>
    %52 = vector.shape_cast %51 : vector<1x128x128xbf16> to vector<128x128xbf16>
    %cst_41 = arith.constant dense<0.000000e+00> : vector<64x128xf32>
    %53 = tpu.matmul %50, %52, %cst_41 {dimension_numbers = #tpu.dot_dimension_numbers<[1], [0], [0], [1], [0, 0, 1, 1], [], []>} : vector<64x128xbf16>, vector<128x128xbf16>, vector<64x128xf32> -> vector<64x128xf32>
    %54 = arith.addf %45, %53 : vector<64x128xf32>
    %c0_42 = arith.constant 0 : index
    %c2_43 = arith.constant 2 : index
    %c0_44 = arith.constant 0 : index
    %c0_45 = arith.constant 0 : index
    %55 = vector.load %arg1[%c0_42, %c2_43, %c0_44, %c0_45] : memref<1x10x10x128xbf16, #tpu.memory_space<vmem>>, vector<1x8x8x128xbf16>
    %56 = vector.shape_cast %55 : vector<1x8x8x128xbf16> to vector<8x8x128xbf16>
    %57 = arith.extf %56 : vector<8x8x128xbf16> to vector<8x8x128xf32>
    %58 = vector.shape_cast %57 : vector<8x8x128xf32> to vector<64x128xf32>
    %59 = arith.truncf %58 : vector<64x128xf32> to vector<64x128xbf16>
    %c6 = arith.constant 6 : index
    %c0_46 = arith.constant 0 : index
    %c0_47 = arith.constant 0 : index
    %60 = vector.load %arg2[%c6, %c0_46, %c0_47] : memref<9x128x128xbf16, #tpu.memory_space<vmem>>, vector<1x128x128xbf16>
    %61 = vector.shape_cast %60 : vector<1x128x128xbf16> to vector<128x128xbf16>
    %cst_48 = arith.constant dense<0.000000e+00> : vector<64x128xf32>
    %62 = tpu.matmul %59, %61, %cst_48 {dimension_numbers = #tpu.dot_dimension_numbers<[1], [0], [0], [1], [0, 0, 1, 1], [], []>} : vector<64x128xbf16>, vector<128x128xbf16>, vector<64x128xf32> -> vector<64x128xf32>
    %63 = arith.addf %54, %62 : vector<64x128xf32>
    %c0_49 = arith.constant 0 : index
    %c2_50 = arith.constant 2 : index
    %c1_51 = arith.constant 1 : index
    %c0_52 = arith.constant 0 : index
    %64 = vector.load %arg1[%c0_49, %c2_50, %c1_51, %c0_52] : memref<1x10x10x128xbf16, #tpu.memory_space<vmem>>, vector<1x8x8x128xbf16>
    %65 = vector.shape_cast %64 : vector<1x8x8x128xbf16> to vector<8x8x128xbf16>
    %66 = arith.extf %65 : vector<8x8x128xbf16> to vector<8x8x128xf32>
    %67 = vector.shape_cast %66 : vector<8x8x128xf32> to vector<64x128xf32>
    %68 = arith.truncf %67 : vector<64x128xf32> to vector<64x128xbf16>
    %c7 = arith.constant 7 : index
    %c0_53 = arith.constant 0 : index
    %c0_54 = arith.constant 0 : index
    %69 = vector.load %arg2[%c7, %c0_53, %c0_54] : memref<9x128x128xbf16, #tpu.memory_space<vmem>>, vector<1x128x128xbf16>
    %70 = vector.shape_cast %69 : vector<1x128x128xbf16> to vector<128x128xbf16>
    %cst_55 = arith.constant dense<0.000000e+00> : vector<64x128xf32>
    %71 = tpu.matmul %68, %70, %cst_55 {dimension_numbers = #tpu.dot_dimension_numbers<[1], [0], [0], [1], [0, 0, 1, 1], [], []>} : vector<64x128xbf16>, vector<128x128xbf16>, vector<64x128xf32> -> vector<64x128xf32>
    %72 = arith.addf %63, %71 : vector<64x128xf32>
    %c0_56 = arith.constant 0 : index
    %c2_57 = arith.constant 2 : index
    %c2_58 = arith.constant 2 : index
    %c0_59 = arith.constant 0 : index
    %73 = vector.load %arg1[%c0_56, %c2_57, %c2_58, %c0_59] : memref<1x10x10x128xbf16, #tpu.memory_space<vmem>>, vector<1x8x8x128xbf16>
    %74 = vector.shape_cast %73 : vector<1x8x8x128xbf16> to vector<8x8x128xbf16>
    %75 = arith.extf %74 : vector<8x8x128xbf16> to vector<8x8x128xf32>
    %76 = vector.shape_cast %75 : vector<8x8x128xf32> to vector<64x128xf32>
    %77 = arith.truncf %76 : vector<64x128xf32> to vector<64x128xbf16>
    %c8 = arith.constant 8 : index
    %c0_60 = arith.constant 0 : index
    %c0_61 = arith.constant 0 : index
    %78 = vector.load %arg2[%c8, %c0_60, %c0_61] : memref<9x128x128xbf16, #tpu.memory_space<vmem>>, vector<1x128x128xbf16>
    %79 = vector.shape_cast %78 : vector<1x128x128xbf16> to vector<128x128xbf16>
    %cst_62 = arith.constant dense<0.000000e+00> : vector<64x128xf32>
    %80 = tpu.matmul %77, %79, %cst_62 {dimension_numbers = #tpu.dot_dimension_numbers<[1], [0], [0], [1], [0, 0, 1, 1], [], []>} : vector<64x128xbf16>, vector<128x128xbf16>, vector<64x128xf32> -> vector<64x128xf32>
    %81 = arith.addf %72, %80 : vector<64x128xf32>
    %c0_63 = arith.constant 0 : index
    %c0_64 = arith.constant 0 : index
    %c0_65 = arith.constant 0 : index
    %82 = vector.load %arg3[%c0_63, %c0_64, %c0_65] : memref<1x64x128xf32, #tpu.memory_space<vmem>>, vector<1x64x128xf32>
    %83 = vector.shape_cast %82 : vector<1x64x128xf32> to vector<64x128xf32>
    %84 = vector.shape_cast %81 : vector<64x128xf32> to vector<1x64x128xf32>
    tpu.vector_store %arg3[%c0_63, %c0_64, %c0_65], %84 {strides = array<i32>} : memref<1x64x128xf32, #tpu.memory_space<vmem>>, vector<1x64x128xf32>,
    %cst_66 = arith.constant dense<0.000000e+00> : vector<128xf32>
    %85 = vector.multi_reduction <add>, %81, %cst_66 [0] : vector<64x128xf32> to vector<128xf32>
    %86 = vector.shape_cast %85 : vector<128xf32> to vector<1x128xf32>
    %87 = arith.mulf %81, %81 : vector<64x128xf32>
    %cst_67 = arith.constant dense<0.000000e+00> : vector<128xf32>
    %88 = vector.multi_reduction <add>, %87, %cst_67 [0] : vector<64x128xf32> to vector<128xf32>
    %89 = vector.shape_cast %88 : vector<128xf32> to vector<1x128xf32>
    %cst_68 = arith.constant 0.000000e+00 : f32
    %90 = vector.broadcast %cst_68 : f32 to vector<6x128xf32>
    %91 = tpu.concatenate %86, %89, %90 in 0 : vector<1x128xf32>, vector<1x128xf32>, vector<6x128xf32> -> vector<8x128xf32>
    %c0_69 = arith.constant 0 : index
    %c0_70 = arith.constant 0 : index
    %c0_71 = arith.constant 0 : index
    %92 = vector.load %arg4[%c0_69, %c0_70, %c0_71] : memref<1x8x128xf32, #tpu.memory_space<vmem>>, vector<1x8x128xf32>
    %93 = vector.shape_cast %92 : vector<1x8x128xf32> to vector<8x128xf32>
    %94 = vector.shape_cast %91 : vector<8x128xf32> to vector<1x8x128xf32>
    tpu.vector_store %arg4[%c0_69, %c0_70, %c0_71], %94 {strides = array<i32>} : memref<1x8x128xf32, #tpu.memory_space<vmem>>, vector<1x8x128xf32>,
    return
  }
  func.func @transform_0(%arg0: i32) -> (i32, i32, i32, i32) {
    %c0_i32 = arith.constant 0 : i32
    %c0_i32_0 = arith.constant 0 : i32
    %c0_i32_1 = arith.constant 0 : i32
    %c0_i32_2 = arith.constant 0 : i32
    return %arg0, %c0_i32, %c0_i32_0, %c0_i32_1 : i32, i32, i32, i32
  }
  func.func @transform_1(%arg0: i32) -> (i32, i32, i32) {
    %c0_i32 = arith.constant 0 : i32
    %c0_i32_0 = arith.constant 0 : i32
    %c0_i32_1 = arith.constant 0 : i32
    %c0_i32_2 = arith.constant 0 : i32
    return %c0_i32, %c0_i32_0, %c0_i32_1 : i32, i32, i32
  }
  func.func @transform_2(%arg0: i32) -> (i32, i32, i32) {
    %c0_i32 = arith.constant 0 : i32
    %c0_i32_0 = arith.constant 0 : i32
    %c0_i32_1 = arith.constant 0 : i32
    return %arg0, %c0_i32, %c0_i32_0 : i32, i32, i32
  }
  func.func @transform_3(%arg0: i32) -> (i32, i32, i32) {
    %c0_i32 = arith.constant 0 : i32
    %c0_i32_0 = arith.constant 0 : i32
    %c0_i32_1 = arith.constant 0 : i32
    return %arg0, %c0_i32, %c0_i32_0 : i32, i32, i32
  }
}

module attributes {stable_mosaic.version = 11 : i64} {
  func.func @_bn_add_relu_kernel(%arg0: i32, %arg1: memref<1x64x128xf32, #tpu.memory_space<vmem>>, %arg2: memref<1x128xf32, #tpu.memory_space<vmem>>, %arg3: memref<1x128xf32, #tpu.memory_space<vmem>>, %arg4: memref<1x64x128xf32, #tpu.memory_space<vmem>>, %arg5: memref<1x128xf32, #tpu.memory_space<vmem>>, %arg6: memref<1x128xf32, #tpu.memory_space<vmem>>, %arg7: memref<1x64x128xf32, #tpu.memory_space<vmem>>) attributes {dimension_semantics = [#tpu.dimension_semantics<parallel>], iteration_bounds = array<i64: 2>, scalar_prefetch = 0 : i64, scratch_operands = 0 : i64, tpu.core_type = #tpu.core_type<tc>, window_params = [{transform_indices = @transform_0, window_bounds = array<i64: 1, 64, 128>}, {pipeline_mode = #tpu.pipeline_mode<synchronous>, transform_indices = @transform_1, window_bounds = array<i64: 1, 128>}, {pipeline_mode = #tpu.pipeline_mode<synchronous>, transform_indices = @transform_2, window_bounds = array<i64: 1, 128>}, {transform_indices = @transform_3, window_bounds = array<i64: 1, 64, 128>}, {pipeline_mode = #tpu.pipeline_mode<synchronous>, transform_indices = @transform_4, window_bounds = array<i64: 1, 128>}, {pipeline_mode = #tpu.pipeline_mode<synchronous>, transform_indices = @transform_5, window_bounds = array<i64: 1, 128>}, {transform_indices = @transform_6, window_bounds = array<i64: 1, 64, 128>}]} {
    %c0 = arith.constant 0 : index
    %c0_0 = arith.constant 0 : index
    %c0_1 = arith.constant 0 : index
    %0 = vector.load %arg1[%c0, %c0_0, %c0_1] : memref<1x64x128xf32, #tpu.memory_space<vmem>>, vector<1x64x128xf32>
    %1 = vector.shape_cast %0 : vector<1x64x128xf32> to vector<64x128xf32>
    %c0_2 = arith.constant 0 : index
    %c0_3 = arith.constant 0 : index
    %2 = vector.load %arg2[%c0_2, %c0_3] : memref<1x128xf32, #tpu.memory_space<vmem>>, vector<1x128xf32>
    %3 = vector.broadcast %2 : vector<1x128xf32> to vector<64x128xf32>
    %4 = arith.mulf %1, %3 : vector<64x128xf32>
    %c0_4 = arith.constant 0 : index
    %c0_5 = arith.constant 0 : index
    %5 = vector.load %arg3[%c0_4, %c0_5] : memref<1x128xf32, #tpu.memory_space<vmem>>, vector<1x128xf32>
    %6 = vector.broadcast %5 : vector<1x128xf32> to vector<64x128xf32>
    %7 = arith.addf %4, %6 : vector<64x128xf32>
    %c0_6 = arith.constant 0 : index
    %c0_7 = arith.constant 0 : index
    %c0_8 = arith.constant 0 : index
    %8 = vector.load %arg4[%c0_6, %c0_7, %c0_8] : memref<1x64x128xf32, #tpu.memory_space<vmem>>, vector<1x64x128xf32>
    %9 = vector.shape_cast %8 : vector<1x64x128xf32> to vector<64x128xf32>
    %c0_9 = arith.constant 0 : index
    %c0_10 = arith.constant 0 : index
    %10 = vector.load %arg5[%c0_9, %c0_10] : memref<1x128xf32, #tpu.memory_space<vmem>>, vector<1x128xf32>
    %11 = vector.broadcast %10 : vector<1x128xf32> to vector<64x128xf32>
    %12 = arith.mulf %9, %11 : vector<64x128xf32>
    %c0_11 = arith.constant 0 : index
    %c0_12 = arith.constant 0 : index
    %13 = vector.load %arg6[%c0_11, %c0_12] : memref<1x128xf32, #tpu.memory_space<vmem>>, vector<1x128xf32>
    %14 = vector.broadcast %13 : vector<1x128xf32> to vector<64x128xf32>
    %15 = arith.addf %12, %14 : vector<64x128xf32>
    %16 = arith.addf %7, %15 : vector<64x128xf32>
    %cst = arith.constant 0.000000e+00 : f32
    %17 = vector.broadcast %cst : f32 to vector<64x128xf32>
    %18 = arith.maximumf %16, %17 : vector<64x128xf32>
    %c0_13 = arith.constant 0 : index
    %c0_14 = arith.constant 0 : index
    %c0_15 = arith.constant 0 : index
    %19 = vector.load %arg7[%c0_13, %c0_14, %c0_15] : memref<1x64x128xf32, #tpu.memory_space<vmem>>, vector<1x64x128xf32>
    %20 = vector.shape_cast %19 : vector<1x64x128xf32> to vector<64x128xf32>
    %21 = vector.shape_cast %18 : vector<64x128xf32> to vector<1x64x128xf32>
    tpu.vector_store %arg7[%c0_13, %c0_14, %c0_15], %21 {strides = array<i32>} : memref<1x64x128xf32, #tpu.memory_space<vmem>>, vector<1x64x128xf32>,
    return
  }
  func.func @transform_0(%arg0: i32) -> (i32, i32, i32) {
    %c0_i32 = arith.constant 0 : i32
    %c0_i32_0 = arith.constant 0 : i32
    %c0_i32_1 = arith.constant 0 : i32
    return %arg0, %c0_i32, %c0_i32_0 : i32, i32, i32
  }
  func.func @transform_1(%arg0: i32) -> (i32, i32) {
    %c0_i32 = arith.constant 0 : i32
    %c0_i32_0 = arith.constant 0 : i32
    %c0_i32_1 = arith.constant 0 : i32
    return %c0_i32, %c0_i32_0 : i32, i32
  }
  func.func @transform_2(%arg0: i32) -> (i32, i32) {
    %c0_i32 = arith.constant 0 : i32
    %c0_i32_0 = arith.constant 0 : i32
    %c0_i32_1 = arith.constant 0 : i32
    return %c0_i32, %c0_i32_0 : i32, i32
  }
  func.func @transform_3(%arg0: i32) -> (i32, i32, i32) {
    %c0_i32 = arith.constant 0 : i32
    %c0_i32_0 = arith.constant 0 : i32
    %c0_i32_1 = arith.constant 0 : i32
    return %arg0, %c0_i32, %c0_i32_0 : i32, i32, i32
  }
  func.func @transform_4(%arg0: i32) -> (i32, i32) {
    %c0_i32 = arith.constant 0 : i32
    %c0_i32_0 = arith.constant 0 : i32
    %c0_i32_1 = arith.constant 0 : i32
    return %c0_i32, %c0_i32_0 : i32, i32
  }
  func.func @transform_5(%arg0: i32) -> (i32, i32) {
    %c0_i32 = arith.constant 0 : i32
    %c0_i32_0 = arith.constant 0 : i32
    %c0_i32_1 = arith.constant 0 : i32
    return %c0_i32, %c0_i32_0 : i32, i32
  }
  func.func @transform_6(%arg0: i32) -> (i32, i32, i32) {
    %c0_i32 = arith.constant 0 : i32
    %c0_i32_0 = arith.constant 0 : i32
    %c0_i32_1 = arith.constant 0 : i32
    return %arg0, %c0_i32, %c0_i32_0 : i32, i32, i32
  }
}

</mosaic_0001>

<bundles_post_ra>
// kernel: res_block_forward.5
= control target key start
LH: loop header
LB: loop body
LE: loop exit
PB: predicated region body
PF: predicated region fallthrough
CT: control target
= control target key end

     0   :  { %s402_s12 = smov 0   ;;  %s429_s0 = inlined_call_operand.vmem [shape: f32[2,64,128], index: 0, kind: input, shape index: {}]   ;;  %s430_s1 = inlined_call_operand.vmem [shape: f32[1,128], index: 1, kind: input, shape index: {}]   ;;  %s431_s2 = inlined_call_operand.vmem [shape: f32[1,128], index: 2, kind: input, shape index: {}]   ;;  %s432_s3 = inlined_call_operand.vmem [shape: bf16[2,64,128], index: 3, kind: output, shape index: {}]  }
   0x1 LB: > { %s312_s13 = sadd.s32 4294967295, %s380_s12   ;;  %p316_p0 = scmp.ge.s32.totalorder %s380_s12, 1  ;;  %s380_s12 = sphi %s402_s12, %s13_s12  }
   0x2   : > { %p137_p1 = scmp.lt.s32.totalorder %s380_s12, 3 }
   0x4   : > { %p138_p2 = pnand %p316_p0, %p137_p1 }
   0x5   : > { %p161_p3 = scmp.lt.s32.totalorder (!%p138_p2), %s312_s13, 1  ;;  %v321_v0 = vld [vmem:[%s430_s1] ss:$0 sm:$0xff] (!%p138_p2) }
   0x6   : > { %141 = sbr.rel (%p138_p2) target bundleno = 29 (0x1d), region = 32  ;;  %v322_v1 = vld [vmem:[%s431_s2] ss:$0 sm:$0xff] (!%p138_p2) }
   0xd   : > { %s434_s13 = smov (!%p161_p3, %s312_s13), 1 }
   0xe   : > { %s333_s14 = sshll.u32 %s434_s13, 6  ;;  %s334_s22 = sshll.u32 %s434_s13, 5 }
   0xf   : > { %s165_s19 = scalar_lea.vmem %s429_s0, %s333_s14  ;;  %s170_s25 = scalar_lea.vmem %s432_s3, %s334_s22 }
  0x10   : > { %v171_v2 = vld [vmem:[%s165_s19] sm:$0xff]  ;;  %v172_v3 = vld [vmem:[%s165_s19 + $0x8] sm:$0xff]  ;;  %v173_v4 = vld [vmem:[%s165_s19 + $0x10] sm:$0xff] }
  0x11   : > { %v186_v5 = vmul.f32 %v321_v0, %v171_v2  ;;  %v187_v6 = vmul.f32 %v321_v0, %v172_v3  ;;  %v174_v7 = vld [vmem:[%s165_s19 + $0x18] sm:$0xff]  ;;  %v188_v8 = vmul.f32 %v321_v0, %v173_v4  ;;  %v175_v9 = vld [vmem:[%s165_s19 + $0x20] sm:$0xff]  ;;  %v176_v10 = vld [vmem:[%s165_s19 + $0x28] sm:$0xff] }
  0x12   : > { %v189_v11 = vmul.f32 %v321_v0, %v174_v7  ;;  %v190_v12 = vmul.f32 %v321_v0, %v175_v9  ;;  %v191_v13 = vmul.f32 %v321_v0, %v176_v10  ;;  %v177_v14 = vld [vmem:[%s165_s19 + $0x30] sm:$0xff]  ;;  %v178_v15 = vld [vmem:[%s165_s19 + $0x38] sm:$0xff] }
  0x13   : > { %v201_v16 = vadd.f32 %v322_v1, %v186_v5  ;;  %v202_v17 = vadd.f32 %v322_v1, %v187_v6  ;;  %v203_v18 = vadd.f32 %v322_v1, %v188_v8  ;;  %v192_v19 = vmul.f32 %v321_v0, %v177_v14 }
  0x14   : > { %v204_v20 = vadd.f32 %v322_v1, %v189_v11  ;;  %v205_v21 = vadd.f32 %v322_v1, %v190_v12  ;;  %v206_v22 = vadd.f32 %v322_v1, %v191_v13  ;;  %v193_v23 = vmul.f32 %v321_v0, %v178_v15 }
  0x15   : > { %v209_v24 = vmax.f32 %v201_v16, 0.0  ;;  %v210_v25 = vmax.f32 %v202_v17, 0.0  ;;  %v211_v26 = vmax.f32 %v203_v18, 0.0  ;;  %v207_v27 = vadd.f32 %v322_v1, %v192_v19 }
  0x16   : > { %v212_v28 = vmax.f32 %v204_v20, 0.0  ;;  %v213_v29 = vmax.f32 %v205_v21, 0.0  ;;  %v214_v30 = vmax.f32 %v206_v22, 0.0  ;;  %v208_v31 = vadd.f32 %v322_v1, %v193_v23 }
  0x17   : > { %v346_v32 = vpack.c.bf16 %v210_v25, %v209_v24  ;;  %v215_v33 = vmax.f32 %v207_v27, 0.0 }
  0x18   : > { %v351_v34 = vpack.c.bf16 %v212_v28, %v211_v26  ;;  %v356_v35 = vpack.c.bf16 %v214_v30, %v213_v29  ;;  %v216_v36 = vmax.f32 %v208_v31, 0.0 }
  0x19   : > { %347 = vst [vmem:[%s170_s25] sm:$0xff] %v346_v32  }
  0x1a   : > { %363 = vst [vmem:[%s170_s25 + $0x8] sm:$0xff] %v351_v34   ;;  %364 = vst [vmem:[%s170_s25 + $0x10] sm:$0xff] %v356_v35   ;;  %v361_v37 = vpack.c.bf16 %v216_v36, %v215_v33 }
  0x1c   : > { %365 = vst [vmem:[%s170_s25 + $0x18] sm:$0xff] %v361_v37  }
  0x1d PF: > { %s13_s12 = sadd.s32 1, %s380_s12  }
  0x1e   : > { %p10_p4 = scmp.ge.s32.totalorder %s13_s12, 4  }
  0x20   :  { %12 = sbr.rel (!%p10_p4) target bundleno = 1 (0x1), region = 62 }

// kernel: res_block_forward.4
= control target key start
LH: loop header
LB: loop body
LE: loop exit
PB: predicated region body
PF: predicated region fallthrough
CT: control target
= control target key end

     0   :  { %s3116_s21 = smov 0   ;;  %s3564_s0 = inlined_call_operand.vmem [shape: bf16[2,9,9,512], index: 0, kind: input, shape index: {}]   ;;  %s3565_s1 = inlined_call_operand.vmem [shape: bf16[9,128,128], index: 1, kind: input, shape index: {}]   ;;  %s3566_s2 = inlined_call_operand.vmem [shape: bf16[128,128], index: 2, kind: input, shape index: {}]   ;;  %s3567_s3 = inlined_call_operand.vmem [shape: f32[2,64,128], index: 3, kind: output, shape index: {0}]   ;;  %s3568_s4 = inlined_call_operand.vmem [shape: f32[2,64,128], index: 4, kind: output, shape index: {1}]   ;;  %s3569_s5 = inlined_call_operand.vmem [shape: f32[2,8,128], index: 5, kind: output, shape index: {2}]   ;;  %s3570_s6 = inlined_call_operand.vmem [shape: f32[2,8,128], index: 6, kind: output, shape index: {3}]  }
   0x1 LB: > { %s2276_s22 = sadd.s32 4294967295, %s3079_s21   ;;  %p2280_p0 = scmp.ge.s32.totalorder %s3079_s21, 1  ;;  %s3079_s21 = sphi %s3116_s21, %s17_s21  }
   0x2   : > { %p219_p1 = scmp.lt.s32.totalorder %s3079_s21, 3 }
   0x4   : > { %p220_p2 = pnand %p2280_p0, %p219_p1 }
   0x5   : > { %v2993_v0 = vld [vmem:[%s3565_s1 + $0x40] sm:$0xff] (!%p220_p2)   ;;  %p262_p3 = scmp.lt.s32.totalorder (!%p220_p2), %s2276_s22, 1  ;;  %v2995_v2 = vld [vmem:[%s3565_s1 + $0x48] sm:$0xff] (!%p220_p2)   ;;  %v2997_v4 = vld [vmem:[%s3565_s1 + $0x50] sm:$0xff] (!%p220_p2)   ;;  %vm633_vm0 = vcmask (!%p220_p2), 1046528   ;;  %vm1927_vm1 = vcmask (!%p220_p2), 1040384  }
   0x6   : > { %223 = sbr.rel (%p220_p2) target bundleno = 415 (0x19f), region = 32  ;;  %v2994_v1 = vld [vmem:[%s3565_s1 + $0x100] sm:$0xff] (!%p220_p2)   ;;  %2680 = vmatprep.subr.bf16.mxu1 (!%p220_p2), %v2993_v0  ;;  %v2996_v3 = vld [vmem:[%s3565_s1 + $0x108] sm:$0xff] (!%p220_p2)   ;;  %v2998_v5 = vld [vmem:[%s3565_s1 + $0x110] sm:$0xff] (!%p220_p2)   ;;  %vm1929_vm2 = vcmask (!%p220_p2), 1041408  }
   0x7   : > { %2776 = vmatprep.subr.bf16.mxu0 (!%p220_p2), %v2994_v1  ;;  %2681 = vmatpush3.bf16.msra.mxu1 (!%p220_p2), %v2993_v0  ;;  %v2999_v6 = vld [vmem:[%s3565_s1 + $0x58] sm:$0xff] (!%p220_p2)   ;;  %v3001_v8 = vld [vmem:[%s3565_s1 + $0x60] sm:$0xff] (!%p220_p2)   ;;  %v3003_v10 = vld [vmem:[%s3565_s1 + $0x68] sm:$0xff] (!%p220_p2)  }
   0x8   : > { %2777 = vmatpush3.bf16.msra.mxu0 (!%p220_p2), %v2994_v1  ;;  %2682 = vmatprep.subr.bf16.mxu1 (!%p220_p2), %v2995_v2  ;;  %v3000_v7 = vld [vmem:[%s3565_s1 + $0x118] sm:$0xff] (!%p220_p2)   ;;  %v3002_v9 = vld [vmem:[%s3565_s1 + $0x120] sm:$0xff] (!%p220_p2)   ;;  %v3004_v13 = vld [vmem:[%s3565_s1 + $0x128] sm:$0xff] (!%p220_p2)  }
   0x9   : > { %2778 = vmatprep.subr.bf16.mxu0 (!%p220_p2), %v2996_v3  ;;  %v3005_v18 = vld [vmem:[%s3565_s1 + $0x70] sm:$0xff] (!%p220_p2)   ;;  %v3007_v20 = vld [vmem:[%s3565_s1 + $0x78] sm:$0xff] (!%p220_p2)   ;;  %v3009_v23 = vld [vmem:[%s3565_s1] sm:$0xff] (!%p220_p2)  }
   0xa   : > { %v3006_v19 = vld [vmem:[%s3565_s1 + $0x130] sm:$0xff] (!%p220_p2)   ;;  %v3008_v21 = vld [vmem:[%s3565_s1 + $0x138] sm:$0xff] (!%p220_p2)   ;;  %v3010_v27 = vld [vmem:[%s3565_s1 + $0x140] sm:$0xff] (!%p220_p2)  }
   0xb   : > { %2683 = vmatpush3.bf16.msra.mxu1 (!%p220_p2), %v2995_v2  ;;  %v3011_v32 = vld [vmem:[%s3565_s1 + $0x8] sm:$0xff] (!%p220_p2)   ;;  %v3013_v37 = vld [vmem:[%s3565_s1 + $0x10] sm:$0xff] (!%p220_p2)   ;;  %v3015_v45 = vld [vmem:[%s3565_s1 + $0x18] sm:$0xff] (!%p220_p2)  }
   0xc   : > { %2779 = vmatpush3.bf16.msra.mxu0 (!%p220_p2), %v2996_v3  ;;  %2684 = vmatprep.subr.bf16.mxu1 (!%p220_p2), %v2997_v4  ;;  %v3012_v35 = vld [vmem:[%s3565_s1 + $0x148] sm:$0xff] (!%p220_p2)   ;;  %v3014_v43 = vld [vmem:[%s3565_s1 + $0x150] sm:$0xff] (!%p220_p2)   ;;  %v3016_v56 = vld [vmem:[%s3565_s1 + $0x158] sm:$0xff] (!%p220_p2)  }
   0xd   : > { %s3572_s22 = smov (!%p262_p3, %s2276_s22), 1  ;;  %2780 = vmatprep.subr.bf16.mxu0 %v2998_v5  ;;  %v3017_v62 = vld [vmem:[%s3565_s1 + $0x20] sm:$0xff]  }
   0xe   : > { %s2984_s15 = smul.u32 288, %s3572_s22  ;;  %v3018_v0 = vld [vmem:[%s3565_s1 + $0x160] sm:$0xff]   ;;  %s2286_s23 = sshll.u32 %s3572_s22, 3 }
   0xf   : > { %2685 = vmatpush3.bf16.msra.mxu1 %v2997_v4  ;;  %s284_s27 = scalar_lea.vmem %s3570_s6, %s2286_s23  ;;  %s280_s30 = scalar_lea.vmem %s3569_s5, %s2286_s23 }
  0x10   : > { %2781 = vmatpush3.bf16.msra.mxu0 %v2998_v5  ;;  %2686 = vmatprep.subr.bf16.mxu1 %v2999_v6  ;;  %s3160_s24 = scalar_lea.vmem %s3564_s0, %s2984_s15 }
  0x11   : > { %2782 = vmatprep.subr.bf16.mxu0 %v3000_v7  ;;  %v322_v11 = vld [vmem:[%s3160_s24 + $0x4] sm:$0xf]  ;;  %v966_v15 = vld [vmem:[%s3160_s24 + $0xc] sm:$0xf]  ;;  %v286_v44 = vld [vmem:[%s3160_s24] sm:$0xf] }
  0x12   : > { %v323_v12 = vld [vmem:[%s3160_s24 + $0x24] sm:$0xf]  ;;  %v967_v16 = vld [vmem:[%s3160_s24 + $0x2c] sm:$0xf]  ;;  %v287_v47 = vld [vmem:[%s3160_s24 + $0x20] sm:$0xf] }
  0x13   : > { %2687 = vmatpush3.bf16.msra.mxu1 %v2999_v6  ;;  %v2292_v14 = vcombine.low %v322_v11, %v323_v12  ;;  %v2380_v17 = vcombine.low %v966_v15, %v967_v16  ;;  %v324_v22 = vld [vmem:[%s3160_s24 + $0x44] sm:$0xf]  ;;  %v968_v25 = vld [vmem:[%s3160_s24 + $0x4c] sm:$0xf]  ;;  %v3220_v49 = vld [vmem:[%s3160_s24] ss:$8 sps:$4 sm:$0xff]   ;;  %v2288_v57 = vcombine.low %v286_v44, %v287_v47 }
  0x14   : > { %2783 = vmatpush3.bf16.msra.mxu0 %v3000_v7  ;;  %2688 = vmatprep.subr.bf16.mxu1 %v3001_v8  ;;  %v325_v24 = vld [vmem:[%s3160_s24 + $0x64] sm:$0xf]  ;;  %v969_v26 = vld [vmem:[%s3160_s24 + $0x6c] sm:$0xf]  ;;  %v1125_v50 = vld [vmem:[%s3160_s24 + $0x18] sm:$0x1]  ;;  %v1140_v53 = vunpack.c.h.bf16 %v3220_v49 }
  0x15   : > { %2784 = vmatprep.subr.bf16.mxu0 %v3002_v9  ;;  %2696 = vmatprep.mubr.bf16.mxu1 %v2292_v14  ;;  %v2293_v28 = vcombine.low %v324_v22, %v325_v24  ;;  %v326_v29 = vld [vmem:[%s3160_s24 + $0x84] sm:$0xf]  ;;  %v2381_v30 = vcombine.low %v968_v25, %v969_v26  ;;  %v970_v33 = vld [vmem:[%s3160_s24 + $0x8c] sm:$0xf]  ;;  %v3224_v51 = vld [vmem:[%s3160_s24 + $0x20] ss:$8 sps:$4 sm:$0xff]   ;;  %v1141_v54 = vunpack.c.l.bf16 %v1125_v50 }
  0x16   : > { %2792 = vmatprep.mubr.bf16.mxu0 %v2380_v17  ;;  %v327_v31 = vld [vmem:[%s3160_s24 + $0xa4] sm:$0xf]  ;;  %v971_v34 = vld [vmem:[%s3160_s24 + $0xac] sm:$0xf]  ;;  %v1127_v52 = vld [vmem:[%s3160_s24 + $0x38] sm:$0x1]  ;;  %v1142_v55 = vunpack.c.h.bf16 %v3224_v51 }
  0x17   : > { %2689 = vmatpush3.bf16.msra.mxu1 %v3001_v8  ;;  %v2294_v36 = vcombine.low %v326_v29, %v327_v31  ;;  %v2382_v38 = vcombine.low %v970_v33, %v971_v34  ;;  %v328_v39 = vld [vmem:[%s3160_s24 + $0xc4] sm:$0xf]  ;;  %v972_v41 = vld [vmem:[%s3160_s24 + $0xcc] sm:$0xf]  ;;  %v1143_v58 = vunpack.c.l.bf16 %v1127_v52  ;;  %v1172_v59 = vrot.slane %v1140_v53, 1  ;;  %v3021_v14 = vld [vmem:[%s3565_s1 + $0x30] sm:$0xff]  }
  0x18   : > { %2785 = vmatpush3.bf16.msra.mxu0 %v3002_v9  ;;  %2690 = vmatprep.subr.bf16.mxu1 %v3003_v10  ;;  %v329_v40 = vld [vmem:[%s3160_s24 + $0xe4] sm:$0xf]  ;;  %v973_v42 = vld [vmem:[%s3160_s24 + $0xec] sm:$0xf]  ;;  %v1173_v60 = vrot.slane %v1141_v54, 1  ;;  %v1175_v61 = vrot.slane %v1142_v55, 1 }
  0x19   : > { %2786 = vmatprep.subr.bf16.mxu0 %v3004_v13  ;;  %v2295_v46 = vcombine.low %v328_v39, %v329_v40  ;;  %v2383_v48 = vcombine.low %v972_v41, %v973_v42  ;;  %v1176_v63 = vrot.slane %v1143_v58, 1  ;;  %v3241_v3 = vld [vmem:[%s3160_s24 + $0x40] ss:$8 sps:$4 sm:$0xff]   ;;  %v1129_v4 = vld [vmem:[%s3160_s24 + $0x58] sm:$0x1]  ;;  %v3022_v15 = vld [vmem:[%s3565_s1 + $0x170] sm:$0xff]  }
  0x1a   : > { %v1174_v1 = vsel %vm633_vm0, %v1172_v59, %v1173_v60  ;;  %v3245_v6 = vld [vmem:[%s3160_s24 + $0x60] ss:$8 sps:$4 sm:$0xff]   ;;  %v1131_v7 = vld [vmem:[%s3160_s24 + $0x78] sm:$0x1]  ;;  %v1145_v11 = vunpack.c.l.bf16 %v1129_v4  ;;  %v586_v55 = vld [vmem:[%s3160_s24 + $0x10] sm:$0x1] }
  0x1b   : > { %2691 = vmatpush3.bf16.msra.mxu1 %v3003_v10  ;;  %v1177_v2 = vsel %vm633_vm0, %v1175_v61, %v1176_v63  ;;  %v3019_v8 = vld [vmem:[%s3565_s1 + $0x28] sm:$0xff]   ;;  %v1144_v10 = vunpack.c.h.bf16 %v3241_v3  ;;  %v1146_v12 = vunpack.c.h.bf16 %v3245_v6  ;;  %v1133_v22 = vld [vmem:[%s3160_s24 + $0x98] sm:$0x1]  ;;  %v288_v31 = vld [vmem:[%s3160_s24 + $0x40] sm:$0xf]  ;;  %v602_v61 = vunpack.c.l.bf16 %v586_v55 }
  0x1c   : > { %2787 = vmatpush3.bf16.msra.mxu0 %v3004_v13  ;;  %2692 = vmatprep.subr.bf16.mxu1 %v3005_v18  ;;  %v1204_v5 = vpack.c.bf16 %v1177_v2, %v1174_v1  ;;  %v3020_v9 = vld [vmem:[%s3565_s1 + $0x168] sm:$0xff]   ;;  %v1147_v13 = vunpack.c.l.bf16 %v1131_v7  ;;  %v1179_v17 = vrot.slane %v1145_v11, 1  ;;  %v1135_v24 = vld [vmem:[%s3160_s24 + $0xb8] sm:$0x1]  ;;  %v290_v41 = vld [vmem:[%s3160_s24 + $0x80] sm:$0xf] }
  0x1d   : > { %2788 = vmatprep.subr.bf16.mxu0 %v3006_v19  ;;  %v1178_v16 = vrot.slane %v1144_v10, 1  ;;  %v3024_v26 = vld [vmem:[%s3565_s1 + $0x178] sm:$0xff]   ;;  %v1151_v29 = vunpack.c.l.bf16 %v1135_v24  ;;  %v3289_v40 = vld [vmem:[%s3160_s24 + $0xc0] ss:$8 sps:$4 sm:$0xff]   ;;  %v588_v60 = vld [vmem:[%s3160_s24 + $0x30] sm:$0x1] }
  0x1e   : > { %v1137_v42 = vld [vmem:[%s3160_s24 + $0xd8] sm:$0x1]  ;;  %v291_v53 = vld [vmem:[%s3160_s24 + $0xa0] sm:$0xf]  ;;  %v3028_v1 = vld [vmem:[%s3565_s1 + $0x188] sm:$0xff]  }
  0x1f   : > { %2693 = vmatpush3.bf16.msra.mxu1 %v3005_v18  ;;  %v1181_v18 = vrot.slane %v1146_v12, 1  ;;  %v1180_v33 = vsel %vm633_vm0, %v1178_v16, %v1179_v17  ;;  %v1188_v39 = vrot.slane %v1151_v29, 1  ;;  %v1139_v44 = vld [vmem:[%s3160_s24 + $0xf8] sm:$0x1]  ;;  %v2290_v2 = vcombine.low %v290_v41, %v291_v53  ;;  %v3030_v11 = vld [vmem:[%s3565_s1 + $0x190] sm:$0xff]   ;;  %v3034_v29 = vld [vmem:[%s3565_s1 + $0x1a0] sm:$0xff]  }
  0x20   : > { %2789 = vmatpush3.bf16.msra.mxu0 %v3006_v19  ;;  %2694 = vmatprep.subr.bf16.mxu1 %v3007_v20  ;;  %v1182_v19 = vrot.slane %v1147_v13, 1  ;;  %v1155_v54 = vunpack.c.l.bf16 %v1139_v44  ;;  %v292_v12 = vld [vmem:[%s3160_s24 + $0xc0] sm:$0xf]  ;;  %v3031_v24 = vld [vmem:[%s3565_s1 + $0x98] sm:$0xff]   ;;  %v3037_v41 = vld [vmem:[%s3565_s1 + $0xb0] sm:$0xff]  }
  0x21   : > { %2790 = vmatprep.subr.bf16.mxu0 %v3008_v21  ;;  %v293_v13 = vld [vmem:[%s3160_s24 + $0xe0] sm:$0xf]  ;;  %v3040_v53 = vld [vmem:[%s3565_s1 + $0x1b8] sm:$0xff]  }
  0x22   : > { %v1183_v34 = vsel %vm633_vm0, %v1181_v18, %v1182_v19  ;;  %v2432_v16 = vld [vmem:[%s3160_s24 + $0x20] sm:$0xf]  ;;  %v2291_v17 = vcombine.low %v292_v12, %v293_v13  ;;  %v3043_v12 = vld [vmem:[%s3565_s1 + $0xc8] sm:$0xff]  }
  0x23   : > { %2695 = vmatpush3.bf16.msra.mxu1 %v3007_v20  ;;  %v3023_v20 = vld [vmem:[%s3565_s1 + $0x38] sm:$0xff]   ;;  %v1205_v52 = vpack.c.bf16 %v1183_v34, %v1180_v33  ;;  %v3036_v33 = vld [vmem:[%s3565_s1 + $0x1a8] sm:$0xff]   ;;  %v605_v34 = vunpack.c.l.bf16 %v3241_v3  ;;  %v3038_v3 = vld [vmem:[%s3565_s1 + $0x1b0] sm:$0xff]  }
  0x24   : > { %2791 = vmatpush3.bf16.msra.mxu0 %v3008_v21  ;;  %2704 = vmatprep.subr.bf16.mxu1 %v3009_v23  ;;  %v3266_v21 = vld [vmem:[%s3160_s24 + $0x80] ss:$8 sps:$4 sm:$0xff]  }
  0x25   : > { %2800 = vmatprep.subr.bf16.mxu0 %v3010_v27  ;;  %v1148_v25 = vunpack.c.h.bf16 %v3266_v21  ;;  %v3044_v13 = vld [vmem:[%s3565_s1 + $0x1c8] sm:$0xff]  }
  0x26   : > { %2697 = vmatmul.mubr.bf16.vlgmr.msra.gmra.mrb[0].mxu1 %v2293_v28 }
  0x27   : > { %2705 = vmatpush3.bf16.msra.mxu1 %v3009_v23  ;;  %2793 = vmatmul.mubr.bf16.vlgmr.msra.gmra.mrb[0].mxu0 %v2381_v30  ;;  %v3270_v23 = vld [vmem:[%s3160_s24 + $0xa0] ss:$8 sps:$4 sm:$0xff]  }
  0x28   : > { %2801 = vmatpush3.bf16.msra.mxu0 %v3010_v27  ;;  %2706 = vmatprep.subr.bf16.mxu1 %v3011_v32  ;;  %v1149_v27 = vunpack.c.l.bf16 %v1133_v22  ;;  %v1150_v28 = vunpack.c.h.bf16 %v3270_v23  ;;  %v3025_v30 = vld [vmem:[%s3565_s1 + $0x80] sm:$0xff]   ;;  %v611_v44 = vunpack.c.l.bf16 %v3270_v23  ;;  %v600_v23 = vld [vmem:[%s3160_s24 + $0xf0] sm:$0x1] }
  0x29   : > { %2802 = vmatprep.subr.bf16.mxu0 %v3012_v35  ;;  %2700 = vmatprep.mubr.bf16.mxu1 %v2294_v36  ;;  %v1184_v36 = vrot.slane %v1148_v25, 1  ;;  %v3032_v25 = vld [vmem:[%s3565_s1 + $0x198] sm:$0xff]  }
  0x2a   : > { %2796 = vmatprep.mubr.bf16.mxu0 %v2382_v38  ;;  %v1187_v38 = vrot.slane %v1150_v28, 1  ;;  %v3033_v28 = vld [vmem:[%s3565_s1 + $0xa0] sm:$0xff]  }
  0x2b   : > { %2707 = vmatpush3.bf16.msra.mxu1 %v3011_v32  ;;  %v289_v32 = vld [vmem:[%s3160_s24 + $0x60] sm:$0xf] }
  0x2c   : > { %2803 = vmatpush3.bf16.msra.mxu0 %v3012_v35  ;;  %2708 = vmatprep.subr.bf16.mxu1 %v3013_v37  ;;  %v3026_v35 = vld [vmem:[%s3565_s1 + $0x180] sm:$0xff]   ;;  %v2289_v50 = vcombine.low %v288_v31, %v289_v32  ;;  %v1189_v58 = vsel %vm633_vm0, %v1187_v38, %v1188_v39  ;;  %v590_v31 = vld [vmem:[%s3160_s24 + $0x50] sm:$0x1] }
  0x2d   : > { %2804 = vmatprep.subr.bf16.mxu0 %v3014_v43  ;;  %v592_v32 = vld [vmem:[%s3160_s24 + $0x70] sm:$0x1]  ;;  %v606_v38 = vunpack.c.l.bf16 %v590_v31  ;;  %v3048_v31 = vld [vmem:[%s3565_s1 + $0x1d8] sm:$0xff]  }
  0x2e   : > { %2701 = vmatmul.mubr.bf16.gmra.mrb[4].mxu1 %v2295_v46  ;;  %v1153_v46 = vunpack.c.l.bf16 %v1137_v42  ;;  %v608_v39 = vunpack.c.l.bf16 %v592_v32  ;;  %v640_v42 = vrot.slane %v605_v34, 1  ;;  %v3049_v34 = vld [vmem:[%s3565_s1 + $0xe0] sm:$0xff]  }
  0x2f   : > { %2709 = vmatpush3.bf16.msra.mxu1 %v3013_v37  ;;  %2797 = vmatmul.mubr.bf16.gmra.mrb[4].mxu0 %v2383_v48  ;;  %v1185_v37 = vrot.slane %v1149_v27, 1  ;;  %v601_v48 = vunpack.c.l.bf16 %v3220_v49  ;;  %v3027_v49 = vld [vmem:[%s3565_s1 + $0x88] sm:$0xff]  }
  0x30   : > { %2805 = vmatpush3.bf16.msra.mxu0 %v3014_v43  ;;  %2710 = vmatprep.subr.bf16.mxu1 %v3015_v45  ;;  %v3294_v43 = vld [vmem:[%s3160_s24 + $0xe0] ss:$8 sps:$4 sm:$0xff]  }
  0x31   : > { %2806 = vmatprep.subr.bf16.mxu0 %v3016_v56  ;;  %2720 = vmatprep.mubr.bf16.mxu1 %v2288_v57  ;;  %v1154_v47 = vunpack.c.h.bf16 %v3294_v43  ;;  %v1186_v57 = vsel %vm633_vm0, %v1184_v36, %v1185_v37  ;;  %v634_v4 = vrot.slane %v601_v48, 1  ;;  %v594_v36 = vld [vmem:[%s3160_s24 + $0x90] sm:$0x1]  ;;  %v615_v55 = vunpack.c.l.bf16 %v3294_v43 }
  0x32   : > { %2816 = vmatprep.mubr.bf16.mxu0 %v1204_v5  ;;  %v3029_v5 = vld [vmem:[%s3565_s1 + $0x90] sm:$0xff]   ;;  %v1206_v7 = vpack.c.bf16 %v1189_v58, %v1186_v57  ;;  %v649_v57 = vrot.slane %v611_v44, 1  ;;  %v3041_v58 = vld [vmem:[%s3565_s1 + $0xc0] sm:$0xff]  }
  0x33   : > { %2711 = vmatpush3.bf16.msra.mxu1 %v3015_v45  ;;  %v1152_v45 = vunpack.c.h.bf16 %v3289_v40  ;;  %v1193_v63 = vrot.slane %v1154_v47, 1  ;;  %v596_v37 = vld [vmem:[%s3160_s24 + $0xb0] sm:$0x1]  ;;  %v610_v47 = vunpack.c.l.bf16 %v594_v36  ;;  %v3051_v36 = vld [vmem:[%s3565_s1 + $0xe8] sm:$0xff]   ;;  %v2504_v44 = vld [vmem:[%s3160_s24 + $0x20] sm:$0xf] }
  0x34   : > { %2807 = vmatpush3.bf16.msra.mxu0 %v3016_v56  ;;  %2712 = vmatprep.subr.bf16.mxu1 %v3017_v62  ;;  %v603_v56 = vunpack.c.l.bf16 %v3224_v51  ;;  %v604_v51 = vunpack.c.l.bf16 %v588_v60  ;;  %v612_v48 = vunpack.c.l.bf16 %v596_v37  ;;  %v3052_v37 = vld [vmem:[%s3565_s1 + $0x1e8] sm:$0xff]  }
  0x35   : > { %2808 = vmatprep.subr.bf16.mxu0 %v3018_v0  ;;  %v1190_v59 = vrot.slane %v1152_v45, 1  ;;  %v3039_v45 = vld [vmem:[%s3565_s1 + $0xb8] sm:$0xff]  }
  0x36   : > { %v638_v10 = vrot.slane %v604_v51, 1  ;;  %v650_v60 = vrot.slane %v612_v48, 1  ;;  %v3058_v48 = vld [vmem:[%s3566_s2] sm:$0xff]  }
  0x37   : > { %2713 = vmatpush3.bf16.msra.mxu1 %v3017_v62  ;;  %v1191_v62 = vrot.slane %v1153_v46, 1 }
  0x38   : > { %2809 = vmatpush3.bf16.msra.mxu0 %v3018_v0  ;;  %2714 = vmatprep.subr.bf16.mxu1 %v3019_v8  ;;  %v1194_v0 = vrot.slane %v1155_v54, 1  ;;  %v613_v54 = vunpack.c.l.bf16 %v3289_v40 }
  0x39   : > { %2810 = vmatprep.subr.bf16.mxu0 %v3020_v9 }
  0x3a   : > { %v652_v51 = vrot.slane %v613_v54, 1  ;;  %v813_v54 = vld [vmem:[%s3160_s24 + $0xa8] sm:$0xf] }
  0x3b   : > { %2715 = vmatpush3.bf16.msra.mxu1 %v3019_v8  ;;  %v635_v8 = vrot.slane %v602_v61, 1  ;;  %v3042_v61 = vld [vmem:[%s3565_s1 + $0x1c0] sm:$0xff]  }
  0x3c   : > { %2811 = vmatpush3.bf16.msra.mxu0 %v3020_v9  ;;  %2716 = vmatprep.subr.bf16.mxu1 %v3021_v14  ;;  %v637_v9 = vrot.slane %v603_v56, 1 }
  0x3d   : > { %2812 = vmatprep.subr.bf16.mxu0 %v3022_v15  ;;  %v636_v18 = vsel %vm633_vm0, %v634_v4, %v635_v8  ;;  %v2437_v8 = vld [vmem:[%s3160_s24 + $0xc0] sm:$0xf] }
  0x3e   : > { %v639_v19 = vsel %vm633_vm0, %v637_v9, %v638_v10 }
  0x3f   : > { %2717 = vmatpush3.bf16.msra.mxu1 %v3021_v14  ;;  %v1192_v14 = vsel %vm633_vm0, %v1190_v59, %v1191_v62  ;;  %v647_v59 = vrot.slane %v610_v47, 1  ;;  %v2435_v62 = vld [vmem:[%s3160_s24 + $0x80] sm:$0xf]  ;;  %v2507_v47 = vld [vmem:[%s3160_s24 + $0x50] sm:$0x1] }
  0x40   : > { %2813 = vmatpush3.bf16.msra.mxu0 %v3022_v15  ;;  %2718 = vmatprep.subr.bf16.mxu1 %v3023_v20  ;;  %v1195_v15 = vsel %vm633_vm0, %v1193_v63, %v1194_v0  ;;  %v616_v0 = vunpack.c.l.bf16 %v600_v23  ;;  %v812_v23 = vld [vmem:[%s3160_s24 + $0x88] sm:$0xf] }
  0x41   : > { %2814 = vmatprep.subr.bf16.mxu0 %v3024_v26  ;;  %v1207_v22 = vpack.c.bf16 %v1195_v15, %v1192_v14 }
  0x43   : > { %2719 = vmatpush3.bf16.msra.mxu1 %v3023_v20  ;;  %v2433_v20 = vld [vmem:[%s3160_s24 + $0x40] sm:$0xf] }
  0x44   : > { %2815 = vmatpush3.bf16.msra.mxu0 %v3024_v26  ;;  %2728 = vmatprep.subr.bf16.mxu1 %v3025_v30  ;;  %v666_v26 = vpack.c.bf16 %v639_v19, %v636_v18  ;;  %v2440_v27 = vcombine.low %v2432_v16, %v2433_v20  ;;  %v3045_v16 = vld [vmem:[%s3565_s1 + $0xd0] sm:$0xff]   ;;  %v2438_v20 = vld [vmem:[%s3160_s24 + $0xe0] sm:$0xf] }
  0x45   : > { %2824 = vmatprep.subr.bf16.mxu0 %v3026_v35  ;;  %v3046_v19 = vld [vmem:[%s3565_s1 + $0x1d0] sm:$0xff]  }
  0x46   : > { %2721 = vmatmul.mubr.bf16.vlgmr.msra.gmra.mrb[0].mxu1 %v2289_v50  ;;  %v641_v50 = vrot.slane %v606_v38, 1  ;;  %v3053_v38 = vld [vmem:[%s3565_s1 + $0xf0] sm:$0xff]  }
  0x47   : > { %2729 = vmatpush3.bf16.msra.mxu1 %v3025_v30  ;;  %2817 = vmatmul.mubr.bf16.vlgmr.msra.gmra.mrb[0].mxu0 %v1205_v52  ;;  %v3035_v30 = vld [vmem:[%s3565_s1 + $0xa8] sm:$0xff]   ;;  %v644_v52 = vrot.slane %v608_v39, 1  ;;  %v3054_v39 = vld [vmem:[%s3565_s1 + $0x1f0] sm:$0xff]  }
  0x48   : > { %2825 = vmatpush3.bf16.msra.mxu0 %v3026_v35  ;;  %2730 = vmatprep.subr.bf16.mxu1 %v3027_v49  ;;  %v607_v35 = vunpack.c.l.bf16 %v3245_v6  ;;  %v609_v6 = vunpack.c.l.bf16 %v3266_v21  ;;  %v598_v21 = vld [vmem:[%s3160_s24 + $0xd0] sm:$0x1]  ;;  %v642_v40 = vsel %vm633_vm0, %v640_v42, %v641_v50  ;;  %v810_v42 = vld [vmem:[%s3160_s24 + $0x48] sm:$0xf]  ;;  %v2470_v50 = vld [vmem:[%s3160_s24 + $0x64] sm:$0xf] }
  0x49   : > { %2826 = vmatprep.subr.bf16.mxu0 %v3028_v1  ;;  %2724 = vmatprep.mubr.bf16.mxu1 %v2290_v2  ;;  %v614_v63 = vunpack.c.l.bf16 %v598_v21  ;;  %v2436_v2 = vld [vmem:[%s3160_s24 + $0xa0] sm:$0xf] }
  0x4a   : > { %2820 = vmatprep.mubr.bf16.mxu0 %v1206_v7  ;;  %v643_v46 = vrot.slane %v607_v35, 1  ;;  %v646_v56 = vrot.slane %v609_v6, 1  ;;  %v651_v7 = vsel %vm633_vm0, %v649_v57, %v650_v60  ;;  %v2442_v15 = vcombine.low %v2436_v2, %v2437_v8  ;;  %v3050_v35 = vld [vmem:[%s3565_s1 + $0x1e0] sm:$0xff]   ;;  %v811_v6 = vld [vmem:[%s3160_s24 + $0x68] sm:$0xf] }
  0x4b   : > { %2731 = vmatpush3.bf16.msra.mxu1 %v3027_v49  ;;  %v2434_v49 = vld [vmem:[%s3160_s24 + $0x60] sm:$0xf]  ;;  %v653_v10 = vrot.slane %v614_v63, 1  ;;  %v1679_v57 = vunpack.c.l.bf16 %v2504_v44  ;;  %v1682_v60 = vunpack.c.l.bf16 %v2507_v47  ;;  %v814_v2 = vld [vmem:[%s3160_s24 + $0xc8] sm:$0xf]  ;;  %v3071_v44 = vld [vmem:[%s3565_s1 + $0x238] sm:$0xff]  }
  0x4c   : > { %2827 = vmatpush3.bf16.msra.mxu0 %v3028_v1  ;;  %2732 = vmatprep.subr.bf16.mxu1 %v3029_v5  ;;  %v645_v43 = vsel %vm633_vm0, %v643_v46, %v644_v52  ;;  %v655_v1 = vrot.slane %v615_v55, 1  ;;  %v2441_v9 = vcombine.low %v2434_v49, %v2435_v62  ;;  %v2506_v46 = vld [vmem:[%s3160_s24 + $0x40] sm:$0xf]  ;;  %v2471_v52 = vld [vmem:[%s3160_s24 + $0x84] sm:$0xf]  ;;  %v2354_v49 = vcombine.low %v812_v23, %v813_v54 }
  0x4d   : > { %2828 = vmatprep.subr.bf16.mxu0 %v3030_v11  ;;  %v667_v4 = vpack.c.bf16 %v645_v43, %v642_v40  ;;  %v3057_v21 = vld [vmem:[%s3565_s1 + $0x200] sm:$0xff]   ;;  %v3060_v40 = vld [vmem:[%s3566_s2 + $0x8] sm:$0xff]   ;;  %v1711_v63 = vrot.slane %v1679_v57, 1  ;;  %v2519_v57 = vld [vmem:[%s3160_s24 + $0x110] sm:$0x1] }
  0x4e   : > { %2725 = vmatmul.mubr.bf16.gmra.mrb[4].mxu1 %v2291_v17  ;;  %v654_v17 = vsel %vm633_vm0, %v652_v51, %v653_v10  ;;  %v2472_v55 = vld [vmem:[%s3160_s24 + $0xa4] sm:$0xf]  ;;  %v3059_v43 = vld [vmem:[%s3565_s1 + $0x208] sm:$0xff]  }
  0x4f   : > { %2733 = vmatpush3.bf16.msra.mxu1 %v3029_v5  ;;  %2821 = vmatmul.mubr.bf16.gmra.mrb[4].mxu0 %v1207_v22  ;;  %v648_v5 = vsel %vm633_vm0, %v646_v56, %v647_v59  ;;  %v2439_v22 = vld [vmem:[%s3160_s24 + $0x100] sm:$0xf]  ;;  %v2473_v56 = vld [vmem:[%s3160_s24 + $0xc4] sm:$0xf]  ;;  %v1681_v59 = vunpack.c.l.bf16 %v2506_v46 }
  0x50   : > { %2829 = vmatpush3.bf16.msra.mxu0 %v3030_v11  ;;  %2734 = vmatprep.subr.bf16.mxu1 %v3031_v24  ;;  %v656_v11 = vrot.slane %v616_v0, 1  ;;  %v668_v14 = vpack.c.bf16 %v651_v7, %v648_v5  ;;  %v2478_v62 = vcombine.low %v2472_v55, %v2473_v56  ;;  %v3062_v5 = vld [vmem:[%s3566_s2 + $0x10] sm:$0xff]   ;;  %v2474_v7 = vld [vmem:[%s3160_s24 + $0xe4] sm:$0xf] }
  0x51   : > { %2830 = vmatprep.subr.bf16.mxu0 %v3032_v25  ;;  %2744 = vmatprep.mubr.bf16.mxu1 %v666_v26  ;;  %v1714_v51 = vrot.slane %v1681_v59, 1  ;;  %v2475_v8 = vld [vmem:[%s3160_s24 + $0x104] sm:$0xf]  ;;  %v1934_v59 = vld [vmem:[%s3160_s24 + $0x4c] sm:$0xf] }
  0x52   : > { %2840 = vmatprep.mubr.bf16.mxu0 %v2440_v27  ;;  %v657_v18 = vsel %vm633_vm0, %v655_v1, %v656_v11  ;;  %v2468_v27 = vld [vmem:[%s3160_s24 + $0x24] sm:$0xf]  ;;  %v1715_v1 = vrot.slane %v1682_v60, 1  ;;  %v1935_v60 = vld [vmem:[%s3160_s24 + $0x6c] sm:$0xf] }
  0x53   : > { %2735 = vmatpush3.bf16.msra.mxu1 %v3031_v24  ;;  %v808_v24 = vld [vmem:[%s3160_s24 + $0x8] sm:$0xf]  ;;  %v669_v26 = vpack.c.bf16 %v657_v18, %v654_v17  ;;  %v3063_v17 = vld [vmem:[%s3565_s1 + $0x218] sm:$0xff]  }
  0x54   : > { %2831 = vmatpush3.bf16.msra.mxu0 %v3032_v25  ;;  %2736 = vmatprep.subr.bf16.mxu1 %v3033_v28  ;;  %v809_v25 = vld [vmem:[%s3160_s24 + $0x28] sm:$0xf] }
  0x55   : > { %2832 = vmatprep.subr.bf16.mxu0 %v3034_v29  ;;  %v2352_v32 = vcombine.low %v808_v24, %v809_v25  ;;  %v3068_v24 = vld [vmem:[%s3566_s2 + $0x28] sm:$0xff]   ;;  %v2508_v25 = vld [vmem:[%s3160_s24 + $0x60] sm:$0xf] }
  0x57   : > { %2737 = vmatpush3.bf16.msra.mxu1 %v3033_v28  ;;  %v2443_v28 = vcombine.low %v2438_v20, %v2439_v22  ;;  %v3066_v20 = vld [vmem:[%s3566_s2 + $0x20] sm:$0xff]  }
  0x58   : > { %2833 = vmatpush3.bf16.msra.mxu0 %v3034_v29  ;;  %2738 = vmatprep.subr.bf16.mxu1 %v3035_v30  ;;  %v2469_v29 = vld [vmem:[%s3160_s24 + $0x44] sm:$0xf] }
  0x59   : > { %2834 = vmatprep.subr.bf16.mxu0 %v3036_v33  ;;  %v3065_v22 = vld [vmem:[%s3565_s1 + $0x220] sm:$0xff]  }
  0x5b   : > { %2739 = vmatpush3.bf16.msra.mxu1 %v3035_v30  ;;  %v3047_v30 = vld [vmem:[%s3565_s1 + $0xd8] sm:$0xff]  }
  0x5c   : > { %2835 = vmatpush3.bf16.msra.mxu0 %v3036_v33  ;;  %2740 = vmatprep.subr.bf16.mxu1 %v3037_v41  ;;  %v2476_v33 = vcombine.low %v2468_v27, %v2469_v29  ;;  %v2510_v27 = vld [vmem:[%s3160_s24 + $0x80] sm:$0xf]  ;;  %v3067_v29 = vld [vmem:[%s3565_s1 + $0x228] sm:$0xff]  }
  0x5d   : > { %2836 = vmatprep.subr.bf16.mxu0 %v3038_v3 }
  0x5f   : > { %2741 = vmatpush3.bf16.msra.mxu1 %v3037_v41  ;;  %v3055_v41 = vld [vmem:[%s3565_s1 + $0xf8] sm:$0xff]  }
  0x60   : > { %2837 = vmatpush3.bf16.msra.mxu0 %v3038_v3  ;;  %2742 = vmatprep.subr.bf16.mxu1 %v3039_v45  ;;  %v3056_v3 = vld [vmem:[%s3565_s1 + $0x1f8] sm:$0xff]  }
  0x61   : > { %2838 = vmatprep.subr.bf16.mxu0 %v3040_v53 }
  0x63   : > { %2743 = vmatpush3.bf16.msra.mxu1 %v3039_v45  ;;  %v2505_v45 = vld [vmem:[%s3160_s24 + $0x30] sm:$0x1] }
  0x64   : > { %2839 = vmatpush3.bf16.msra.mxu0 %v3040_v53  ;;  %2752 = vmatprep.subr.bf16.mxu1 %v3041_v58  ;;  %v2353_v53 = vcombine.low %v810_v42, %v811_v6 }
  0x65   : > { %2848 = vmatprep.subr.bf16.mxu0 %v3042_v61 }
  0x66   : > { %2745 = vmatmul.mubr.bf16.vlgmr.msra.gmra.mrb[0].mxu1 %v667_v4  ;;  %v815_v4 = vld [vmem:[%s3160_s24 + $0xe8] sm:$0xf] }
  0x67   : > { %2753 = vmatpush3.bf16.msra.mxu1 %v3041_v58  ;;  %2841 = vmatmul.mubr.bf16.vlgmr.msra.gmra.mrb[0].mxu0 %v2441_v9  ;;  %v1680_v58 = vunpack.c.l.bf16 %v2505_v45  ;;  %v3061_v9 = vld [vmem:[%s3565_s1 + $0x210] sm:$0xff]   ;;  %v2355_v10 = vcombine.low %v814_v2, %v815_v4  ;;  %v3072_v45 = vld [vmem:[%s3566_s2 + $0x38] sm:$0xff]   ;;  %v2545_v2 = vcombine.low %v1934_v59, %v1935_v60 }
  0x68   : > { %2849 = vmatpush3.bf16.msra.mxu0 %v3042_v61  ;;  %2754 = vmatprep.subr.bf16.mxu1 %v3043_v12  ;;  %v2477_v61 = vcombine.low %v2470_v50, %v2471_v52  ;;  %v2516_v52 = vld [vmem:[%s3160_s24 + $0xe0] sm:$0xf] }
  0x69   : > { %2850 = vmatprep.subr.bf16.mxu0 %v3044_v13  ;;  %2748 = vmatprep.mubr.bf16.mxu1 %v668_v14  ;;  %v1712_v0 = vrot.slane %v1680_v58, 1  ;;  %v1932_v14 = vld [vmem:[%s3160_s24 + $0xc] sm:$0xf] }
  0x6a   : > { %2844 = vmatprep.mubr.bf16.mxu0 %v2442_v15  ;;  %v1933_v15 = vld [vmem:[%s3160_s24 + $0x2c] sm:$0xf] }
  0x6b   : > { %2755 = vmatpush3.bf16.msra.mxu1 %v3043_v12  ;;  %v1713_v11 = vsel %vm633_vm0, %v1711_v63, %v1712_v0  ;;  %v1716_v12 = vsel %vm633_vm0, %v1714_v51, %v1715_v1  ;;  %v1694_v0 = vunpack.c.l.bf16 %v2519_v57 }
  0x6c   : > { %2851 = vmatpush3.bf16.msra.mxu0 %v3044_v13  ;;  %2756 = vmatprep.subr.bf16.mxu1 %v3045_v16  ;;  %v2479_v13 = vcombine.low %v2474_v7, %v2475_v8  ;;  %v1743_v18 = vpack.c.bf16 %v1716_v12, %v1713_v11  ;;  %v1938_v12 = vld [vmem:[%s3160_s24 + $0xcc] sm:$0xf] }
  0x6d   : > { %2852 = vmatprep.subr.bf16.mxu0 %v3046_v19  ;;  %v1733_v11 = vrot.slane %v1694_v0, 1 }
  0x6e   : > { %2749 = vmatmul.mubr.bf16.gmra.mrb[4].mxu1 %v669_v26  ;;  %v2509_v26 = vld [vmem:[%s3160_s24 + $0x70] sm:$0x1] }
  0x6f   : > { %2757 = vmatpush3.bf16.msra.mxu1 %v3045_v16  ;;  %2845 = vmatmul.mubr.bf16.gmra.mrb[4].mxu0 %v2443_v28  ;;  %v3064_v16 = vld [vmem:[%s3566_s2 + $0x18] sm:$0xff]   ;;  %v2511_v28 = vld [vmem:[%s3160_s24 + $0x90] sm:$0x1] }
  0x70   : > { %2853 = vmatpush3.bf16.msra.mxu0 %v3046_v19  ;;  %2758 = vmatprep.subr.bf16.mxu1 %v3047_v30  ;;  %v2544_v19 = vcombine.low %v1932_v14, %v1933_v15 }
  0x71   : > { %2854 = vmatprep.subr.bf16.mxu0 %v3048_v31  ;;  %2768 = vmatprep.mubr.bf16.mxu1 %v2352_v32  ;;  %v2514_v32 = vld [vmem:[%s3160_s24 + $0xc0] sm:$0xf] }
  0x72   : > { %2864 = vmatprep.mubr.bf16.mxu0 %v2476_v33  ;;  %v2515_v33 = vld [vmem:[%s3160_s24 + $0xd0] sm:$0x1]  ;;  %v1689_v42 = vunpack.c.l.bf16 %v2514_v32 }
  0x73   : > { %2759 = vmatpush3.bf16.msra.mxu1 %v3047_v30  ;;  %v2512_v30 = vld [vmem:[%s3160_s24 + $0xa0] sm:$0xf]  ;;  %v1690_v6 = vunpack.c.l.bf16 %v2515_v33 }
  0x74   : > { %2855 = vmatpush3.bf16.msra.mxu0 %v3048_v31  ;;  %2760 = vmatprep.subr.bf16.mxu1 %v3049_v34  ;;  %v2513_v31 = vld [vmem:[%s3160_s24 + $0xb0] sm:$0x1]  ;;  %v1726_v55 = vrot.slane %v1689_v42, 1 }
  0x75   : > { %2856 = vmatprep.subr.bf16.mxu0 %v3050_v35  ;;  %v1727_v56 = vrot.slane %v1690_v6, 1 }
  0x77   : > { %2761 = vmatpush3.bf16.msra.mxu1 %v3049_v34  ;;  %v1683_v34 = vunpack.c.l.bf16 %v2508_v25  ;;  %v1728_v1 = vsel %vm633_vm0, %v1726_v55, %v1727_v56 }
  0x78   : > { %2857 = vmatpush3.bf16.msra.mxu0 %v3050_v35  ;;  %2762 = vmatprep.subr.bf16.mxu1 %v3051_v36  ;;  %v1684_v35 = vunpack.c.l.bf16 %v2509_v26 }
  0x79   : > { %2858 = vmatprep.subr.bf16.mxu0 %v3052_v37  ;;  %v1717_v46 = vrot.slane %v1683_v34, 1 }
  0x7a   : > { %v1718_v47 = vrot.slane %v1684_v35, 1 }
  0x7b   : > { %2763 = vmatpush3.bf16.msra.mxu1 %v3051_v36  ;;  %v1685_v36 = vunpack.c.l.bf16 %v2510_v27 }
  0x7c   : > { %2859 = vmatpush3.bf16.msra.mxu0 %v3052_v37  ;;  %2764 = vmatprep.subr.bf16.mxu1 %v3053_v38  ;;  %v1686_v37 = vunpack.c.l.bf16 %v2511_v28  ;;  %v1719_v58 = vsel %vm633_vm0, %v1717_v46, %v1718_v47 }
  0x7d   : > { %2860 = vmatprep.subr.bf16.mxu0 %v3054_v39 }
  0x7e   : > { %v1721_v50 = vrot.slane %v1686_v37, 1 }
  0x7f   : > { %2765 = vmatpush3.bf16.msra.mxu1 %v3053_v38  ;;  %v3070_v38 = vld [vmem:[%s3566_s2 + $0x30] sm:$0xff]  }
  0x80   : > { %2861 = vmatpush3.bf16.msra.mxu0 %v3054_v39  ;;  %2766 = vmatprep.subr.bf16.mxu1 %v3055_v41  ;;  %v3069_v39 = vld [vmem:[%s3565_s1 + $0x230] sm:$0xff]  }
  0x81   : > { %2862 = vmatprep.subr.bf16.mxu0 %v3056_v3 }
  0x83   : > { %2767 = vmatpush3.bf16.msra.mxu1 %v3055_v41  ;;  %v1687_v41 = vunpack.c.l.bf16 %v2512_v30 }
  0x84   : > { %2863 = vmatpush3.bf16.msra.mxu0 %v3056_v3  ;;  %2896 = vmatprep.subr.bf16.mxu1 %v3058_v48  ;;  %v1688_v3 = vunpack.c.l.bf16 %v2513_v31 }
  0x85   : > { %2872 = vmatprep.subr.bf16.mxu0 %v3057_v21  ;;  %v1723_v23 = vrot.slane %v1687_v41, 1 }
  0x86   : > { %2769 = vmatmul.mubr.bf16.vlgmr.msra.gmra.mrb[0].mxu1 %v2353_v53  ;;  %v2517_v53 = vld [vmem:[%s3160_s24 + $0xf0] sm:$0x1]  ;;  %v1724_v54 = vrot.slane %v1688_v3, 1 }
  0x87   : > { %2865 = vmatmul.mubr.bf16.vlgmr.msra.gmra.mrb[0].mxu0 %v2477_v61  ;;  %2897 = vmatpush3.bf16.msra.mxu1 %v3058_v48  ;;  %v1720_v48 = vrot.slane %v1685_v36, 1  ;;  %v1691_v61 = vunpack.c.l.bf16 %v2516_v52 }
  0x88   : > { %2873 = vmatpush3.bf16.msra.mxu0 %v3057_v21  ;;  %2898 = vmatprep.subr.bf16.mxu1 %v3060_v40  ;;  %v2518_v21 = vld [vmem:[%s3160_s24 + $0x100] sm:$0xf]  ;;  %v1725_v51 = vsel %vm633_vm0, %v1723_v23, %v1724_v54 }
  0x89   : > { %2874 = vmatprep.subr.bf16.mxu0 %v3059_v43  ;;  %2772 = vmatprep.mubr.bf16.mxu1 %v2354_v49  ;;  %v1937_v49 = vld [vmem:[%s3160_s24 + $0xac] sm:$0xf]  ;;  %v1693_v63 = vunpack.c.l.bf16 %v2518_v21  ;;  %v1729_v7 = vrot.slane %v1691_v61, 1  ;;  %v1745_v8 = vpack.c.bf16 %v1728_v1, %v1725_v51 }
  0x8a   : > { %2868 = vmatprep.mubr.bf16.mxu0 %v2478_v62  ;;  %v1692_v62 = vunpack.c.l.bf16 %v2517_v53 }
  0x8b   : > { %2899 = vmatpush3.bf16.msra.mxu1 %v3060_v40  ;;  %v1722_v40 = vsel %vm633_vm0, %v1720_v48, %v1721_v50 }
  0x8c   : > { %2875 = vmatpush3.bf16.msra.mxu0 %v3059_v43  ;;  %2900 = vmatprep.subr.bf16.mxu1 %v3062_v5  ;;  %v1936_v43 = vld [vmem:[%s3160_s24 + $0x8c] sm:$0xf]  ;;  %v1744_v4 = vpack.c.bf16 %v1722_v40, %v1719_v58 }
  0x8d   : > { %2876 = vmatprep.subr.bf16.mxu0 %v3061_v9 }
  0x8e   : > { %2773 = vmatmul.mubr.bf16.gmra.mrb[4].mxu1 %v2355_v10  ;;  %v1732_v10 = vrot.slane %v1693_v63, 1 }
  0x8f   : > { %2901 = vmatpush3.bf16.msra.mxu1 %v3062_v5  ;;  %2869 = vmatmul.mubr.bf16.gmra.mrb[4].mxu0 %v2479_v13  ;;  %v2546_v5 = vcombine.low %v1936_v43, %v1937_v49  ;;  %v1939_v13 = vld [vmem:[%s3160_s24 + $0xec] sm:$0xf]  ;;  %s2558_s24 = sshll.u32 %s3572_s22, 6 }
  0x90   : > { %2877 = vmatpush3.bf16.msra.mxu0 %v3061_v9  ;;  %2902 = vmatprep.subr.bf16.mxu1 %v3064_v16  ;;  %v1730_v9 = vrot.slane %v1692_v62, 1  ;;  %v1734_v15 = vsel %vm633_vm0, %v1732_v10, %v1733_v11  ;;  %s3530_s17 = scalar_lea.vmem %s3568_s4, %s2558_s24  ;;  %s3535_s20 = scalar_lea.vmem %s3567_s3, %s2558_s24 }
  0x91   : > { %2878 = vmatprep.subr.bf16.mxu0 %v3063_v17  ;;  %2888 = vmatprep.mubr.bf16.mxu0 %v1743_v18 }
  0x92   : > { %2912 = vmatprep.mubr.bf16.mxu1 %v2544_v19  ;;  %v1731_v14 = vsel %vm633_vm0, %v1729_v7, %v1730_v9 }
  0x93   : > { %2903 = vmatpush3.bf16.msra.mxu1 %v3064_v16  ;;  %v2547_v16 = vcombine.low %v1938_v12, %v1939_v13 }
  0x94   : > { %2879 = vmatpush3.bf16.msra.mxu0 %v3063_v17  ;;  %2904 = vmatprep.subr.bf16.mxu1 %v3066_v20  ;;  %v1746_v17 = vpack.c.bf16 %v1734_v15, %v1731_v14 }
  0x95   : > { %2880 = vmatprep.subr.bf16.mxu0 %v3065_v22 }
  0x97   : > { %2905 = vmatpush3.bf16.msra.mxu1 %v3066_v20 }
  0x98   : > { %2881 = vmatpush3.bf16.msra.mxu0 %v3065_v22  ;;  %2906 = vmatprep.subr.bf16.mxu1 %v3068_v24 }
  0x99   : > { %2882 = vmatprep.subr.bf16.mxu0 %v3067_v29 }
  0x9b   : > { %2907 = vmatpush3.bf16.msra.mxu1 %v3068_v24 }
  0x9c   : > { %2883 = vmatpush3.bf16.msra.mxu0 %v3067_v29  ;;  %2908 = vmatprep.subr.bf16.mxu1 %v3070_v38 }
  0x9d   : > { %2884 = vmatprep.subr.bf16.mxu0 %v3069_v39 }
  0x9f   : > { %2909 = vmatpush3.bf16.msra.mxu1 %v3070_v38 }
  0xa0   : > { %2885 = vmatpush3.bf16.msra.mxu0 %v3069_v39  ;;  %2910 = vmatprep.subr.bf16.mxu1 %v3072_v45 }
  0xa1   : > { %2886 = vmatprep.subr.bf16.mxu0 %v3071_v44 }
  0xa3   : > { %2911 = vmatpush3.bf16.msra.mxu1 %v3072_v45 }
  0xa4   : > { %2887 = vmatpush3.bf16.msra.mxu0 %v3071_v44 }
  0xa6   : > { %2913 = vmatmul.mubr.bf16.vlgmr.msra.gmra.mrb[8].mxu1 %v2545_v2 }
  0xa7   : > { %2889 = vmatmul.mubr.bf16.vlgmr.msra.gmra.mrb[0].mxu0 %v1744_v4  ;;  %2916 = vmatprep.mubr.bf16.mxu1 %v2546_v5 }
  0xa8   : > { %2892 = vmatprep.mubr.bf16.mxu0 %v1745_v8 }
  0xae   : > { %2917 = vmatmul.mubr.bf16.gmra.mrb[12].mxu1 %v2547_v16 }
  0xaf   : > { %2893 = vmatmul.mubr.bf16.gmra.mrb[4].mxu0 %v1746_v17 }
 0x159   : > { %v2770_v18 = vpop.f32.mrb[0].mxu1 }
 0x15a   : > { %v927_v19 = vpop.f32.mrb[1].mxu1 }
 0x15b   : > { %v2771_v20 = vpop.f32.mrb[2].mxu1 }
 0x15c   : > { %v930_v22 = vpop.f32.mrb[3].mxu1 }
 0x161   : > { %v2774_v24 = vpop.f32.mrb[4].mxu1 }
 0x162   : > { %v943_v25 = vpop.f32.mrb[5].mxu1 }
 0x163   : > { %v2775_v26 = vpop.f32.mrb[6].mxu1 }
 0x164   : > { %v3524_v27 = vpop.f32.mrb[7].mxu1 }
 0x179   : > { %v2914_v28 = vpop.f32.mrb[8].mxu1 }
 0x17a   : > { %v2890_v29 = vpop.f32.mrb[0].mxu0  ;;  %2083 = vst [vmem:[%s3530_s17 + $0x10] sm:$0xff] %v2914_v28  ;;  %v2050_v30 = vpop.f32.mrb[9].mxu1  ;;  %v2104_v6 = vmul.f32 %v2914_v28, %v2914_v28 }
 0x17b   : > { %v2920_v31 = vadd.f32 %v2890_v29, %v2770_v18  ;;  %v1846_v32 = vpop.f32.mrb[1].mxu0  ;;  %2081 = vst [vmem:[%s3530_s17] sm:$0xff] %v2050_v30  ;;  %v2102_v33 = vmul.f32 %v2050_v30, %v2050_v30  ;;  %v2915_v34 = vpop.f32.mrb[10].mxu1 }
 0x17c   : > { %v2921_v35 = vadd.f32 %v1846_v32, %v927_v19  ;;  %v2891_v36 = vpop.f32.mrb[2].mxu0  ;;  %2084 = vst [vmem:[%s3530_s17 + $0x18] sm:$0xff] %v2915_v34  ;;  %v2053_v37 = vpop.f32.mrb[11].mxu1  ;;  %v2105_v50 = vmul.f32 %v2915_v34, %v2915_v34 }
 0x17d   : > { %1887 = vst [vmem:[%s3535_s20 + $0x10] sm:$0xff] %v2920_v31  ;;  %v2922_v38 = vadd.f32 %v2891_v36, %v2771_v20  ;;  %v1849_v39 = vpop.f32.mrb[3].mxu0  ;;  %2082 = vst [vmem:[%s3530_s17 + $0x8] sm:$0xff] %v2053_v37  ;;  %v2089_v41 = vadd.f32 %v2053_v37, %v2050_v30  ;;  %v2103_v3 = vmul.f32 %v2053_v37, %v2053_v37 }
 0x17e   : > { %1885 = vst [vmem:[%s3535_s20] sm:$0xff] %v2921_v35  ;;  %v2923_v42 = vadd.f32 %v1849_v39, %v930_v22  ;;  %v1906_v46 = vmul.f32 %v2921_v35, %v2921_v35  ;;  %v1908_v23 = vmul.f32 %v2920_v31, %v2920_v31 }
 0x17f   : > { %1888 = vst [vmem:[%s3535_s20 + $0x18] sm:$0xff] %v2922_v38  ;;  %v2090_v44 = vadd.f32 %v2914_v28, %v2089_v41  ;;  %v2110_v45 = vadd.f32 %v2103_v3, %v2102_v33  ;;  %v1909_v49 = vmul.f32 %v2922_v38, %v2922_v38 }
 0x180   : > { %1886 = vst [vmem:[%s3535_s20 + $0x8] sm:$0xff] %v2923_v42  ;;  %v1893_v47 = vadd.f32 %v2923_v42, %v2921_v35  ;;  %v1907_v48 = vmul.f32 %v2923_v42, %v2923_v42 }
 0x181   : > { %v2111_v52 = vadd.f32 %v2110_v45, %v2104_v6  ;;  %v2918_v53 = vpop.f32.mrb[12].mxu1  ;;  %v2091_v21 = vadd.f32 %v2915_v34, %v2090_v44 }
 0x182   : > { %v1894_v54 = vadd.f32 %v2920_v31, %v1893_v47  ;;  %v1914_v55 = vadd.f32 %v1907_v48, %v1906_v46  ;;  %v2894_v56 = vpop.f32.mrb[4].mxu0  ;;  %2087 = vst [vmem:[%s3530_s17 + $0x30] sm:$0xff] %v2918_v53  ;;  %v2066_v57 = vpop.f32.mrb[13].mxu1  ;;  %v2108_v17 = vmul.f32 %v2918_v53, %v2918_v53 }
 0x183   : > { %v2924_v58 = vadd.f32 %v2894_v56, %v2774_v24  ;;  %v1862_v59 = vpop.f32.mrb[5].mxu0  ;;  %2085 = vst [vmem:[%s3530_s17 + $0x20] sm:$0xff] %v2066_v57  ;;  %v2092_v60 = vadd.f32 %v2091_v21, %v2066_v57  ;;  %v2106_v61 = vmul.f32 %v2066_v57, %v2066_v57  ;;  %v2112_v40 = vadd.f32 %v2111_v52, %v2105_v50  ;;  %v2919_v43 = vpop.f32.mrb[14].mxu1 }
 0x184   : > { %v1915_v62 = vadd.f32 %v1914_v55, %v1908_v23  ;;  %v2925_v63 = vadd.f32 %v1862_v59, %v943_v25  ;;  %v1895_v0 = vadd.f32 %v2922_v38, %v1894_v54  ;;  %v2895_v51 = vpop.f32.mrb[6].mxu0  ;;  %2088 = vst [vmem:[%s3530_s17 + $0x38] sm:$0xff] %v2919_v43  ;;  %v2069_v1 = vpop.f32.mrb[15].mxu1  ;;  %v2109_v25 = vmul.f32 %v2919_v43, %v2919_v43 }
 0x185   : > { %1891 = vst [vmem:[%s3535_s20 + $0x30] sm:$0xff] %v2924_v58  ;;  %v2113_v2 = vadd.f32 %v2112_v40, %v2106_v61  ;;  %v2926_v4 = vadd.f32 %v2895_v51, %v2775_v26  ;;  %v1865_v5 = vpop.f32.mrb[7].mxu0  ;;  %2086 = vst [vmem:[%s3530_s17 + $0x28] sm:$0xff] %v2069_v1  ;;  %v2093_v7 = vadd.f32 %v2092_v60, %v2069_v1 }
 0x186   : > { %1889 = vst [vmem:[%s3535_s20 + $0x20] sm:$0xff] %v2925_v63  ;;  %v1896_v8 = vadd.f32 %v2925_v63, %v1895_v0  ;;  %v1910_v9 = vmul.f32 %v2925_v63, %v2925_v63  ;;  %v1916_v10 = vadd.f32 %v1915_v62, %v1909_v49  ;;  %v2927_v11 = vadd.f32 %v1865_v5, %v3524_v27 }
 0x187   : > { %1892 = vst [vmem:[%s3535_s20 + $0x38] sm:$0xff] %v2926_v4  ;;  %v2094_v12 = vadd.f32 %v2918_v53, %v2093_v7  ;;  %v2107_v13 = vmul.f32 %v2069_v1, %v2069_v1  ;;  %v1912_v20 = vmul.f32 %v2924_v58, %v2924_v58  ;;  %v1913_v29 = vmul.f32 %v2926_v4, %v2926_v4 }
 0x188   : > { %v1917_v14 = vadd.f32 %v1916_v10, %v1910_v9  ;;  %1890 = vst [vmem:[%s3535_s20 + $0x28] sm:$0xff] %v2927_v11  ;;  %v1897_v15 = vadd.f32 %v2927_v11, %v1896_v8  ;;  %v1911_v16 = vmul.f32 %v2927_v11, %v2927_v11 }
 0x189   : > { %v2095_v18 = vadd.f32 %v2919_v43, %v2094_v12  ;;  %v2114_v19 = vadd.f32 %v2113_v2, %v2107_v13 }
 0x18a   : > { %v1898_v22 = vadd.f32 %v2924_v58, %v1897_v15  ;;  %v1918_v24 = vadd.f32 %v1917_v14, %v1911_v16 }
 0x18b   : > { %v2096_v26 = vrot.slane %v2095_v18, 4  ;;  %v2115_v28 = vadd.f32 %v2114_v19, %v2108_v17 }
 0x18c   : > { %v1899_v30 = vadd.f32 %v2926_v4, %v1898_v22  ;;  %v1919_v31 = vadd.f32 %v1918_v24, %v1912_v20 }
 0x18d   : > { %v2097_v27 = vadd.f32 %v2096_v26, %v2095_v18  ;;  %v2116_v32 = vadd.f32 %v2115_v28, %v2109_v25 }
 0x18e   : > { %v1900_v33 = vrot.slane %v1899_v30, 4  ;;  %v1920_v34 = vadd.f32 %v1919_v31, %v1913_v29 }
 0x18f   : > { %v2098_v35 = vrot.slane %v2097_v27, 2  ;;  %v2117_v36 = vrot.slane %v2116_v32, 4 }
 0x190   : > { %v1901_v37 = vadd.f32 %v1900_v33, %v1899_v30  ;;  %v1921_v38 = vrot.slane %v1920_v34, 4 }
 0x191   : > { %v2099_v39 = vadd.f32 %v2098_v35, %v2097_v27  ;;  %v2118_v41 = vadd.f32 %v2117_v36, %v2116_v32 }
 0x192   : > { %v1902_v3 = vrot.slane %v1901_v37, 2  ;;  %v1922_v42 = vadd.f32 %v1921_v38, %v1920_v34 }
 0x193   : > { %v2119_v6 = vrot.slane %v2118_v41, 2  ;;  %v2100_v46 = vrot.slane %v2099_v39, 1 }
 0x194   : > { %v1903_v44 = vadd.f32 %v1902_v3, %v1901_v37  ;;  %v1923_v45 = vrot.slane %v1922_v42, 2 }
 0x195   : > { %v2120_v47 = vadd.f32 %v2119_v6, %v2118_v41  ;;  %v2101_v21 = vadd.f32 %v2100_v46, %v2099_v39 }
 0x196   : > { %v1904_v48 = vrot.slane %v1903_v44, 1  ;;  %v1924_v50 = vadd.f32 %v1923_v45, %v1922_v42 }
 0x197   : > { %v2121_v52 = vrot.slane %v2120_v47, 1 }
 0x198   : > { %v1925_v53 = vrot.slane %v1924_v50, 1  ;;  %v1905_v54 = vadd.f32 %v1904_v48, %v1903_v44 }
 0x199   : > { %v2122_v23 = vadd.f32 %v2121_v52, %v2120_v47 }
 0x19a   : > { %v1926_v55 = vadd.f32 %v1925_v53, %v1924_v50 }
 0x19b   : > { %v2123_v56 = vsel %vm1927_vm1, %v2101_v21, %v2122_v23 }
 0x19c   : > { %v1928_v57 = vsel %vm1927_vm1, %v1905_v54, %v1926_v55  ;;  %v2124_v58 = vsel %vm1929_vm2, %v2123_v56, 0.0 }
 0x19d   : > { %v1930_v59 = vsel %vm1929_vm2, %v1928_v57, 0.0  ;;  %2125 = vst [vmem:[%s284_s27] sm:$0xff] %v2124_v58 }
 0x19e   : > { %1931 = vst [vmem:[%s280_s30] sm:$0xff] %v1930_v59 }
 0x19f PF: > { %s17_s21 = sadd.s32 1, %s3079_s21  }
 0x1a0   : > { %p14_p4 = scmp.ge.s32.totalorder %s17_s21, 4  }
 0x1a2   :  { %16 = sbr.rel (!%p14_p4) target bundleno = 1 (0x1), region = 107 }

// kernel: res_block_forward.7
= control target key start
LH: loop header
LB: loop body
LE: loop exit
PB: predicated region body
PF: predicated region fallthrough
CT: control target
= control target key end

     0   :  { %s510_s21 = smov 0   ;;  %s597_s0 = inlined_call_operand.vmem [shape: f32[2,64,128], index: 0, kind: input, shape index: {}]   ;;  %s598_s1 = inlined_call_operand.vmem [shape: f32[1,128], index: 1, kind: input, shape index: {}]   ;;  %s599_s2 = inlined_call_operand.vmem [shape: f32[1,128], index: 2, kind: input, shape index: {}]   ;;  %s600_s3 = inlined_call_operand.vmem [shape: f32[2,64,128], index: 3, kind: input, shape index: {}]   ;;  %s601_s4 = inlined_call_operand.vmem [shape: f32[1,128], index: 4, kind: input, shape index: {}]   ;;  %s602_s5 = inlined_call_operand.vmem [shape: f32[1,128], index: 5, kind: input, shape index: {}]   ;;  %s603_s6 = inlined_call_operand.vmem [shape: f32[2,64,128], index: 6, kind: output, shape index: {}]  }
   0x1 LB: > { %s439_s22 = sadd.s32 4294967295, %s473_s21   ;;  %p443_p0 = scmp.ge.s32.totalorder %s473_s21, 1  ;;  %s473_s21 = sphi %s510_s21, %s16_s21  }
   0x2   : > { %p222_p1 = scmp.lt.s32.totalorder %s473_s21, 3 }
   0x4   : > { %p223_p2 = pnand %p443_p0, %p222_p1 }
   0x5   : > { %p257_p3 = scmp.lt.s32.totalorder (!%p223_p2), %s439_s22, 1  ;;  %v450_v0 = vld [vmem:[%s598_s1] ss:$0 sm:$0xff] (!%p223_p2) }
   0x6   : > { %226 = sbr.rel (%p223_p2) target bundleno = 35 (0x23), region = 44  ;;  %v452_v1 = vld [vmem:[%s601_s4] ss:$0 sm:$0xff] (!%p223_p2) }
   0x7   : > { %v541_v2 = vld [vmem:[%s599_s2] ss:$0 sm:$0xff] (!%p223_p2) }
   0x8   : > { %v546_v3 = vld [vmem:[%s602_s5] ss:$0 sm:$0xff] (!%p223_p2) }
   0xd   : > { %s605_s22 = smov (!%p257_p3, %s439_s22), 1 }
   0xe   : > { %s518_s23 = sshll.u32 %s605_s22, 6 }
   0xf   : > { %s530_s30 = scalar_lea.vmem %s597_s0, %s518_s23  ;;  %s536_s9 = scalar_lea.vmem %s600_s3, %s518_s23 }
  0x10   : > { %v272_v4 = vld [vmem:[%s530_s30] sm:$0xff]  ;;  %v273_v6 = vld [vmem:[%s530_s30 + $0x8] sm:$0xff]  ;;  %v274_v11 = vld [vmem:[%s530_s30 + $0x10] sm:$0xff]  ;;  %s571_s16 = scalar_lea.vmem %s603_s6, %s518_s23 }
  0x11   : > { %v310_v5 = vld [vmem:[%s536_s9] sm:$0xff]  ;;  %v287_v7 = vmul.f32 %v450_v0, %v272_v4  ;;  %v288_v9 = vmul.f32 %v450_v0, %v273_v6  ;;  %v311_v10 = vld [vmem:[%s536_s9 + $0x8] sm:$0xff]  ;;  %v312_v12 = vld [vmem:[%s536_s9 + $0x10] sm:$0xff]  ;;  %v289_v14 = vmul.f32 %v450_v0, %v274_v11 }
  0x12   : > { %v325_v8 = vmul.f32 %v452_v1, %v310_v5  ;;  %v326_v13 = vmul.f32 %v452_v1, %v311_v10  ;;  %v327_v15 = vmul.f32 %v452_v1, %v312_v12  ;;  %v275_v16 = vld [vmem:[%s530_s30 + $0x18] sm:$0xff]  ;;  %v276_v18 = vld [vmem:[%s530_s30 + $0x20] sm:$0xff]  ;;  %v277_v24 = vld [vmem:[%s530_s30 + $0x28] sm:$0xff] }
  0x13   : > { %v313_v17 = vld [vmem:[%s536_s9 + $0x18] sm:$0xff]  ;;  %v302_v19 = vadd.f32 %v541_v2, %v287_v7  ;;  %v303_v21 = vadd.f32 %v541_v2, %v288_v9  ;;  %v290_v22 = vmul.f32 %v450_v0, %v275_v16  ;;  %v314_v23 = vld [vmem:[%s536_s9 + $0x20] sm:$0xff]  ;;  %v304_v26 = vadd.f32 %v541_v2, %v289_v14  ;;  %v315_v29 = vld [vmem:[%s536_s9 + $0x28] sm:$0xff] }
  0x14   : > { %v340_v20 = vadd.f32 %v546_v3, %v325_v8  ;;  %v341_v25 = vadd.f32 %v546_v3, %v326_v13  ;;  %v342_v27 = vadd.f32 %v546_v3, %v327_v15  ;;  %v328_v28 = vmul.f32 %v452_v1, %v313_v17  ;;  %v278_v38 = vld [vmem:[%s530_s30 + $0x30] sm:$0xff]  ;;  %v279_v44 = vld [vmem:[%s530_s30 + $0x38] sm:$0xff] }
  0x15   : > { %v305_v31 = vadd.f32 %v541_v2, %v290_v22  ;;  %v291_v32 = vmul.f32 %v450_v0, %v276_v18  ;;  %v329_v33 = vmul.f32 %v452_v1, %v314_v23  ;;  %v292_v37 = vmul.f32 %v450_v0, %v277_v24  ;;  %v316_v39 = vld [vmem:[%s536_s9 + $0x30] sm:$0xff]  ;;  %v317_v45 = vld [vmem:[%s536_s9 + $0x38] sm:$0xff] }
  0x16   : > { %v348_v30 = vadd.f32 %v340_v20, %v302_v19  ;;  %v349_v34 = vadd.f32 %v341_v25, %v303_v21  ;;  %v350_v35 = vadd.f32 %v342_v27, %v304_v26  ;;  %v343_v36 = vadd.f32 %v546_v3, %v328_v28 }
  0x17   : > { %v306_v41 = vadd.f32 %v541_v2, %v291_v32  ;;  %v344_v42 = vadd.f32 %v546_v3, %v329_v33  ;;  %v330_v43 = vmul.f32 %v452_v1, %v315_v29  ;;  %v307_v49 = vadd.f32 %v541_v2, %v292_v37 }
  0x18   : > { %v356_v40 = vmax.f32 %v348_v30, 0.0  ;;  %v357_v46 = vmax.f32 %v349_v34, 0.0  ;;  %v358_v47 = vmax.f32 %v350_v35, 0.0  ;;  %v351_v48 = vadd.f32 %v343_v36, %v305_v31 }
  0x19   : > { %v352_v50 = vadd.f32 %v344_v42, %v306_v41  ;;  %v345_v51 = vadd.f32 %v546_v3, %v330_v43  ;;  %v293_v52 = vmul.f32 %v450_v0, %v278_v38  ;;  %v331_v53 = vmul.f32 %v452_v1, %v316_v39 }
  0x1a   : > { %364 = vst [vmem:[%s571_s16] sm:$0xff] %v356_v40  ;;  %365 = vst [vmem:[%s571_s16 + $0x8] sm:$0xff] %v357_v46  ;;  %v359_v54 = vmax.f32 %v351_v48, 0.0  ;;  %v294_v55 = vmul.f32 %v450_v0, %v279_v44  ;;  %v332_v56 = vmul.f32 %v452_v1, %v317_v45 }
  0x1b   : > { %366 = vst [vmem:[%s571_s16 + $0x10] sm:$0xff] %v358_v47  ;;  %v360_v57 = vmax.f32 %v352_v50, 0.0  ;;  %v353_v58 = vadd.f32 %v345_v51, %v307_v49  ;;  %v308_v59 = vadd.f32 %v541_v2, %v293_v52  ;;  %v346_v60 = vadd.f32 %v546_v3, %v331_v53 }
  0x1c   : > { %367 = vst [vmem:[%s571_s16 + $0x18] sm:$0xff] %v359_v54  ;;  %v309_v61 = vadd.f32 %v541_v2, %v294_v55  ;;  %v347_v62 = vadd.f32 %v546_v3, %v332_v56 }
  0x1d   : > { %368 = vst [vmem:[%s571_s16 + $0x20] sm:$0xff] %v360_v57  ;;  %v361_v63 = vmax.f32 %v353_v58, 0.0  ;;  %v354_v4 = vadd.f32 %v346_v60, %v308_v59 }
  0x1e   : > { %v355_v5 = vadd.f32 %v347_v62, %v309_v61 }
  0x1f   : > { %369 = vst [vmem:[%s571_s16 + $0x28] sm:$0xff] %v361_v63  ;;  %v362_v0 = vmax.f32 %v354_v4, 0.0 }
  0x20   : > { %v363_v6 = vmax.f32 %v355_v5, 0.0 }
  0x21   : > { %370 = vst [vmem:[%s571_s16 + $0x30] sm:$0xff] %v362_v0 }
  0x22   : > { %371 = vst [vmem:[%s571_s16 + $0x38] sm:$0xff] %v363_v6 }
  0x23 PF: > { %s16_s21 = sadd.s32 1, %s473_s21  }
  0x24   : > { %p13_p4 = scmp.ge.s32.totalorder %s16_s21, 4  }
  0x26   :  { %15 = sbr.rel (!%p13_p4) target bundleno = 1 (0x1), region = 77 }

// kernel: res_block_forward.6
= control target key start
LH: loop header
LB: loop body
LE: loop exit
PB: predicated region body
PF: predicated region fallthrough
CT: control target
= control target key end

     0   :  { %s2834_s12 = smov 0   ;;  %s3404_s0 = inlined_call_operand.vmem [shape: bf16[2,10,10,128], index: 0, kind: input, shape index: {}]   ;;  %s3405_s1 = inlined_call_operand.vmem [shape: bf16[9,128,128], index: 1, kind: input, shape index: {}]   ;;  %s3406_s2 = inlined_call_operand.vmem [shape: f32[2,64,128], index: 2, kind: output, shape index: {0}]   ;;  %s3407_s3 = inlined_call_operand.vmem [shape: f32[2,8,128], index: 3, kind: output, shape index: {1}]  }
   0x1 LB: > { %s2021_s13 = sadd.s32 4294967295, %s2812_s12   ;;  %p2025_p0 = scmp.ge.s32.totalorder %s2812_s12, 1  ;;  %s2812_s12 = sphi %s2834_s12, %s14_s12  }
   0x2   : > { %p140_p1 = scmp.lt.s32.totalorder %s2812_s12, 3 }
   0x4   : > { %p141_p2 = pnand %p2025_p0, %p140_p1 }
   0x5   : > { %v2722_v0 = vld [vmem:[%s3405_s1 + $0x40] sm:$0xff] (!%p141_p2)   ;;  %p168_p3 = scmp.lt.s32.totalorder (!%p141_p2), %s2021_s13, 1  ;;  %v2724_v2 = vld [vmem:[%s3405_s1 + $0x48] sm:$0xff] (!%p141_p2)   ;;  %v2726_v4 = vld [vmem:[%s3405_s1 + $0x50] sm:$0xff] (!%p141_p2)   ;;  %vm251_vm0 = vcmask (!%p141_p2), 1046528   ;;  %vm555_vm1 = vcmask (!%p141_p2), 1045504  }
   0x6   : > { %144 = sbr.rel (%p141_p2) target bundleno = 415 (0x19f), region = 28  ;;  %v2723_v1 = vld [vmem:[%s3405_s1 + $0x100] sm:$0xff] (!%p141_p2)   ;;  %2417 = vmatprep.subr.bf16.mxu1 (!%p141_p2), %v2722_v0  ;;  %v2725_v3 = vld [vmem:[%s3405_s1 + $0x108] sm:$0xff] (!%p141_p2)   ;;  %v2727_v5 = vld [vmem:[%s3405_s1 + $0x110] sm:$0xff] (!%p141_p2)   ;;  %vm1930_vm2 = vcmask (!%p141_p2), 1040384   ;;  %vm1932_vm3 = vcmask (!%p141_p2), 1041408  }
   0x7   : > { %2513 = vmatprep.subr.bf16.mxu0 (!%p141_p2), %v2723_v1  ;;  %2418 = vmatpush3.bf16.msra.mxu1 (!%p141_p2), %v2722_v0  ;;  %v2728_v6 = vld [vmem:[%s3405_s1 + $0x58] sm:$0xff] (!%p141_p2)   ;;  %v2730_v8 = vld [vmem:[%s3405_s1 + $0x60] sm:$0xff] (!%p141_p2)   ;;  %v2732_v10 = vld [vmem:[%s3405_s1 + $0x68] sm:$0xff] (!%p141_p2)  }
   0x8   : > { %2514 = vmatpush3.bf16.msra.mxu0 (!%p141_p2), %v2723_v1  ;;  %2419 = vmatprep.subr.bf16.mxu1 (!%p141_p2), %v2724_v2  ;;  %v2729_v7 = vld [vmem:[%s3405_s1 + $0x118] sm:$0xff] (!%p141_p2)   ;;  %v2731_v9 = vld [vmem:[%s3405_s1 + $0x120] sm:$0xff] (!%p141_p2)   ;;  %v2733_v11 = vld [vmem:[%s3405_s1 + $0x128] sm:$0xff] (!%p141_p2)  }
   0x9   : > { %2515 = vmatprep.subr.bf16.mxu0 (!%p141_p2), %v2725_v3  ;;  %v2734_v27 = vld [vmem:[%s3405_s1 + $0x70] sm:$0xff] (!%p141_p2)   ;;  %v2736_v37 = vld [vmem:[%s3405_s1 + $0x78] sm:$0xff] (!%p141_p2)  }
   0xa   : > { %v2735_v32 = vld [vmem:[%s3405_s1 + $0x130] sm:$0xff] (!%p141_p2)   ;;  %v2737_v55 = vld [vmem:[%s3405_s1 + $0x138] sm:$0xff] (!%p141_p2)  }
   0xb   : > { %2420 = vmatpush3.bf16.msra.mxu1 (!%p141_p2), %v2724_v2  ;;  %v2738_v2 = vld [vmem:[%s3405_s1] sm:$0xff] (!%p141_p2)  }
   0xc   : > { %2516 = vmatpush3.bf16.msra.mxu0 (!%p141_p2), %v2725_v3  ;;  %2421 = vmatprep.subr.bf16.mxu1 (!%p141_p2), %v2726_v4 }
   0xd   : > { %s3409_s13 = smov (!%p168_p3, %s2021_s13), 1  ;;  %2517 = vmatprep.subr.bf16.mxu0 %v2727_v5 }
   0xe   : > { %s2713_s30 = smul.u32 80, %s3409_s13  ;;  %s2308_s16 = sshll.u32 %s3409_s13, 6 }
   0xf   : > { %2422 = vmatpush3.bf16.msra.mxu1 %v2726_v4  ;;  %s177_s19 = scalar_lea.vmem %s3406_s2, %s2308_s16  ;;  %s2029_s20 = sshll.u32 %s3409_s13, 3 }
  0x10   : > { %2518 = vmatpush3.bf16.msra.mxu0 %v2727_v5  ;;  %2423 = vmatprep.subr.bf16.mxu1 %v2728_v6  ;;  %s2878_s10 = scalar_lea.vmem %s3404_s0, %s2713_s30  ;;  %v2739_v5 = vld [vmem:[%s3405_s1 + $0x140] sm:$0xff]   ;;  %s181_s23 = scalar_lea.vmem %s3407_s3, %s2029_s20 }
  0x11   : > { %2519 = vmatprep.subr.bf16.mxu0 %v2729_v7  ;;  %v2887_v12 = vld [vmem:[%s2878_s10] sm:$0xf]  ;;  %v2890_v13 = vld [vmem:[%s2878_s10 + $0x8] sm:$0xf]  ;;  %v2893_v14 = vld [vmem:[%s2878_s10 + $0x4] sm:$0x1] }
  0x12   : > { %v191_v15 = vunpack.c.l.bf16 %v2887_v12  ;;  %v192_v16 = vunpack.c.l.bf16 %v2890_v13  ;;  %v2898_v17 = vld [vmem:[%s2878_s10 + $0xc] sm:$0x1]  ;;  %v227_v18 = vunpack.c.l.bf16 %v2893_v14  ;;  %v2126_v20 = vld [vmem:[%s2878_s10 + $0x8] ss:$8 sps:$4 sm:$0xff]   ;;  %v2909_v25 = vld [vmem:[%s2878_s10 + $0x14] sm:$0x1] }
  0x13   : > { %2424 = vmatpush3.bf16.msra.mxu1 %v2728_v6  ;;  %v228_v19 = vunpack.c.l.bf16 %v2898_v17  ;;  %v2904_v21 = vld [vmem:[%s2878_s10 + $0xc] sm:$0x1]  ;;  %v905_v26 = vunpack.c.l.bf16 %v2126_v20  ;;  %v907_v30 = vunpack.c.h.bf16 %v2126_v20  ;;  %v908_v31 = vunpack.c.l.bf16 %v2909_v25  ;;  %v2923_v35 = vld [vmem:[%s2878_s10 + $0x10] sm:$0xf]  ;;  %v2926_v36 = vld [vmem:[%s2878_s10 + $0x18] sm:$0xf] }
  0x14   : > { %2520 = vmatpush3.bf16.msra.mxu0 %v2729_v7  ;;  %2425 = vmatprep.subr.bf16.mxu1 %v2730_v8  ;;  %v252_v22 = vrot.slane %v191_v15, 1  ;;  %v253_v23 = vrot.slane %v227_v18, 1  ;;  %v255_v24 = vrot.slane %v192_v16, 1  ;;  %v906_v29 = vunpack.c.l.bf16 %v2904_v21  ;;  %v2937_v42 = vld [vmem:[%s2878_s10 + $0x14] sm:$0x1]  ;;  %v2740_v15 = vld [vmem:[%s3405_s1 + $0x8] sm:$0xff]  }
  0x15   : > { %2521 = vmatprep.subr.bf16.mxu0 %v2731_v9  ;;  %v256_v28 = vrot.slane %v228_v19, 1  ;;  %v937_v34 = vrot.slane %v905_v26, 1  ;;  %v940_v40 = vrot.slane %v907_v30, 1  ;;  %v941_v41 = vrot.slane %v908_v31, 1  ;;  %v2942_v46 = vld [vmem:[%s2878_s10 + $0x1c] sm:$0x1] }
  0x16   : > { %v254_v33 = vsel %vm251_vm0, %v252_v22, %v253_v23  ;;  %v938_v39 = vrot.slane %v906_v29, 1  ;;  %v193_v44 = vunpack.c.l.bf16 %v2923_v35  ;;  %v194_v45 = vunpack.c.l.bf16 %v2926_v36  ;;  %v2130_v48 = vld [vmem:[%s2878_s10 + $0x18] ss:$8 sps:$4 sm:$0xff]   ;;  %v2947_v49 = vld [vmem:[%s2878_s10 + $0x1c] sm:$0x1]  ;;  %v2741_v16 = vld [vmem:[%s3405_s1 + $0x148] sm:$0xff]  }
  0x17   : > { %2426 = vmatpush3.bf16.msra.mxu1 %v2730_v8  ;;  %v257_v38 = vsel %vm251_vm0, %v255_v24, %v256_v28  ;;  %v229_v47 = vunpack.c.l.bf16 %v2937_v42  ;;  %v942_v51 = vsel %vm251_vm0, %v940_v40, %v941_v41  ;;  %v230_v52 = vunpack.c.l.bf16 %v2942_v46  ;;  %v2953_v53 = vld [vmem:[%s2878_s10 + $0x24] sm:$0x1]  ;;  %v2742_v20 = vld [vmem:[%s3405_s1 + $0x10] sm:$0xff]   ;;  %v2988_v22 = vld [vmem:[%s2878_s10 + $0x20] sm:$0xf] }
  0x18   : > { %2522 = vmatpush3.bf16.msra.mxu0 %v2731_v9  ;;  %2427 = vmatprep.subr.bf16.mxu1 %v2732_v10  ;;  %v284_v43 = vpack.c.bf16 %v257_v38, %v254_v33  ;;  %v939_v50 = vsel %vm251_vm0, %v937_v34, %v938_v39  ;;  %v909_v54 = vunpack.c.l.bf16 %v2130_v48  ;;  %v258_v57 = vrot.slane %v193_v44, 1  ;;  %v2991_v23 = vld [vmem:[%s2878_s10 + $0x28] sm:$0xf]  ;;  %v2995_v26 = vld [vmem:[%s2878_s10 + $0x24] sm:$0x1]  ;;  %v2743_v28 = vld [vmem:[%s3405_s1 + $0x150] sm:$0xff]  }
  0x19   : > { %2523 = vmatprep.subr.bf16.mxu0 %v2733_v11  ;;  %v969_v56 = vpack.c.bf16 %v942_v51, %v939_v50  ;;  %v259_v58 = vrot.slane %v229_v47, 1  ;;  %v261_v59 = vrot.slane %v194_v45, 1  ;;  %v262_v60 = vrot.slane %v230_v52, 1  ;;  %v2134_v38 = vld [vmem:[%s2878_s10 + $0x28] ss:$8 sps:$4 sm:$0xff]   ;;  %v2744_v50 = vld [vmem:[%s3405_s1 + $0x18] sm:$0xff]  }
  0x1a   : > { %2433 = vmatprep.mubr.bf16.mxu1 %v284_v43  ;;  %v910_v61 = vunpack.c.l.bf16 %v2947_v49  ;;  %v911_v63 = vunpack.c.h.bf16 %v2130_v48  ;;  %v912_v0 = vunpack.c.l.bf16 %v2953_v53  ;;  %v943_v1 = vrot.slane %v909_v54, 1  ;;  %v3012_v39 = vld [vmem:[%s2878_s10 + $0x2c] sm:$0x1]  ;;  %v2753_v49 = vld [vmem:[%s3405_s1 + $0x178] sm:$0xff]   ;;  %v2755_v53 = vld [vmem:[%s3405_s1 + $0x80] sm:$0xff]  }
  0x1b   : > { %2428 = vmatpush3.bf16.msra.mxu1 %v2732_v10  ;;  %2529 = vmatprep.mubr.bf16.mxu0 %v969_v56  ;;  %v260_v62 = vsel %vm251_vm0, %v258_v57, %v259_v58  ;;  %v263_v3 = vsel %vm251_vm0, %v261_v59, %v262_v60  ;;  %v195_v24 = vunpack.c.l.bf16 %v2988_v22  ;;  %v196_v30 = vunpack.c.l.bf16 %v2991_v23  ;;  %v3036_v56 = vld [vmem:[%s2878_s10 + $0x38] sm:$0xf]  ;;  %v3040_v58 = vld [vmem:[%s2878_s10 + $0x34] sm:$0x1] }
  0x1c   : > { %2524 = vmatpush3.bf16.msra.mxu0 %v2733_v11  ;;  %2429 = vmatprep.subr.bf16.mxu1 %v2734_v27  ;;  %v944_v4 = vrot.slane %v910_v61, 1  ;;  %v946_v6 = vrot.slane %v911_v63, 1  ;;  %v947_v7 = vrot.slane %v912_v0, 1  ;;  %v285_v8 = vpack.c.bf16 %v263_v3, %v260_v62  ;;  %v2745_v59 = vld [vmem:[%s3405_s1 + $0x158] sm:$0xff]   ;;  %v2746_v3 = vld [vmem:[%s3405_s1 + $0x20] sm:$0xff]   ;;  %v2761_v42 = vld [vmem:[%s3405_s1 + $0x190] sm:$0xff]  }
  0x1d   : > { %2525 = vmatprep.subr.bf16.mxu0 %v2735_v32  ;;  %v3008_v34 = vrot.slane %v906_v29, 2  ;;  %v3016_v40 = vrot.slane %v908_v31, 2  ;;  %v267_v43 = vrot.slane %v196_v30, 1  ;;  %v3023_v29 = vld [vmem:[%s2878_s10 + $0x34] sm:$0x1]  ;;  %v913_v44 = vunpack.c.l.bf16 %v2134_v38  ;;  %v2747_v30 = vld [vmem:[%s3405_s1 + $0x160] sm:$0xff]  }
  0x1e   : > { %v945_v9 = vsel %vm251_vm0, %v943_v1, %v944_v4  ;;  %v948_v10 = vsel %vm251_vm0, %v946_v6, %v947_v7  ;;  %v914_v45 = vunpack.c.l.bf16 %v3012_v39  ;;  %v915_v48 = vunpack.c.h.bf16 %v2134_v38  ;;  %v3028_v31 = vld [vmem:[%s2878_s10 + $0x30] sm:$0xf]  ;;  %v534_v17 = vld [vmem:[%s2878_s10 + $0x18] sm:$0xe] }
  0x1f   : > { %2430 = vmatpush3.bf16.msra.mxu1 %v2734_v27  ;;  %v970_v11 = vpack.c.bf16 %v948_v10, %v945_v9  ;;  %v2998_v27 = vld [vmem:[%s2878_s10 + $0x2c] sm:$0x1]  ;;  %v916_v25 = vunpack.c.l.bf16 %v3023_v29  ;;  %v197_v57 = vunpack.c.l.bf16 %v3028_v31  ;;  %v198_v4 = vunpack.c.l.bf16 %v3036_v56  ;;  %v3060_v9 = vld [vmem:[%s2878_s10 + $0x3c] sm:$0x1] }
  0x20   : > { %2526 = vmatpush3.bf16.msra.mxu0 %v2735_v32  ;;  %2431 = vmatprep.subr.bf16.mxu1 %v2736_v37  ;;  %v231_v32 = vunpack.c.l.bf16 %v2995_v26  ;;  %v232_v33 = vunpack.c.l.bf16 %v2998_v27  ;;  %v950_v62 = vrot.slane %v914_v45, 1  ;;  %v952_v63 = vrot.slane %v915_v48, 1  ;;  %v2748_v48 = vld [vmem:[%s3405_s1 + $0x28] sm:$0xff]   ;;  %v3226_v26 = vld [vmem:[%s2878_s10 + $0x14] sm:$0x1] }
  0x21   : > { %2527 = vmatprep.subr.bf16.mxu0 %v2737_v55  ;;  %v953_v1 = vrot.slane %v916_v25, 1  ;;  %v270_v7 = vrot.slane %v197_v57, 1  ;;  %v273_v38 = vrot.slane %v198_v4, 1  ;;  %v2166_v57 = vld [vmem:[%s2878_s10 + $0x8] sm:$0xe]  ;;  %v1151_v39 = vrot.slane %v916_v25, 2 }
  0x22   : > { %v265_v41 = vrot.slane %v231_v32, 1  ;;  %v268_v21 = vrot.slane %v232_v33, 1  ;;  %v3229_v27 = vld [vmem:[%s2878_s10 + $0x1c] sm:$0x1] }
  0x23   : > { %2432 = vmatpush3.bf16.msra.mxu1 %v2736_v37  ;;  %v264_v37 = vrot.slane %v195_v24, 1  ;;  %v918_v24 = vunpack.c.l.bf16 %v3060_v9  ;;  %v2759_v9 = vld [vmem:[%s3405_s1 + $0x188] sm:$0xff]  }
  0x24   : > { %2528 = vmatpush3.bf16.msra.mxu0 %v2737_v55  ;;  %2441 = vmatprep.subr.bf16.mxu1 %v2738_v2  ;;  %v269_v54 = vsel %vm251_vm0, %v267_v43, %v268_v21  ;;  %v949_v55 = vrot.slane %v913_v44, 1 }
  0x25   : > { %2537 = vmatprep.subr.bf16.mxu0 %v2739_v5  ;;  %v266_v51 = vsel %vm251_vm0, %v264_v37, %v265_v41  ;;  %v956_v44 = vrot.slane %v918_v24, 1 }
  0x26   : > { %2434 = vmatmul.mubr.bf16.vlgmr.msra.gmra.mrb[0].mxu1 %v285_v8  ;;  %v286_v60 = vpack.c.bf16 %v269_v54, %v266_v51  ;;  %v2138_v8 = vld [vmem:[%s2878_s10 + $0x38] ss:$8 sps:$4 sm:$0xff]   ;;  %v951_v10 = vsel %vm251_vm0, %v949_v55, %v950_v62  ;;  %v2030_v55 = vcombine.low %v2887_v12, %v2890_v13  ;;  %v2749_v62 = vld [vmem:[%s3405_s1 + $0x168] sm:$0xff]  }
  0x27   : > { %2442 = vmatpush3.bf16.msra.mxu1 %v2738_v2  ;;  %2530 = vmatmul.mubr.bf16.vlgmr.msra.gmra.mrb[0].mxu0 %v970_v11  ;;  %v3050_v2 = vld [vmem:[%s2878_s10 + $0x3c] sm:$0x1]  ;;  %v954_v11 = vsel %vm251_vm0, %v952_v63, %v953_v1  ;;  %v919_v43 = vunpack.c.h.bf16 %v2138_v8  ;;  %v2169_v12 = vld [vmem:[%s2878_s10 + $0x20] sm:$0xe] }
  0x28   : > { %2538 = vmatpush3.bf16.msra.mxu0 %v2739_v5  ;;  %2443 = vmatprep.subr.bf16.mxu1 %v2740_v15  ;;  %v233_v5 = vunpack.c.l.bf16 %v3040_v58  ;;  %v234_v6 = vunpack.c.l.bf16 %v3050_v2  ;;  %v971_v37 = vpack.c.bf16 %v954_v11, %v951_v10  ;;  %v2168_v11 = vld [vmem:[%s2878_s10 + $0x18] sm:$0xe]  ;;  %v2778_v2 = vld [vmem:[%s3405_s1 + $0xc8] sm:$0xff]  }
  0x29   : > { %2539 = vmatprep.subr.bf16.mxu0 %v2741_v16  ;;  %2437 = vmatprep.mubr.bf16.mxu1 %v286_v60  ;;  %v2167_v60 = vld [vmem:[%s2878_s10 + $0x10] sm:$0xe]  ;;  %v958_v4 = vrot.slane %v919_v43, 1  ;;  %v1122_v43 = vunpack.c.l.bf16 %v2169_v12 }
  0x2a   : > { %v274_v41 = vrot.slane %v234_v6, 1  ;;  %2533 = vmatprep.mubr.bf16.mxu0 %v971_v37  ;;  %v1120_v10 = vunpack.c.l.bf16 %v2167_v60  ;;  %v2756_v60 = vld [vmem:[%s3405_s1 + $0x180] sm:$0xff]  }
  0x2b   : > { %2444 = vmatpush3.bf16.msra.mxu1 %v2740_v15  ;;  %v3065_v15 = vld [vmem:[%s2878_s10 + $0x44] sm:$0x1] }
  0x2c   : > { %2540 = vmatpush3.bf16.msra.mxu0 %v2741_v16  ;;  %2445 = vmatprep.subr.bf16.mxu1 %v2742_v20  ;;  %v917_v16 = vunpack.c.l.bf16 %v2138_v8  ;;  %v920_v21 = vunpack.c.l.bf16 %v3065_v15  ;;  %v275_v54 = vsel %vm251_vm0, %v273_v38, %v274_v41  ;;  %v1119_v8 = vunpack.c.l.bf16 %v2166_v57 }
  0x2d   : > { %2541 = vmatprep.subr.bf16.mxu0 %v2743_v28  ;;  %v1138_v37 = vrot.slane %v1120_v10, 2  ;;  %v1121_v41 = vunpack.c.l.bf16 %v2168_v11  ;;  %v1154_v11 = vrot.slane %v918_v24, 2  ;;  %v2032_v24 = vcombine.low %v2988_v22, %v2991_v23  ;;  %v2760_v23 = vld [vmem:[%s3405_s1 + $0x90] sm:$0xff]  }
  0x2e   : > { %v1157_v29 = vrot.slane %v920_v21, 2  ;;  %v563_v22 = vrot.slane %v229_v47, 2 }
  0x2f   : > { %2446 = vmatpush3.bf16.msra.mxu1 %v2742_v20  ;;  %v271_v20 = vrot.slane %v233_v5, 1  ;;  %v1140_v38 = vsel %vm555_vm1, %v1138_v37, %v3016_v40  ;;  %v1141_v40 = vrot.slane %v1121_v41, 2 }
  0x30   : > { %2542 = vmatpush3.bf16.msra.mxu0 %v2743_v28  ;;  %2447 = vmatprep.subr.bf16.mxu1 %v2744_v50  ;;  %v955_v28 = vrot.slane %v917_v16, 1  ;;  %v1135_v16 = vrot.slane %v1119_v8, 2 }
  0x31   : > { %2543 = vmatprep.subr.bf16.mxu0 %v2745_v59  ;;  %v272_v51 = vsel %vm251_vm0, %v270_v7, %v271_v20  ;;  %v959_v7 = vrot.slane %v920_v21, 1 }
  0x32   : > { %v287_v63 = vpack.c.bf16 %v275_v54, %v272_v51  ;;  %v957_v1 = vsel %vm251_vm0, %v955_v28, %v956_v44  ;;  %v1137_v20 = vsel %vm555_vm1, %v1135_v16, %v3008_v34  ;;  %v2751_v28 = vld [vmem:[%s3405_s1 + $0x170] sm:$0xff]   ;;  %v1145_v44 = vrot.slane %v912_v0, 2  ;;  %v2752_v34 = vld [vmem:[%s3405_s1 + $0x38] sm:$0xff]   ;;  %v532_v16 = vld [vmem:[%s2878_s10 + $0x8] sm:$0xe] }
  0x33   : > { %2448 = vmatpush3.bf16.msra.mxu1 %v2744_v50  ;;  %v960_v13 = vsel %vm251_vm0, %v958_v4, %v959_v7  ;;  %v1144_v51 = vrot.slane %v1122_v43, 2  ;;  %v1148_v0 = vrot.slane %v914_v45, 2  ;;  %v2172_v45 = vld [vmem:[%s2878_s10 + $0x38] sm:$0xe]  ;;  %v2758_v4 = vld [vmem:[%s3405_s1 + $0x88] sm:$0xff]   ;;  %v540_v21 = vunpack.c.l.bf16 %v532_v16 }
  0x34   : > { %2544 = vmatpush3.bf16.msra.mxu0 %v2745_v59  ;;  %2449 = vmatprep.subr.bf16.mxu1 %v2746_v3  ;;  %v972_v50 = vpack.c.bf16 %v960_v13, %v957_v1  ;;  %v2750_v59 = vld [vmem:[%s3405_s1 + $0x30] sm:$0xff]   ;;  %v2173_v1 = vld [vmem:[%s2878_s10 + $0x40] sm:$0xe]  ;;  %v1125_v8 = vunpack.c.l.bf16 %v2172_v45 }
  0x35   : > { %2545 = vmatprep.subr.bf16.mxu0 %v2747_v30  ;;  %2438 = vmatmul.mubr.bf16.gmra.mrb[4].mxu1 %v287_v63  ;;  %v1146_v54 = vsel %vm555_vm1, %v1144_v51, %v1145_v44  ;;  %v1126_v10 = vunpack.c.l.bf16 %v2173_v1  ;;  %v559_v43 = vrot.slane %v540_v21, 2  ;;  %v2762_v51 = vld [vmem:[%s3405_s1 + $0x98] sm:$0xff]   ;;  %v1485_v21 = vunpack.c.l.bf16 %v3226_v26 }
  0x36   : > { %2457 = vmatprep.mubr.bf16.mxu1 %v2030_v55  ;;  %2534 = vmatmul.mubr.bf16.gmra.mrb[4].mxu0 %v972_v50  ;;  %v2171_v55 = vld [vmem:[%s2878_s10 + $0x30] sm:$0xe]  ;;  %v1153_v12 = vrot.slane %v1125_v8, 2  ;;  %v531_v50 = vld [vmem:[%s2878_s10] sm:$0xe]  ;;  %v2772_v8 = vld [vmem:[%s3405_s1 + $0xb8] sm:$0xff]  }
  0x37   : > { %2450 = vmatpush3.bf16.msra.mxu1 %v2746_v3  ;;  %v1167_v3 = vpack.c.bf16 %v1140_v38, %v1137_v20  ;;  %v1124_v63 = vunpack.c.l.bf16 %v2171_v55  ;;  %v1156_v13 = vrot.slane %v1126_v10, 2  ;;  %v539_v15 = vunpack.c.l.bf16 %v531_v50  ;;  %v2766_v55 = vld [vmem:[%s3405_s1 + $0xa8] sm:$0xff]   ;;  %v2773_v10 = vld [vmem:[%s3405_s1 + $0x1b8] sm:$0xff]  }
  0x38   : > { %2546 = vmatpush3.bf16.msra.mxu0 %v2747_v30  ;;  %2451 = vmatprep.subr.bf16.mxu1 %v2748_v48  ;;  %v1142_v30 = vrot.slane %v910_v61, 2  ;;  %v2170_v61 = vld [vmem:[%s2878_s10 + $0x28] sm:$0xe]  ;;  %v557_v20 = vrot.slane %v227_v18, 2  ;;  %v560_v38 = vrot.slane %v228_v19, 2  ;;  %v566_v19 = vrot.slane %v230_v52, 2 }
  0x39   : > { %2547 = vmatprep.subr.bf16.mxu0 %v2749_v62  ;;  %2553 = vmatprep.mubr.bf16.mxu0 %v1167_v3  ;;  %v1123_v57 = vunpack.c.l.bf16 %v2170_v61  ;;  %v556_v41 = vrot.slane %v539_v15, 2  ;;  %v1158_v14 = vsel %vm555_vm1, %v1156_v13, %v1157_v29  ;;  %v533_v18 = vld [vmem:[%s2878_s10 + $0x10] sm:$0xe]  ;;  %v542_v3 = vunpack.c.l.bf16 %v534_v17  ;;  %v2774_v13 = vld [vmem:[%s3405_s1 + $0xc0] sm:$0xff]  }
  0x3a   : > { %v541_v47 = vunpack.c.l.bf16 %v533_v18  ;;  %v2775_v61 = vld [vmem:[%s2878_s10 + $0x10] ss:$8 sps:$4 sm:$0xff]   ;;  %v575_v50 = vrot.slane %v233_v5, 2 }
  0x3b   : > { %2452 = vmatpush3.bf16.msra.mxu1 %v2748_v48  ;;  %v1143_v48 = vsel %vm555_vm1, %v1141_v40, %v1142_v30  ;;  %v1147_v7 = vrot.slane %v1123_v57, 2  ;;  %v2033_v30 = vcombine.low %v3028_v31, %v3036_v56  ;;  %v558_v44 = vsel %vm555_vm1, %v556_v41, %v557_v20  ;;  %v2763_v31 = vld [vmem:[%s3405_s1 + $0x198] sm:$0xff]   ;;  %v2767_v57 = vld [vmem:[%s3405_s1 + $0x1a8] sm:$0xff]   ;;  %v2780_v17 = vld [vmem:[%s3405_s1 + $0xd0] sm:$0xff]  }
  0x3c   : > { %2548 = vmatpush3.bf16.msra.mxu0 %v2749_v62  ;;  %2453 = vmatprep.subr.bf16.mxu1 %v2750_v59  ;;  %v2031_v62 = vcombine.low %v2923_v35, %v2926_v36  ;;  %v1168_v35 = vpack.c.bf16 %v1146_v54, %v1143_v48  ;;  %v1150_v36 = vrot.slane %v1124_v63, 2  ;;  %v562_v52 = vrot.slane %v541_v47, 2  ;;  %v2764_v48 = vld [vmem:[%s3405_s1 + $0xa0] sm:$0xff]   ;;  %v2769_v63 = vld [vmem:[%s3405_s1 + $0xb0] sm:$0xff]  }
  0x3d   : > { %2549 = vmatprep.subr.bf16.mxu0 %v2751_v28  ;;  %v1149_v25 = vsel %vm555_vm1, %v1147_v7, %v1148_v0  ;;  %v565_v40 = vrot.slane %v542_v3, 2  ;;  %v2765_v54 = vld [vmem:[%s3405_s1 + $0x1a0] sm:$0xff]   ;;  %v538_v7 = vld [vmem:[%s2878_s10 + $0x38] sm:$0xe]  ;;  %v1487_v20 = vunpack.c.l.bf16 %v3229_v27 }
  0x3e   : > { %v1152_v37 = vsel %vm555_vm1, %v1150_v36, %v1151_v39  ;;  %v2770_v39 = vld [vmem:[%s3405_s1 + $0x1b0] sm:$0xff]   ;;  %v2783_v3 = vld [vmem:[%s3405_s1 + $0x1d8] sm:$0xff]  }
  0x3f   : > { %2454 = vmatpush3.bf16.msra.mxu1 %v2750_v59  ;;  %v1169_v59 = vpack.c.bf16 %v1152_v37, %v1149_v25  ;;  %v2234_v16 = vld [vmem:[%s2878_s10 + $0x10] ss:$8 sps:$4 sm:$0xff]   ;;  %v2777_v37 = vld [vmem:[%s2878_s10 + $0x20] ss:$8 sps:$4 sm:$0xff]   ;;  %v1520_v18 = vrot.slane %v1487_v20, 1 }
  0x40   : > { %2550 = vmatpush3.bf16.msra.mxu0 %v2751_v28  ;;  %2455 = vmatprep.subr.bf16.mxu1 %v2752_v34  ;;  %v1155_v28 = vsel %vm555_vm1, %v1153_v12, %v1154_v11  ;;  %v569_v11 = vrot.slane %v231_v32, 2  ;;  %v546_v12 = vunpack.c.l.bf16 %v538_v7  ;;  %v2776_v32 = vld [vmem:[%s3405_s1 + $0x1c0] sm:$0xff]   ;;  %v1484_v15 = vunpack.c.l.bf16 %v2234_v16  ;;  %v2788_v41 = vld [vmem:[%s2878_s10 + $0x30] ss:$8 sps:$4 sm:$0xff]  }
  0x41   : > { %2551 = vmatprep.subr.bf16.mxu0 %v2753_v49  ;;  %v1170_v46 = vpack.c.bf16 %v1158_v14, %v1155_v28  ;;  %v1517_v28 = vrot.slane %v1485_v21, 1  ;;  %v2799_v27 = vld [vmem:[%s2878_s10 + $0x38] ss:$8 sps:$4 sm:$0xff]  }
  0x43   : > { %2456 = vmatpush3.bf16.msra.mxu1 %v2752_v34  ;;  %v561_v34 = vsel %vm555_vm1, %v559_v43, %v560_v38 }
  0x44   : > { %2552 = vmatpush3.bf16.msra.mxu0 %v2753_v49  ;;  %2465 = vmatprep.subr.bf16.mxu1 %v2755_v53  ;;  %v588_v56 = vpack.c.bf16 %v561_v34, %v558_v44  ;;  %v3179_v49 = vsel %vm555_vm1, %v562_v52, %v563_v22 }
  0x45   : > { %2561 = vmatprep.subr.bf16.mxu0 %v2756_v60 }
  0x46   : > { %2458 = vmatmul.mubr.bf16.vlgmr.msra.gmra.mrb[0].mxu1 %v2031_v62  ;;  %v536_v62 = vld [vmem:[%s2878_s10 + $0x28] sm:$0xe] }
  0x47   : > { %2466 = vmatpush3.bf16.msra.mxu1 %v2755_v53  ;;  %2554 = vmatmul.mubr.bf16.vlgmr.msra.gmra.mrb[0].mxu0 %v1168_v35  ;;  %v3182_v53 = vsel %vm555_vm1, %v565_v40, %v566_v19  ;;  %v544_v1 = vunpack.c.l.bf16 %v536_v62  ;;  %v572_v35 = vrot.slane %v232_v33, 2  ;;  %v578_v33 = vrot.slane %v234_v6, 2  ;;  %v2779_v6 = vld [vmem:[%s3405_s1 + $0x1c8] sm:$0xff]   ;;  %v2781_v19 = vld [vmem:[%s3405_s1 + $0x1d0] sm:$0xff]   ;;  %v2784_v40 = vld [vmem:[%s3405_s1 + $0xe0] sm:$0xff]  }
  0x48   : > { %2562 = vmatpush3.bf16.msra.mxu0 %v2756_v60  ;;  %2467 = vmatprep.subr.bf16.mxu1 %v2758_v4  ;;  %v589_v0 = vpack.c.bf16 %v3182_v53, %v3179_v49  ;;  %v535_v60 = vld [vmem:[%s2878_s10 + $0x20] sm:$0xe]  ;;  %v2786_v49 = vld [vmem:[%s3405_s1 + $0xe8] sm:$0xff]   ;;  %v3299_v62 = vld [vmem:[%s2878_s10 + $0x34] sm:$0x1] }
  0x49   : > { %2563 = vmatprep.subr.bf16.mxu0 %v2759_v9  ;;  %2461 = vmatprep.mubr.bf16.mxu1 %v2032_v24  ;;  %v543_v45 = vunpack.c.l.bf16 %v535_v60  ;;  %v571_v29 = vrot.slane %v544_v1, 2  ;;  %v577_v24 = vrot.slane %v546_v12, 2  ;;  %v3287_v53 = vld [vmem:[%s2878_s10 + $0x2c] sm:$0x1]  ;;  %v2789_v60 = vld [vmem:[%s3405_s1 + $0xf0] sm:$0xff]  }
  0x4a   : > { %2557 = vmatprep.mubr.bf16.mxu0 %v1169_v59  ;;  %v1486_v59 = vunpack.c.h.bf16 %v2234_v16  ;;  %v3321_v12 = vld [vmem:[%s2878_s10 + $0x44] sm:$0x1] }
  0x4b   : > { %2468 = vmatpush3.bf16.msra.mxu1 %v2758_v4  ;;  %v537_v4 = vld [vmem:[%s2878_s10 + $0x30] sm:$0xe]  ;;  %v568_v36 = vrot.slane %v543_v45, 2  ;;  %v573_v58 = vsel %vm555_vm1, %v571_v29, %v572_v35  ;;  %v579_v22 = vsel %vm555_vm1, %v577_v24, %v578_v33  ;;  %v2793_v29 = vld [vmem:[%s3405_s1 + $0x1f8] sm:$0xff]  }
  0x4c   : > { %2564 = vmatpush3.bf16.msra.mxu0 %v2759_v9  ;;  %2469 = vmatprep.subr.bf16.mxu1 %v2760_v23  ;;  %v545_v25 = vunpack.c.l.bf16 %v537_v4  ;;  %v1519_v14 = vrot.slane %v1486_v59, 1  ;;  %v2275_v24 = vld [vmem:[%s2878_s10 + $0x18] sm:$0xe]  ;;  %v1497_v59 = vunpack.c.l.bf16 %v3321_v12 }
  0x4d   : > { %2565 = vmatprep.subr.bf16.mxu0 %v2761_v42  ;;  %v570_v9 = vsel %vm555_vm1, %v568_v36, %v569_v11  ;;  %v1493_v11 = vunpack.c.l.bf16 %v3299_v62  ;;  %v2792_v36 = vld [vmem:[%s3405_s1 + $0xf8] sm:$0xff]  }
  0x4e   : > { %2462 = vmatmul.mubr.bf16.gmra.mrb[4].mxu1 %v2033_v30  ;;  %v574_v5 = vrot.slane %v545_v25, 2  ;;  %v590_v38 = vpack.c.bf16 %v573_v58, %v570_v9  ;;  %v2790_v30 = vld [vmem:[%s2878_s10 + $0x40] ss:$8 sps:$4 sm:$0xff]   ;;  %v1521_v34 = vsel %vm251_vm0, %v1519_v14, %v1520_v18 }
  0x4f   : > { %2470 = vmatpush3.bf16.msra.mxu1 %v2760_v23  ;;  %2558 = vmatmul.mubr.bf16.gmra.mrb[4].mxu0 %v1170_v46  ;;  %v1516_v23 = vrot.slane %v1484_v15, 1  ;;  %v2794_v46 = vld [vmem:[%s2878_s10 + $0x8] ss:$8 sps:$4 sm:$0xff]   ;;  %v1529_v9 = vrot.slane %v1493_v11, 1 }
  0x50   : > { %2566 = vmatpush3.bf16.msra.mxu0 %v2761_v42  ;;  %2471 = vmatprep.subr.bf16.mxu1 %v2762_v51  ;;  %v576_v43 = vsel %vm555_vm1, %v574_v5, %v575_v50  ;;  %v2782_v42 = vld [vmem:[%s3405_s1 + $0xd8] sm:$0xff]   ;;  %v2246_v25 = vld [vmem:[%s2878_s10 + $0x40] ss:$8 sps:$4 sm:$0xff]   ;;  %v2274_v5 = vld [vmem:[%s2878_s10 + $0x10] sm:$0xe] }
  0x51   : > { %2567 = vmatprep.subr.bf16.mxu0 %v2763_v31  ;;  %2481 = vmatprep.mubr.bf16.mxu1 %v588_v56  ;;  %v591_v47 = vpack.c.bf16 %v579_v22, %v576_v43  ;;  %v1518_v44 = vsel %vm251_vm0, %v1516_v23, %v1517_v28  ;;  %v3281_v56 = vld [vmem:[%s2878_s10 + $0x24] sm:$0x1]  ;;  %v1496_v15 = vunpack.c.l.bf16 %v2246_v25  ;;  %v2795_v43 = vld [vmem:[%s2878_s10 + $0x18] ss:$8 sps:$4 sm:$0xff]   ;;  %v1698_v23 = vunpack.c.l.bf16 %v2274_v5 }
  0x52   : > { %2577 = vmatprep.mubr.bf16.mxu0 %v2775_v61  ;;  %v1548_v52 = vpack.c.bf16 %v1521_v34, %v1518_v44  ;;  %v2787_v61 = vld [vmem:[%s3405_s1 + $0x1e8] sm:$0xff]   ;;  %v1699_v28 = vunpack.c.l.bf16 %v2275_v24  ;;  %v2805_v24 = vld [vmem:[%s3405_s1 + $0x238] sm:$0xff]  }
  0x53   : > { %2472 = vmatpush3.bf16.msra.mxu1 %v2762_v51  ;;  %v2785_v51 = vld [vmem:[%s3405_s1 + $0x1e0] sm:$0xff]   ;;  %v2798_v34 = vld [vmem:[%s2878_s10 + $0x28] ss:$8 sps:$4 sm:$0xff]  }
  0x54   : > { %2568 = vmatpush3.bf16.msra.mxu0 %v2763_v31  ;;  %2473 = vmatprep.subr.bf16.mxu1 %v2764_v48  ;;  %v2238_v31 = vld [vmem:[%s2878_s10 + $0x20] ss:$8 sps:$4 sm:$0xff]  }
  0x55   : > { %2569 = vmatprep.subr.bf16.mxu0 %v2765_v54 }
  0x57   : > { %2474 = vmatpush3.bf16.msra.mxu1 %v2764_v48  ;;  %v1489_v48 = vunpack.c.l.bf16 %v3281_v56 }
  0x58   : > { %2570 = vmatpush3.bf16.msra.mxu0 %v2765_v54  ;;  %2475 = vmatprep.subr.bf16.mxu1 %v2766_v55  ;;  %v1490_v54 = vunpack.c.h.bf16 %v2238_v31 }
  0x59   : > { %2571 = vmatprep.subr.bf16.mxu0 %v2767_v57  ;;  %v1523_v1 = vrot.slane %v1489_v48, 1 }
  0x5b   : > { %2476 = vmatpush3.bf16.msra.mxu1 %v2766_v55  ;;  %v1491_v55 = vunpack.c.l.bf16 %v3287_v53 }
  0x5c   : > { %2572 = vmatpush3.bf16.msra.mxu0 %v2767_v57  ;;  %2477 = vmatprep.subr.bf16.mxu1 %v2769_v63  ;;  %v2242_v57 = vld [vmem:[%s2878_s10 + $0x30] ss:$8 sps:$4 sm:$0xff]  }
  0x5d   : > { %2573 = vmatprep.subr.bf16.mxu0 %v2770_v39  ;;  %v1492_v4 = vunpack.c.l.bf16 %v2242_v57  ;;  %v1494_v7 = vunpack.c.h.bf16 %v2242_v57  ;;  %v1724_v12 = vrot.slane %v1491_v55, 2 }
  0x5f   : > { %2478 = vmatpush3.bf16.msra.mxu1 %v2769_v63  ;;  %v3302_v63 = vld [vmem:[%s2878_s10 + $0x3c] sm:$0x1]  ;;  %v1528_v50 = vrot.slane %v1492_v4, 1  ;;  %v1531_v16 = vrot.slane %v1494_v7, 1  ;;  %v2802_v7 = vld [vmem:[%s3405_s1 + $0x220] sm:$0xff]  }
  0x60   : > { %2574 = vmatpush3.bf16.msra.mxu0 %v2770_v39  ;;  %2479 = vmatprep.subr.bf16.mxu1 %v2772_v8  ;;  %v2791_v39 = vld [vmem:[%s3405_s1 + $0x1f0] sm:$0xff]   ;;  %v1495_v35 = vunpack.c.l.bf16 %v3302_v63 }
  0x61   : > { %2575 = vmatprep.subr.bf16.mxu0 %v2773_v10  ;;  %v1530_v14 = vsel %vm251_vm0, %v1528_v50, %v1529_v9  ;;  %v2804_v50 = vld [vmem:[%s3405_s1 + $0x230] sm:$0xff]  }
  0x62   : > { %v1532_v58 = vrot.slane %v1495_v35, 1 }
  0x63   : > { %2480 = vmatpush3.bf16.msra.mxu1 %v2772_v8  ;;  %v1525_v8 = vrot.slane %v1490_v54, 1  ;;  %v1730_v54 = vrot.slane %v1495_v35, 2  ;;  %v2276_v35 = vld [vmem:[%s2878_s10 + $0x20] sm:$0xe] }
  0x64   : > { %2576 = vmatpush3.bf16.msra.mxu0 %v2773_v10  ;;  %2489 = vmatprep.subr.bf16.mxu1 %v2774_v13  ;;  %v1526_v10 = vrot.slane %v1491_v55, 1  ;;  %v1533_v18 = vsel %vm251_vm0, %v1531_v16, %v1532_v58  ;;  %v1700_v16 = vunpack.c.l.bf16 %v2276_v35 }
  0x65   : > { %2585 = vmatprep.subr.bf16.mxu0 %v2776_v32 }
  0x66   : > { %2482 = vmatmul.mubr.bf16.vlgmr.msra.gmra.mrb[0].mxu1 %v589_v0  ;;  %v1488_v0 = vunpack.c.l.bf16 %v2238_v31  ;;  %v1527_v33 = vsel %vm251_vm0, %v1525_v8, %v1526_v10  ;;  %v1718_v31 = vrot.slane %v1487_v20, 2  ;;  %v2803_v8 = vld [vmem:[%s3405_s1 + $0x228] sm:$0xff]   ;;  %v2280_v10 = vld [vmem:[%s2878_s10 + $0x40] sm:$0xe] }
  0x67   : > { %2490 = vmatpush3.bf16.msra.mxu1 %v2774_v13  ;;  %2578 = vmatmul.mubr.bf16.vlgmr.msra.gmra.mrb[0].mxu0 %v2777_v37  ;;  %v3324_v13 = vld [vmem:[%s2878_s10 + $0x4c] sm:$0x1]  ;;  %v2796_v37 = vld [vmem:[%s3405_s1 + $0x200] sm:$0xff]  }
  0x68   : > { %2586 = vmatpush3.bf16.msra.mxu0 %v2776_v32  ;;  %2491 = vmatprep.subr.bf16.mxu1 %v2778_v2  ;;  %v1522_v45 = vrot.slane %v1488_v0, 1 }
  0x69   : > { %2587 = vmatprep.subr.bf16.mxu0 %v2779_v6  ;;  %2485 = vmatprep.mubr.bf16.mxu1 %v590_v38  ;;  %v2278_v38 = vld [vmem:[%s2878_s10 + $0x30] sm:$0xe] }
  0x6a   : > { %2581 = vmatprep.mubr.bf16.mxu0 %v2788_v41  ;;  %v1524_v32 = vsel %vm251_vm0, %v1522_v45, %v1523_v1  ;;  %v2279_v41 = vld [vmem:[%s2878_s10 + $0x38] sm:$0xe] }
  0x6b   : > { %2492 = vmatpush3.bf16.msra.mxu1 %v2778_v2  ;;  %v1498_v2 = vunpack.c.h.bf16 %v2246_v25  ;;  %v1549_v22 = vpack.c.bf16 %v1527_v33, %v1524_v32  ;;  %v2801_v45 = vld [vmem:[%s3405_s1 + $0x218] sm:$0xff]   ;;  %v1733_v33 = vrot.slane %v1497_v59, 2 }
  0x6c   : > { %2588 = vmatpush3.bf16.msra.mxu0 %v2779_v6  ;;  %2493 = vmatprep.subr.bf16.mxu1 %v2780_v17  ;;  %v1499_v6 = vunpack.c.l.bf16 %v3324_v13 }
  0x6d   : > { %2589 = vmatprep.subr.bf16.mxu0 %v2781_v19 }
  0x6e   : > { %2486 = vmatmul.mubr.bf16.gmra.mrb[4].mxu1 %v591_v47  ;;  %v1534_v47 = vrot.slane %v1496_v15, 1  ;;  %v1538_v44 = vrot.slane %v1499_v6, 1  ;;  %v1736_v9 = vrot.slane %v1499_v6, 2  ;;  %v1721_v15 = vrot.slane %v1489_v48, 2 }
  0x6f   : > { %2494 = vmatpush3.bf16.msra.mxu1 %v2780_v17  ;;  %2582 = vmatmul.mubr.bf16.gmra.mrb[4].mxu0 %v2790_v30  ;;  %v1702_v17 = vunpack.c.l.bf16 %v2278_v38  ;;  %v1537_v30 = vrot.slane %v1498_v2, 1 }
  0x70   : > { %2590 = vmatpush3.bf16.msra.mxu0 %v2781_v19  ;;  %2495 = vmatprep.subr.bf16.mxu1 %v2782_v42  ;;  %v1703_v19 = vunpack.c.l.bf16 %v2279_v41 }
  0x71   : > { %2591 = vmatprep.subr.bf16.mxu0 %v2783_v3  ;;  %2505 = vmatprep.mubr.bf16.mxu1 %v2794_v46  ;;  %v1715_v46 = vrot.slane %v1485_v21, 2  ;;  %v1539_v26 = vsel %vm251_vm0, %v1537_v30, %v1538_v44  ;;  %v2800_v21 = vld [vmem:[%s3405_s1 + $0x210] sm:$0xff]  }
  0x72   : > { %2601 = vmatprep.mubr.bf16.mxu0 %v1548_v52  ;;  %v1550_v52 = vpack.c.bf16 %v1533_v18, %v1530_v14  ;;  %v1729_v0 = vrot.slane %v1703_v19, 2 }
  0x73   : > { %2496 = vmatpush3.bf16.msra.mxu1 %v2782_v42  ;;  %v2797_v42 = vld [vmem:[%s3405_s1 + $0x208] sm:$0xff]  }
  0x74   : > { %2592 = vmatpush3.bf16.msra.mxu0 %v2783_v3  ;;  %2497 = vmatprep.subr.bf16.mxu1 %v2784_v40  ;;  %v1535_v3 = vrot.slane %v1497_v59, 1 }
  0x75   : > { %2593 = vmatprep.subr.bf16.mxu0 %v2785_v51 }
  0x76   : > { %v1536_v57 = vsel %vm251_vm0, %v1534_v47, %v1535_v3 }
  0x77   : > { %2498 = vmatpush3.bf16.msra.mxu1 %v2784_v40  ;;  %v1714_v40 = vrot.slane %v1698_v23, 2  ;;  %v1551_v62 = vpack.c.bf16 %v1539_v26, %v1536_v57 }
  0x78   : > { %2594 = vmatpush3.bf16.msra.mxu0 %v2785_v51  ;;  %2499 = vmatprep.subr.bf16.mxu1 %v2786_v49  ;;  %v1717_v51 = vrot.slane %v1699_v28, 2 }
  0x79   : > { %2595 = vmatprep.subr.bf16.mxu0 %v2787_v61  ;;  %v1716_v20 = vsel %vm555_vm1, %v1714_v40, %v1715_v46 }
  0x7b   : > { %2500 = vmatpush3.bf16.msra.mxu1 %v2786_v49  ;;  %v1726_v49 = vrot.slane %v1702_v17, 2 }
  0x7c   : > { %2596 = vmatpush3.bf16.msra.mxu0 %v2787_v61  ;;  %2501 = vmatprep.subr.bf16.mxu1 %v2789_v60  ;;  %v1727_v61 = vrot.slane %v1493_v11, 2  ;;  %v2281_v11 = vld [vmem:[%s2878_s10 + $0x48] sm:$0xe] }
  0x7d   : > { %2597 = vmatprep.subr.bf16.mxu0 %v2791_v39  ;;  %v1705_v25 = vunpack.c.l.bf16 %v2281_v11 }
  0x7e   : > { %v1728_v63 = vsel %vm555_vm1, %v1726_v49, %v1727_v61 }
  0x7f   : > { %2502 = vmatpush3.bf16.msra.mxu1 %v2789_v60  ;;  %v1719_v60 = vsel %vm555_vm1, %v1717_v51, %v1718_v31  ;;  %v1735_v5 = vrot.slane %v1705_v25, 2 }
  0x80   : > { %2598 = vmatpush3.bf16.msra.mxu0 %v2791_v39  ;;  %2503 = vmatprep.subr.bf16.mxu1 %v2792_v36  ;;  %v1731_v39 = vsel %vm555_vm1, %v1729_v0, %v1730_v54  ;;  %v1746_v1 = vpack.c.bf16 %v1719_v60, %v1716_v20 }
  0x81   : > { %2599 = vmatprep.subr.bf16.mxu0 %v2793_v29  ;;  %v1748_v4 = vpack.c.bf16 %v1731_v39, %v1728_v63  ;;  %v1737_v59 = vsel %vm555_vm1, %v1735_v5, %v1736_v9 }
  0x83   : > { %2504 = vmatpush3.bf16.msra.mxu1 %v2792_v36  ;;  %v2277_v36 = vld [vmem:[%s2878_s10 + $0x28] sm:$0xe] }
  0x84   : > { %2600 = vmatpush3.bf16.msra.mxu0 %v2793_v29  ;;  %2633 = vmatprep.subr.bf16.mxu1 %v2796_v37  ;;  %v1704_v29 = vunpack.c.l.bf16 %v2280_v10  ;;  %v1701_v32 = vunpack.c.l.bf16 %v2277_v36 }
  0x85   : > { %2609 = vmatprep.subr.bf16.mxu0 %v2796_v37 }
  0x86   : > { %2506 = vmatmul.mubr.bf16.vlgmr.msra.gmra.mrb[0].mxu1 %v2795_v43  ;;  %v1732_v58 = vrot.slane %v1704_v29, 2  ;;  %v1723_v2 = vrot.slane %v1701_v32, 2 }
  0x87   : > { %2602 = vmatmul.mubr.bf16.vlgmr.msra.gmra.mrb[0].mxu0 %v1549_v22  ;;  %2641 = vmatpush3.bf16.msra.mxu1 %v2796_v37 }
  0x88   : > { %2610 = vmatpush3.bf16.msra.mxu0 %v2796_v37  ;;  %2634 = vmatprep.subr.bf16.mxu1 %v2797_v42  ;;  %v1720_v37 = vrot.slane %v1700_v16, 2  ;;  %v1734_v13 = vsel %vm555_vm1, %v1732_v58, %v1733_v33  ;;  %v1725_v38 = vsel %vm555_vm1, %v1723_v2, %v1724_v12 }
  0x89   : > { %2611 = vmatprep.subr.bf16.mxu0 %v2797_v42  ;;  %2509 = vmatprep.mubr.bf16.mxu1 %v2798_v34  ;;  %v1749_v41 = vpack.c.bf16 %v1737_v59, %v1734_v13 }
  0x8a   : > { %2605 = vmatprep.mubr.bf16.mxu0 %v1550_v52  ;;  %v1722_v6 = vsel %vm555_vm1, %v1720_v37, %v1721_v15 }
  0x8b   : > { %2642 = vmatpush3.bf16.msra.mxu1 %v2797_v42  ;;  %v1747_v56 = vpack.c.bf16 %v1725_v38, %v1722_v6 }
  0x8c   : > { %2612 = vmatpush3.bf16.msra.mxu0 %v2797_v42  ;;  %2635 = vmatprep.subr.bf16.mxu1 %v2800_v21 }
  0x8d   : > { %2613 = vmatprep.subr.bf16.mxu0 %v2800_v21 }
  0x8e   : > { %2510 = vmatmul.mubr.bf16.gmra.mrb[4].mxu1 %v2799_v27 }
  0x8f   : > { %2606 = vmatmul.mubr.bf16.gmra.mrb[4].mxu0 %v1551_v62  ;;  %2643 = vmatpush3.bf16.msra.mxu1 %v2800_v21 }
  0x90   : > { %2614 = vmatpush3.bf16.msra.mxu0 %v2800_v21  ;;  %2636 = vmatprep.subr.bf16.mxu1 %v2801_v45 }
  0x91   : > { %2615 = vmatprep.subr.bf16.mxu0 %v2801_v45  ;;  %2625 = vmatprep.mubr.bf16.mxu0 %v1746_v1 }
  0x92   : > { %2629 = vmatprep.mubr.bf16.mxu1 %v1748_v4 }
  0x93   : > { %2644 = vmatpush3.bf16.msra.mxu1 %v2801_v45 }
  0x94   : > { %2616 = vmatpush3.bf16.msra.mxu0 %v2801_v45  ;;  %2637 = vmatprep.subr.bf16.mxu1 %v2802_v7 }
  0x95   : > { %2617 = vmatprep.subr.bf16.mxu0 %v2802_v7 }
  0x97   : > { %2645 = vmatpush3.bf16.msra.mxu1 %v2802_v7 }
  0x98   : > { %2618 = vmatpush3.bf16.msra.mxu0 %v2802_v7  ;;  %2638 = vmatprep.subr.bf16.mxu1 %v2803_v8 }
  0x99   : > { %2619 = vmatprep.subr.bf16.mxu0 %v2803_v8 }
  0x9b   : > { %2646 = vmatpush3.bf16.msra.mxu1 %v2803_v8 }
  0x9c   : > { %2620 = vmatpush3.bf16.msra.mxu0 %v2803_v8  ;;  %2639 = vmatprep.subr.bf16.mxu1 %v2804_v50 }
  0x9d   : > { %2621 = vmatprep.subr.bf16.mxu0 %v2804_v50 }
  0x9f   : > { %2647 = vmatpush3.bf16.msra.mxu1 %v2804_v50 }
  0xa0   : > { %2622 = vmatpush3.bf16.msra.mxu0 %v2804_v50  ;;  %2640 = vmatprep.subr.bf16.mxu1 %v2805_v24 }
  0xa1   : > { %2623 = vmatprep.subr.bf16.mxu0 %v2805_v24 }
  0xa3   : > { %2648 = vmatpush3.bf16.msra.mxu1 %v2805_v24 }
  0xa4   : > { %2624 = vmatpush3.bf16.msra.mxu0 %v2805_v24 }
  0xa6   : > { %2630 = vmatmul.mubr.bf16.vlgmr.msra.gmra.mrb[8].mxu1 %v1749_v41 }
  0xa7   : > { %2626 = vmatmul.mubr.bf16.vlgmr.msra.gmra.mrb[0].mxu0 %v1747_v56 }
 0x159   : > { %v2507_v53 = vpop.f32.mrb[0].mxu1 }
 0x15a   : > { %v850_v48 = vpop.f32.mrb[1].mxu1 }
 0x15b   : > { %v2508_v55 = vpop.f32.mrb[2].mxu1 }
 0x15c   : > { %v853_v43 = vpop.f32.mrb[3].mxu1 }
 0x161   : > { %v2511_v22 = vpop.f32.mrb[4].mxu1 }
 0x162   : > { %v2607_v23 = vpop.f32.mrb[4].mxu0  ;;  %v866_v28 = vpop.f32.mrb[5].mxu1 }
 0x163   : > { %v2653_v14 = vadd.f32 %v2607_v23, %v2511_v22  ;;  %v1667_v18 = vpop.f32.mrb[5].mxu0  ;;  %v2512_v17 = vpop.f32.mrb[6].mxu1 }
 0x164   : > { %v2655_v19 = vadd.f32 %v1667_v18, %v866_v28  ;;  %v2608_v42 = vpop.f32.mrb[6].mxu0  ;;  %v869_v47 = vpop.f32.mrb[7].mxu1 }
 0x165   : > { %v2657_v3 = vadd.f32 %v2608_v42, %v2512_v17  ;;  %v1670_v30 = vpop.f32.mrb[7].mxu0 }
 0x166   : > { %v2659_v44 = vadd.f32 %v1670_v30, %v869_v47 }
 0x179   : > { %v2631_v34 = vpop.f32.mrb[8].mxu1 }
 0x17a   : > { %v2627_v46 = vpop.f32.mrb[0].mxu0  ;;  %v2654_v52 = vadd.f32 %v2653_v14, %v2631_v34  ;;  %v1865_v40 = vpop.f32.mrb[9].mxu1 }
 0x17b   : > { %v2649_v51 = vadd.f32 %v2627_v46, %v2507_v53  ;;  %v1849_v31 = vpop.f32.mrb[1].mxu0  ;;  %v2656_v49 = vadd.f32 %v2655_v19, %v1865_v40  ;;  %v2632_v61 = vpop.f32.mrb[10].mxu1 }
 0x17c   : > { %1894 = vst [vmem:[%s177_s19 + $0x30] sm:$0xff] %v2654_v52  ;;  %v2650_v0 = vadd.f32 %v1849_v31, %v850_v48  ;;  %v2628_v54 = vpop.f32.mrb[2].mxu0  ;;  %v2658_v57 = vadd.f32 %v2657_v3, %v2632_v61  ;;  %v1868_v26 = vpop.f32.mrb[11].mxu1  ;;  %v1915_v16 = vmul.f32 %v2654_v52, %v2654_v52 }
 0x17d   : > { %1890 = vst [vmem:[%s177_s19 + $0x10] sm:$0xff] %v2649_v51  ;;  %1892 = vst [vmem:[%s177_s19 + $0x20] sm:$0xff] %v2656_v49  ;;  %v2651_v21 = vadd.f32 %v2628_v54, %v2508_v55  ;;  %v1852_v27 = vpop.f32.mrb[3].mxu0  ;;  %v2660_v20 = vadd.f32 %v2659_v44, %v1868_v26  ;;  %v1911_v45 = vmul.f32 %v2649_v51, %v2649_v51 }
 0x17e   : > { %1888 = vst [vmem:[%s177_s19] sm:$0xff] %v2650_v0  ;;  %1895 = vst [vmem:[%s177_s19 + $0x38] sm:$0xff] %v2658_v57  ;;  %v2652_v60 = vadd.f32 %v1852_v27, %v853_v43  ;;  %v1909_v62 = vmul.f32 %v2650_v0, %v2650_v0  ;;  %v1913_v11 = vmul.f32 %v2656_v49, %v2656_v49 }
 0x17f   : > { %1891 = vst [vmem:[%s177_s19 + $0x18] sm:$0xff] %v2651_v21  ;;  %1893 = vst [vmem:[%s177_s19 + $0x28] sm:$0xff] %v2660_v20  ;;  %v1912_v7 = vmul.f32 %v2651_v21, %v2651_v21  ;;  %v1914_v25 = vmul.f32 %v2660_v20, %v2660_v20  ;;  %v1916_v9 = vmul.f32 %v2658_v57, %v2658_v57 }
 0x180   : > { %1889 = vst [vmem:[%s177_s19 + $0x8] sm:$0xff] %v2652_v60  ;;  %v1896_v63 = vadd.f32 %v2652_v60, %v2650_v0  ;;  %v1910_v39 = vmul.f32 %v2652_v60, %v2652_v60 }
 0x182   : > { %v1897_v1 = vadd.f32 %v2649_v51, %v1896_v63  ;;  %v1917_v4 = vadd.f32 %v1910_v39, %v1909_v62 }
 0x184   : > { %v1918_v8 = vadd.f32 %v1917_v4, %v1911_v45  ;;  %v1898_v10 = vadd.f32 %v2651_v21, %v1897_v1 }
 0x186   : > { %v1899_v35 = vadd.f32 %v2656_v49, %v1898_v10  ;;  %v1919_v36 = vadd.f32 %v1918_v8, %v1912_v7 }
 0x188   : > { %v1900_v29 = vadd.f32 %v2660_v20, %v1899_v35  ;;  %v1920_v50 = vadd.f32 %v1919_v36, %v1913_v11 }
 0x18a   : > { %v1901_v32 = vadd.f32 %v2654_v52, %v1900_v29  ;;  %v1921_v33 = vadd.f32 %v1920_v50, %v1914_v25 }
 0x18c   : > { %v1902_v58 = vadd.f32 %v2658_v57, %v1901_v32  ;;  %v1922_v5 = vadd.f32 %v1921_v33, %v1915_v16 }
 0x18e   : > { %v1903_v24 = vrot.slane %v1902_v58, 4  ;;  %v1923_v37 = vadd.f32 %v1922_v5, %v1916_v9 }
 0x190   : > { %v1904_v15 = vadd.f32 %v1903_v24, %v1902_v58  ;;  %v1924_v2 = vrot.slane %v1923_v37, 4 }
 0x192   : > { %v1905_v12 = vrot.slane %v1904_v15, 2  ;;  %v1925_v13 = vadd.f32 %v1924_v2, %v1923_v37 }
 0x194   : > { %v1906_v59 = vadd.f32 %v1905_v12, %v1904_v15  ;;  %v1926_v6 = vrot.slane %v1925_v13, 2 }
 0x196   : > { %v1907_v38 = vrot.slane %v1906_v59, 1  ;;  %v1927_v41 = vadd.f32 %v1926_v6, %v1925_v13 }
 0x198   : > { %v1928_v56 = vrot.slane %v1927_v41, 1  ;;  %v1908_v53 = vadd.f32 %v1907_v38, %v1906_v59 }
 0x19a   : > { %v1929_v48 = vadd.f32 %v1928_v56, %v1927_v41 }
 0x19c   : > { %v1931_v55 = vsel %vm1930_vm2, %v1908_v53, %v1929_v48 }
 0x19d   : > { %v1933_v43 = vsel %vm1932_vm3, %v1931_v55, 0.0 }
 0x19e   : > { %1934 = vst [vmem:[%s181_s23] sm:$0xff] %v1933_v43 }
 0x19f PF: > { %s14_s12 = sadd.s32 1, %s2812_s12  }
 0x1a0   : > { %p11_p4 = scmp.ge.s32.totalorder %s14_s12, 4  }
 0x1a2   :  { %13 = sbr.rel (!%p11_p4) target bundleno = 1 (0x1), region = 80 }

</bundles_post_ra>
